<compile_context>
chip_gen: v5e
topology: v5e:2x2
jax: 0.10.0
libtpu: 0.0.40
codegen_flags: <defaults>
</compile_context>

<pallas_src>
import functools
import math

import jax
import jax.numpy as jnp
import numpy as np
from jax.experimental import pallas as pl
from jax.experimental.pallas import tpu as pltpu

# ------------------------- small hyper-parameters --------------------------
B, L, C_IN = 2, 8, 4            # batch, input_len, input_dim
D_MODEL, D_FF = 32, 64
N_HEADS, E_LAYERS = 4, 2
NUM_CLASS = 2
HEAD_DIM = D_MODEL // N_HEADS
LN_EPS = 1e-5                   # torch.nn.LayerNorm default
EMB_IN_PAD = 16                 # 3*C_IN (=12) padded up for an aligned slab
_INV_SQRT2 = np.float32(1.0 / math.sqrt(2.0))
_ATTN_SCALE = np.float32(1.0 / math.sqrt(HEAD_DIM))

# ------------------- packed (1, D) vector-slab row indices ------------------
# per layer: [bo, ln1_g, ln1_b, b2, ln2_g, ln2_b]; then final-norm g/b; then bp
def _vrow(li, j):
    return li * 6 + j


V_NG = E_LAYERS * 6
V_NB = V_NG + 1
V_BP = V_NG + 2
N_VEC = V_BP + 1


# ----------------------------- in-kernel math ------------------------------
def _gelu(x):
    # exact (erf) GELU == torch.nn.GELU() / F.gelu default
    return 0.5 * x * (1.0 + jax.lax.erf(x * _INV_SQRT2))


def _layernorm(x, g, b):
    m = jnp.mean(x, axis=-1, keepdims=True)
    c = x - m
    v = jnp.mean(c * c, axis=-1, keepdims=True)
    return c * jax.lax.rsqrt(v + LN_EPS) * g + b


# ------------------------------ fused kernel --------------------------------
def transformer_kernel(x_ref, emb_ref, wqkv_ref, bqkv_ref, wo_ref,
                       w1_ref, b1_ref, w2_ref, vec_ref, wp_ref, out_ref):
    """Whole forward pass: embedding -> E_LAYERS encoder layers -> head."""
    f32 = jnp.float32

    # --- DataEmbedding: circular conv folded into one matmul (taps + shifted
    # input already packed host-side) + pre-tiled positional embedding.
    h = (jnp.dot(x_ref[...], emb_ref[:EMB_IN_PAD, :],
                 preferred_element_type=f32)
         + emb_ref[EMB_IN_PAD:, :])                               # (B*L, D)
    # dropout omitted: eval-mode identity

    # --- Encoder layers (unrolled; distinct weights per layer) ---------------
    for li in range(E_LAYERS):
        attn = None
        # heads unrolled; weights pre-split per head -> no activation slicing
        for hh in range(N_HEADS):
            q = (jnp.dot(h, wqkv_ref[li, 0, hh, :, :],
                         preferred_element_type=f32)
                 + bqkv_ref[li, 0, hh, :, :])                     # (B*L, E)
            k = (jnp.dot(h, wqkv_ref[li, 1, hh, :, :],
                         preferred_element_type=f32)
                 + bqkv_ref[li, 1, hh, :, :])
            v = (jnp.dot(h, wqkv_ref[li, 2, hh, :, :],
                         preferred_element_type=f32)
                 + bqkv_ref[li, 2, hh, :, :])
            # leading-dim reshapes only (layout preserving)
            q3 = q.reshape(B, L, HEAD_DIM)
            k3 = k.reshape(B, L, HEAD_DIM)
            v3 = v.reshape(B, L, HEAD_DIM)

            s = jnp.einsum('ble,bme->blm', q3, k3,
                           preferred_element_type=f32) * _ATTN_SCALE
            s = s - jnp.max(s, axis=-1, keepdims=True)
            p = jnp.exp(s)
            p = p / jnp.sum(p, axis=-1, keepdims=True)  # exact softmax (torch)
            o = jnp.einsum('blm,bme->ble', p, v3,
                           preferred_element_type=f32).reshape(B * L, HEAD_DIM)

            # head merge + out-projection as an accumulated matmul
            c = jnp.dot(o, wo_ref[li, hh, :, :], preferred_element_type=f32)
            attn = c if attn is None else attn + c
        attn = attn + vec_ref[_vrow(li, 0), :, :]                 # out-proj bias

        # Add & Norm, FFN (pointwise conv == Linear) with GELU, Add & Norm
        x1 = _layernorm(h + attn,
                        vec_ref[_vrow(li, 1), :, :], vec_ref[_vrow(li, 2), :, :])
        y = _gelu(jnp.dot(x1, w1_ref[li, :, :], preferred_element_type=f32)
                  + b1_ref[li, :, :])
        y = (jnp.dot(y, w2_ref[li, :, :], preferred_element_type=f32)
             + vec_ref[_vrow(li, 3), :, :])
        h = _layernorm(x1 + y,
                       vec_ref[_vrow(li, 4), :, :], vec_ref[_vrow(li, 5), :, :])

    # --- Head: final encoder LN + GELU, then logits as accumulated matmuls
    # out[b, n] = sum_l sum_d y[b, l, d] * Wp[l*D+d, n]  (no lane flatten)
    y = _gelu(_layernorm(h, vec_ref[V_NG, :, :], vec_ref[V_NB, :, :]))
    y3 = y.reshape(B, L, D_MODEL)
    logits = None
    for l in range(L):
        c = jnp.dot(y3[:, l, :], wp_ref[l, :, :], preferred_element_type=f32)
        logits = c if logits is None else logits + c
    bp = vec_ref[V_BP, :, :][:, :NUM_CLASS]
    out_ref[...] = logits + bp


# ------------------------------- wrapper ------------------------------------
def transformer_forward(params, x):
    # Circular-shift construction is free wrapper-side prologue work:
    # slab columns are [x(l-1) | x(l) | x(l+1)], padded to EMB_IN_PAD channels.
    xm = jnp.roll(x, 1, axis=1)          # x[(l-1) % L]
    xp = jnp.roll(x, -1, axis=1)         # x[(l+1) % L]
    x_cat = jnp.concatenate([xm, x, xp], axis=-1)                 # (B, L, 3C)
    x_rows = jnp.pad(x_cat,
                     ((0, 0), (0, 0), (0, EMB_IN_PAD - 3 * C_IN))
                     ).reshape(B * L, EMB_IN_PAD)

    args = (x_rows, params["emb"], params["wqkv"], params["bqkv"], params["wo"],
            params["w1"], params["b1"], params["w2"], params["vec"],
            params["wp"])

    return pl.pallas_call(
        transformer_kernel,
        out_shape=jax.ShapeDtypeStruct((B, NUM_CLASS), jnp.float32),
        in_specs=[pl.BlockSpec(memory_space=pltpu.MemorySpace.VMEM)
                  for _ in args],
        out_specs=pl.BlockSpec(memory_space=pltpu.MemorySpace.VMEM),
    )(*args)


# ----------------------------- parameter init -------------------------------
def init_params(key):
    def nrm(k, shape, scale=0.05):
        return scale * jax.random.normal(k, shape, dtype=jnp.float32)

    ks = jax.random.split(key, 4)
    p = {}

    # --- embedding slab: rows [0:16) = padded circular-conv taps (x @ W form),
    #     rows [16:32) = sinusoidal PE tiled over batch (B*L rows).
    wconv = nrm(ks[0], (D_MODEL, C_IN, 3))            # torch Conv1d weight (D,C,3)
    taps = jnp.concatenate([wconv[:, :, k].T for k in range(3)], axis=0)  # (3C, D)
    taps = jnp.pad(taps, ((0, EMB_IN_PAD - 3 * C_IN), (0, 0)))            # (16, D)
    pos = np.arange(L, dtype=np.float32)[:, None]
    div = np.exp(np.arange(0, D_MODEL, 2, dtype=np.float32)
                 * -(math.log(10000.0) / D_MODEL))
    pe = np.zeros((L, D_MODEL), np.float32)
    pe[:, 0::2] = np.sin(pos * div)
    pe[:, 1::2] = np.cos(pos * div)
    pe_tiled = jnp.tile(jnp.asarray(pe), (B, 1))                          # (B*L, D)
    p["emb"] = jnp.concatenate([taps, pe_tiled], axis=0)                  # (32, D)

    # --- per-layer weights, pre-split per head so the kernel never slices
    wqkv_l, bqkv_l, wo_l, w1_l, b1_l, w2_l = [], [], [], [], [], []
    vec_rows = []
    ones = jnp.ones((1, D_MODEL), jnp.float32)
    zeros = jnp.zeros((1, D_MODEL), jnp.float32)
    for lk in jax.random.split(ks[1], E_LAYERS):
        kk = jax.random.split(lk, 12)
        wq, bq = nrm(kk[0], (D_MODEL, D_MODEL)), nrm(kk[1], (1, D_MODEL))
        wk, bk = nrm(kk[2], (D_MODEL, D_MODEL)), nrm(kk[3], (1, D_MODEL))
        wv, bv = nrm(kk[4], (D_MODEL, D_MODEL)), nrm(kk[5], (1, D_MODEL))
        wo, bo = nrm(kk[6], (D_MODEL, D_MODEL)), nrm(kk[7], (1, D_MODEL))
        # head hh uses columns [hh*E, (hh+1)*E) of Wq/Wk/Wv (x @ W form)
        wqkv_l.append(jnp.stack([
            jnp.stack([w[:, hh * HEAD_DIM:(hh + 1) * HEAD_DIM]
                       for hh in range(N_HEADS)], axis=0)
            for w in (wq, wk, wv)], axis=0))                   # (3, H, D, E)
        bqkv_l.append(jnp.stack([
            jnp.stack([bvec[:, hh * HEAD_DIM:(hh + 1) * HEAD_DIM]
                       for hh in range(N_HEADS)], axis=0)
            for bvec in (bq, bk, bv)], axis=0))                # (3, H, 1, E)
        # head hh's out-projection uses rows [hh*E, (hh+1)*E) of Wo
        wo_l.append(jnp.stack([wo[hh * HEAD_DIM:(hh + 1) * HEAD_DIM, :]
                               for hh in range(N_HEADS)], axis=0))  # (H, E, D)
        w1_l.append(nrm(kk[8], (D_MODEL, D_FF)))
        b1_l.append(nrm(kk[9], (1, D_FF)))
        w2_l.append(nrm(kk[10], (D_FF, D_MODEL)))
        b2 = nrm(kk[11], (1, D_MODEL))
        vec_rows += [bo, ones, zeros, b2, ones, zeros]   # bo, g1, b1n, b2, g2, b2n

    p["wqkv"] = jnp.stack(wqkv_l, axis=0)   # (E_LAYERS, 3, H, D, E)
    p["bqkv"] = jnp.stack(bqkv_l, axis=0)   # (E_LAYERS, 3, H, 1, E)
    p["wo"] = jnp.stack(wo_l, axis=0)       # (E_LAYERS, H, E, D)
    p["w1"] = jnp.stack(w1_l, axis=0)       # (E_LAYERS, D, D_FF)
    p["b1"] = jnp.stack(b1_l, axis=0)       # (E_LAYERS, 1, D_FF)
    p["w2"] = jnp.stack(w2_l, axis=0)       # (E_LAYERS, D_FF, D)

    # final encoder norm + classifier bias (lane-padded to D) in the vec slab
    bp = nrm(ks[3], (1, NUM_CLASS))
    vec_rows += [ones, zeros, jnp.pad(bp, ((0, 0), (0, D_MODEL - NUM_CLASS)))]
    p["vec"] = jnp.stack(vec_rows, axis=0)  # (N_VEC, 1, D)
    assert p["vec"].shape[0] == N_VEC

    # classifier weight Linear(L*D -> num_class), reshaped to (L, D, num_class)
    p["wp"] = nrm(ks[2], (L * D_MODEL, NUM_CLASS)).reshape(L, D_MODEL, NUM_CLASS)
    return p


# --------------------------------- main --------------------------------------
if __name__ == "__main__":
    key = jax.random.PRNGKey(0)
    pkey, xkey = jax.random.split(key)
    params = init_params(pkey)
    x_enc = jax.random.normal(xkey, (B, L, C_IN), dtype=jnp.float32)

    fwd = jax.jit(functools.partial(transformer_forward, params))
    out = fwd(x_enc)
    jax.block_until_ready(out)
    assert out.shape == (B, NUM_CLASS) and out.dtype == jnp.float32
    assert bool(jnp.all(jnp.isfinite(out)))
    print("KERNEL_OK")
</pallas_src>

<mosaic_0001>
module attributes {stable_mosaic.version = 11 : i64} {
  func.func @transformer_kernel(%arg0: memref<16x16xf32, #tpu.memory_space<vmem>>, %arg1: memref<32x32xf32, #tpu.memory_space<vmem>>, %arg2: memref<2x3x4x32x8xf32, #tpu.memory_space<vmem>>, %arg3: memref<2x3x4x1x8xf32, #tpu.memory_space<vmem>>, %arg4: memref<2x4x8x32xf32, #tpu.memory_space<vmem>>, %arg5: memref<2x32x64xf32, #tpu.memory_space<vmem>>, %arg6: memref<2x1x64xf32, #tpu.memory_space<vmem>>, %arg7: memref<2x64x32xf32, #tpu.memory_space<vmem>>, %arg8: memref<15x1x32xf32, #tpu.memory_space<vmem>>, %arg9: memref<8x32x2xf32, #tpu.memory_space<vmem>>, %arg10: memref<2x2xf32, #tpu.memory_space<vmem>>) attributes {dimension_semantics = [], scalar_prefetch = 0 : i64, scratch_operands = 0 : i64, tpu.core_type = #tpu.core_type<tc>} {
    %c0 = arith.constant 0 : index
    %c0_0 = arith.constant 0 : index
    %0 = vector.load %arg0[%c0, %c0_0] : memref<16x16xf32, #tpu.memory_space<vmem>>, vector<16x16xf32>
    %c0_1 = arith.constant 0 : index
    %c0_2 = arith.constant 0 : index
    %1 = vector.load %arg1[%c0_1, %c0_2] : memref<32x32xf32, #tpu.memory_space<vmem>>, vector<16x32xf32>
    %cst = arith.constant dense<0.000000e+00> : vector<16x32xf32>
    %2 = tpu.matmul %0, %1, %cst {dimension_numbers = #tpu.dot_dimension_numbers<[1], [0], [0], [1], [0, 0, 1, 1], [], []>} : vector<16x16xf32>, vector<16x32xf32>, vector<16x32xf32> -> vector<16x32xf32>
    %c16 = arith.constant 16 : index
    %c0_3 = arith.constant 0 : index
    %3 = vector.load %arg1[%c16, %c0_3] : memref<32x32xf32, #tpu.memory_space<vmem>>, vector<16x32xf32>
    %4 = arith.addf %2, %3 : vector<16x32xf32>
    %c0_4 = arith.constant 0 : index
    %c0_5 = arith.constant 0 : index
    %c0_6 = arith.constant 0 : index
    %c0_7 = arith.constant 0 : index
    %c0_8 = arith.constant 0 : index
    %5 = vector.load %arg2[%c0_4, %c0_5, %c0_6, %c0_7, %c0_8] : memref<2x3x4x32x8xf32, #tpu.memory_space<vmem>>, vector<1x1x1x32x8xf32>
    %6 = vector.shape_cast %5 : vector<1x1x1x32x8xf32> to vector<32x8xf32>
    %cst_9 = arith.constant dense<0.000000e+00> : vector<16x8xf32>
    %7 = tpu.matmul %4, %6, %cst_9 {dimension_numbers = #tpu.dot_dimension_numbers<[1], [0], [0], [1], [0, 0, 1, 1], [], []>} : vector<16x32xf32>, vector<32x8xf32>, vector<16x8xf32> -> vector<16x8xf32>
    %c0_10 = arith.constant 0 : index
    %c0_11 = arith.constant 0 : index
    %c0_12 = arith.constant 0 : index
    %c0_13 = arith.constant 0 : index
    %c0_14 = arith.constant 0 : index
    %8 = vector.load %arg3[%c0_10, %c0_11, %c0_12, %c0_13, %c0_14] : memref<2x3x4x1x8xf32, #tpu.memory_space<vmem>>, vector<1x1x1x1x8xf32>
    %9 = vector.shape_cast %8 : vector<1x1x1x1x8xf32> to vector<1x8xf32>
    %10 = vector.broadcast %9 : vector<1x8xf32> to vector<16x8xf32>
    %11 = arith.addf %7, %10 : vector<16x8xf32>
    %c0_15 = arith.constant 0 : index
    %c1 = arith.constant 1 : index
    %c0_16 = arith.constant 0 : index
    %c0_17 = arith.constant 0 : index
    %c0_18 = arith.constant 0 : index
    %12 = vector.load %arg2[%c0_15, %c1, %c0_16, %c0_17, %c0_18] : memref<2x3x4x32x8xf32, #tpu.memory_space<vmem>>, vector<1x1x1x32x8xf32>
    %13 = vector.shape_cast %12 : vector<1x1x1x32x8xf32> to vector<32x8xf32>
    %cst_19 = arith.constant dense<0.000000e+00> : vector<16x8xf32>
    %14 = tpu.matmul %4, %13, %cst_19 {dimension_numbers = #tpu.dot_dimension_numbers<[1], [0], [0], [1], [0, 0, 1, 1], [], []>} : vector<16x32xf32>, vector<32x8xf32>, vector<16x8xf32> -> vector<16x8xf32>
    %c0_20 = arith.constant 0 : index
    %c1_21 = arith.constant 1 : index
    %c0_22 = arith.constant 0 : index
    %c0_23 = arith.constant 0 : index
    %c0_24 = arith.constant 0 : index
    %15 = vector.load %arg3[%c0_20, %c1_21, %c0_22, %c0_23, %c0_24] : memref<2x3x4x1x8xf32, #tpu.memory_space<vmem>>, vector<1x1x1x1x8xf32>
    %16 = vector.shape_cast %15 : vector<1x1x1x1x8xf32> to vector<1x8xf32>
    %17 = vector.broadcast %16 : vector<1x8xf32> to vector<16x8xf32>
    %18 = arith.addf %14, %17 : vector<16x8xf32>
    %c0_25 = arith.constant 0 : index
    %c2 = arith.constant 2 : index
    %c0_26 = arith.constant 0 : index
    %c0_27 = arith.constant 0 : index
    %c0_28 = arith.constant 0 : index
    %19 = vector.load %arg2[%c0_25, %c2, %c0_26, %c0_27, %c0_28] : memref<2x3x4x32x8xf32, #tpu.memory_space<vmem>>, vector<1x1x1x32x8xf32>
    %20 = vector.shape_cast %19 : vector<1x1x1x32x8xf32> to vector<32x8xf32>
    %cst_29 = arith.constant dense<0.000000e+00> : vector<16x8xf32>
    %21 = tpu.matmul %4, %20, %cst_29 {dimension_numbers = #tpu.dot_dimension_numbers<[1], [0], [0], [1], [0, 0, 1, 1], [], []>} : vector<16x32xf32>, vector<32x8xf32>, vector<16x8xf32> -> vector<16x8xf32>
    %c0_30 = arith.constant 0 : index
    %c2_31 = arith.constant 2 : index
    %c0_32 = arith.constant 0 : index
    %c0_33 = arith.constant 0 : index
    %c0_34 = arith.constant 0 : index
    %22 = vector.load %arg3[%c0_30, %c2_31, %c0_32, %c0_33, %c0_34] : memref<2x3x4x1x8xf32, #tpu.memory_space<vmem>>, vector<1x1x1x1x8xf32>
    %23 = vector.shape_cast %22 : vector<1x1x1x1x8xf32> to vector<1x8xf32>
    %24 = vector.broadcast %23 : vector<1x8xf32> to vector<16x8xf32>
    %25 = arith.addf %21, %24 : vector<16x8xf32>
    %26 = vector.shape_cast %11 : vector<16x8xf32> to vector<2x8x8xf32>
    %27 = vector.shape_cast %18 : vector<16x8xf32> to vector<2x8x8xf32>
    %28 = vector.shape_cast %25 : vector<16x8xf32> to vector<2x8x8xf32>
    "tpu.trace_start"() <{level = 10 : i32, message = "ble,bme->blm"}> : () -> ()
    %cst_35 = arith.constant dense<0.000000e+00> : vector<2x8x8xf32>
    %29 = tpu.matmul %26, %27, %cst_35 {dimension_numbers = #tpu.dot_dimension_numbers<[2], [2], [1], [1], [0, 0, 0, 1, 1, 1], [0], [0]>} : vector<2x8x8xf32>, vector<2x8x8xf32>, vector<2x8x8xf32> -> vector<2x8x8xf32>
    "tpu.trace_stop"() : () -> ()
    %cst_36 = arith.constant 0.353553385 : f32
    %30 = vector.broadcast %cst_36 : f32 to vector<2x8x8xf32>
    %31 = arith.mulf %29, %30 : vector<2x8x8xf32>
    %cst_37 = arith.constant dense<0xFF800000> : vector<2x8xf32>
    %32 = vector.multi_reduction <maximumf>, %31, %cst_37 [2] : vector<2x8x8xf32> to vector<2x8xf32>
    %33 = vector.shape_cast %32 : vector<2x8xf32> to vector<2x8x1xf32>
    %34 = vector.broadcast %33 : vector<2x8x1xf32> to vector<2x8x8xf32>
    %35 = arith.subf %31, %34 : vector<2x8x8xf32>
    %36 = math.exp %35 : vector<2x8x8xf32>
    %cst_38 = arith.constant dense<0.000000e+00> : vector<2x8xf32>
    %37 = vector.multi_reduction <add>, %36, %cst_38 [2] : vector<2x8x8xf32> to vector<2x8xf32>
    %38 = vector.shape_cast %37 : vector<2x8xf32> to vector<2x8x1xf32>
    %39 = vector.broadcast %38 : vector<2x8x1xf32> to vector<2x8x8xf32>
    %40 = arith.divf %36, %39 : vector<2x8x8xf32>
    "tpu.trace_start"() <{level = 10 : i32, message = "blm,bme->ble"}> : () -> ()
    %cst_39 = arith.constant dense<0.000000e+00> : vector<2x8x8xf32>
    %41 = tpu.matmul %40, %28, %cst_39 {dimension_numbers = #tpu.dot_dimension_numbers<[2], [1], [1], [2], [0, 0, 0, 1, 1, 2], [0], [0]>} : vector<2x8x8xf32>, vector<2x8x8xf32>, vector<2x8x8xf32> -> vector<2x8x8xf32>
    "tpu.trace_stop"() : () -> ()
    %42 = vector.shape_cast %41 : vector<2x8x8xf32> to vector<16x8xf32>
    %c0_40 = arith.constant 0 : index
    %c0_41 = arith.constant 0 : index
    %c0_42 = arith.constant 0 : index
    %c0_43 = arith.constant 0 : index
    %43 = vector.load %arg4[%c0_40, %c0_41, %c0_42, %c0_43] : memref<2x4x8x32xf32, #tpu.memory_space<vmem>>, vector<1x1x8x32xf32>
    %44 = vector.shape_cast %43 : vector<1x1x8x32xf32> to vector<8x32xf32>
    %cst_44 = arith.constant dense<0.000000e+00> : vector<16x32xf32>
    %45 = tpu.matmul %42, %44, %cst_44 {dimension_numbers = #tpu.dot_dimension_numbers<[1], [0], [0], [1], [0, 0, 1, 1], [], []>} : vector<16x8xf32>, vector<8x32xf32>, vector<16x32xf32> -> vector<16x32xf32>
    %c0_45 = arith.constant 0 : index
    %c0_46 = arith.constant 0 : index
    %c1_47 = arith.constant 1 : index
    %c0_48 = arith.constant 0 : index
    %c0_49 = arith.constant 0 : index
    %46 = vector.load %arg2[%c0_45, %c0_46, %c1_47, %c0_48, %c0_49] : memref<2x3x4x32x8xf32, #tpu.memory_space<vmem>>, vector<1x1x1x32x8xf32>
    %47 = vector.shape_cast %46 : vector<1x1x1x32x8xf32> to vector<32x8xf32>
    %cst_50 = arith.constant dense<0.000000e+00> : vector<16x8xf32>
    %48 = tpu.matmul %4, %47, %cst_50 {dimension_numbers = #tpu.dot_dimension_numbers<[1], [0], [0], [1], [0, 0, 1, 1], [], []>} : vector<16x32xf32>, vector<32x8xf32>, vector<16x8xf32> -> vector<16x8xf32>
    %c0_51 = arith.constant 0 : index
    %c0_52 = arith.constant 0 : index
    %c1_53 = arith.constant 1 : index
    %c0_54 = arith.constant 0 : index
    %c0_55 = arith.constant 0 : index
    %49 = vector.load %arg3[%c0_51, %c0_52, %c1_53, %c0_54, %c0_55] : memref<2x3x4x1x8xf32, #tpu.memory_space<vmem>>, vector<1x1x1x1x8xf32>
    %50 = vector.shape_cast %49 : vector<1x1x1x1x8xf32> to vector<1x8xf32>
    %51 = vector.broadcast %50 : vector<1x8xf32> to vector<16x8xf32>
    %52 = arith.addf %48, %51 : vector<16x8xf32>
    %c0_56 = arith.constant 0 : index
    %c1_57 = arith.constant 1 : index
    %c1_58 = arith.constant 1 : index
    %c0_59 = arith.constant 0 : index
    %c0_60 = arith.constant 0 : index
    %53 = vector.load %arg2[%c0_56, %c1_57, %c1_58, %c0_59, %c0_60] : memref<2x3x4x32x8xf32, #tpu.memory_space<vmem>>, vector<1x1x1x32x8xf32>
    %54 = vector.shape_cast %53 : vector<1x1x1x32x8xf32> to vector<32x8xf32>
    %cst_61 = arith.constant dense<0.000000e+00> : vector<16x8xf32>
    %55 = tpu.matmul %4, %54, %cst_61 {dimension_numbers = #tpu.dot_dimension_numbers<[1], [0], [0], [1], [0, 0, 1, 1], [], []>} : vector<16x32xf32>, vector<32x8xf32>, vector<16x8xf32> -> vector<16x8xf32>
    %c0_62 = arith.constant 0 : index
    %c1_63 = arith.constant 1 : index
    %c1_64 = arith.constant 1 : index
    %c0_65 = arith.constant 0 : index
    %c0_66 = arith.constant 0 : index
    %56 = vector.load %arg3[%c0_62, %c1_63, %c1_64, %c0_65, %c0_66] : memref<2x3x4x1x8xf32, #tpu.memory_space<vmem>>, vector<1x1x1x1x8xf32>
    %57 = vector.shape_cast %56 : vector<1x1x1x1x8xf32> to vector<1x8xf32>
    %58 = vector.broadcast %57 : vector<1x8xf32> to vector<16x8xf32>
    %59 = arith.addf %55, %58 : vector<16x8xf32>
    %c0_67 = arith.constant 0 : index
    %c2_68 = arith.constant 2 : index
    %c1_69 = arith.constant 1 : index
    %c0_70 = arith.constant 0 : index
    %c0_71 = arith.constant 0 : index
    %60 = vector.load %arg2[%c0_67, %c2_68, %c1_69, %c0_70, %c0_71] : memref<2x3x4x32x8xf32, #tpu.memory_space<vmem>>, vector<1x1x1x32x8xf32>
    %61 = vector.shape_cast %60 : vector<1x1x1x32x8xf32> to vector<32x8xf32>
    %cst_72 = arith.constant dense<0.000000e+00> : vector<16x8xf32>
    %62 = tpu.matmul %4, %61, %cst_72 {dimension_numbers = #tpu.dot_dimension_numbers<[1], [0], [0], [1], [0, 0, 1, 1], [], []>} : vector<16x32xf32>, vector<32x8xf32>, vector<16x8xf32> -> vector<16x8xf32>
    %c0_73 = arith.constant 0 : index
    %c2_74 = arith.constant 2 : index
    %c1_75 = arith.constant 1 : index
    %c0_76 = arith.constant 0 : index
    %c0_77 = arith.constant 0 : index
    %63 = vector.load %arg3[%c0_73, %c2_74, %c1_75, %c0_76, %c0_77] : memref<2x3x4x1x8xf32, #tpu.memory_space<vmem>>, vector<1x1x1x1x8xf32>
    %64 = vector.shape_cast %63 : vector<1x1x1x1x8xf32> to vector<1x8xf32>
    %65 = vector.broadcast %64 : vector<1x8xf32> to vector<16x8xf32>
    %66 = arith.addf %62, %65 : vector<16x8xf32>
    %67 = vector.shape_cast %52 : vector<16x8xf32> to vector<2x8x8xf32>
    %68 = vector.shape_cast %59 : vector<16x8xf32> to vector<2x8x8xf32>
    %69 = vector.shape_cast %66 : vector<16x8xf32> to vector<2x8x8xf32>
    "tpu.trace_start"() <{level = 10 : i32, message = "ble,bme->blm"}> : () -> ()
    %cst_78 = arith.constant dense<0.000000e+00> : vector<2x8x8xf32>
    %70 = tpu.matmul %67, %68, %cst_78 {dimension_numbers = #tpu.dot_dimension_numbers<[2], [2], [1], [1], [0, 0, 0, 1, 1, 1], [0], [0]>} : vector<2x8x8xf32>, vector<2x8x8xf32>, vector<2x8x8xf32> -> vector<2x8x8xf32>
    "tpu.trace_stop"() : () -> ()
    %cst_79 = arith.constant 0.353553385 : f32
    %71 = vector.broadcast %cst_79 : f32 to vector<2x8x8xf32>
    %72 = arith.mulf %70, %71 : vector<2x8x8xf32>
    %cst_80 = arith.constant dense<0xFF800000> : vector<2x8xf32>
    %73 = vector.multi_reduction <maximumf>, %72, %cst_80 [2] : vector<2x8x8xf32> to vector<2x8xf32>
    %74 = vector.shape_cast %73 : vector<2x8xf32> to vector<2x8x1xf32>
    %75 = vector.broadcast %74 : vector<2x8x1xf32> to vector<2x8x8xf32>
    %76 = arith.subf %72, %75 : vector<2x8x8xf32>
    %77 = math.exp %76 : vector<2x8x8xf32>
    %cst_81 = arith.constant dense<0.000000e+00> : vector<2x8xf32>
    %78 = vector.multi_reduction <add>, %77, %cst_81 [2] : vector<2x8x8xf32> to vector<2x8xf32>
    %79 = vector.shape_cast %78 : vector<2x8xf32> to vector<2x8x1xf32>
    %80 = vector.broadcast %79 : vector<2x8x1xf32> to vector<2x8x8xf32>
    %81 = arith.divf %77, %80 : vector<2x8x8xf32>
    "tpu.trace_start"() <{level = 10 : i32, message = "blm,bme->ble"}> : () -> ()
    %cst_82 = arith.constant dense<0.000000e+00> : vector<2x8x8xf32>
    %82 = tpu.matmul %81, %69, %cst_82 {dimension_numbers = #tpu.dot_dimension_numbers<[2], [1], [1], [2], [0, 0, 0, 1, 1, 2], [0], [0]>} : vector<2x8x8xf32>, vector<2x8x8xf32>, vector<2x8x8xf32> -> vector<2x8x8xf32>
    "tpu.trace_stop"() : () -> ()
    %83 = vector.shape_cast %82 : vector<2x8x8xf32> to vector<16x8xf32>
    %c0_83 = arith.constant 0 : index
    %c1_84 = arith.constant 1 : index
    %c0_85 = arith.constant 0 : index
    %c0_86 = arith.constant 0 : index
    %84 = vector.load %arg4[%c0_83, %c1_84, %c0_85, %c0_86] : memref<2x4x8x32xf32, #tpu.memory_space<vmem>>, vector<1x1x8x32xf32>
    %85 = vector.shape_cast %84 : vector<1x1x8x32xf32> to vector<8x32xf32>
    %cst_87 = arith.constant dense<0.000000e+00> : vector<16x32xf32>
    %86 = tpu.matmul %83, %85, %cst_87 {dimension_numbers = #tpu.dot_dimension_numbers<[1], [0], [0], [1], [0, 0, 1, 1], [], []>} : vector<16x8xf32>, vector<8x32xf32>, vector<16x32xf32> -> vector<16x32xf32>
    %87 = arith.addf %45, %86 : vector<16x32xf32>
    %c0_88 = arith.constant 0 : index
    %c0_89 = arith.constant 0 : index
    %c2_90 = arith.constant 2 : index
    %c0_91 = arith.constant 0 : index
    %c0_92 = arith.constant 0 : index
    %88 = vector.load %arg2[%c0_88, %c0_89, %c2_90, %c0_91, %c0_92] : memref<2x3x4x32x8xf32, #tpu.memory_space<vmem>>, vector<1x1x1x32x8xf32>
    %89 = vector.shape_cast %88 : vector<1x1x1x32x8xf32> to vector<32x8xf32>
    %cst_93 = arith.constant dense<0.000000e+00> : vector<16x8xf32>
    %90 = tpu.matmul %4, %89, %cst_93 {dimension_numbers = #tpu.dot_dimension_numbers<[1], [0], [0], [1], [0, 0, 1, 1], [], []>} : vector<16x32xf32>, vector<32x8xf32>, vector<16x8xf32> -> vector<16x8xf32>
    %c0_94 = arith.constant 0 : index
    %c0_95 = arith.constant 0 : index
    %c2_96 = arith.constant 2 : index
    %c0_97 = arith.constant 0 : index
    %c0_98 = arith.constant 0 : index
    %91 = vector.load %arg3[%c0_94, %c0_95, %c2_96, %c0_97, %c0_98] : memref<2x3x4x1x8xf32, #tpu.memory_space<vmem>>, vector<1x1x1x1x8xf32>
    %92 = vector.shape_cast %91 : vector<1x1x1x1x8xf32> to vector<1x8xf32>
    %93 = vector.broadcast %92 : vector<1x8xf32> to vector<16x8xf32>
    %94 = arith.addf %90, %93 : vector<16x8xf32>
    %c0_99 = arith.constant 0 : index
    %c1_100 = arith.constant 1 : index
    %c2_101 = arith.constant 2 : index
    %c0_102 = arith.constant 0 : index
    %c0_103 = arith.constant 0 : index
    %95 = vector.load %arg2[%c0_99, %c1_100, %c2_101, %c0_102, %c0_103] : memref<2x3x4x32x8xf32, #tpu.memory_space<vmem>>, vector<1x1x1x32x8xf32>
    %96 = vector.shape_cast %95 : vector<1x1x1x32x8xf32> to vector<32x8xf32>
    %cst_104 = arith.constant dense<0.000000e+00> : vector<16x8xf32>
    %97 = tpu.matmul %4, %96, %cst_104 {dimension_numbers = #tpu.dot_dimension_numbers<[1], [0], [0], [1], [0, 0, 1, 1], [], []>} : vector<16x32xf32>, vector<32x8xf32>, vector<16x8xf32> -> vector<16x8xf32>
    %c0_105 = arith.constant 0 : index
    %c1_106 = arith.constant 1 : index
    %c2_107 = arith.constant 2 : index
    %c0_108 = arith.constant 0 : index
    %c0_109 = arith.constant 0 : index
    %98 = vector.load %arg3[%c0_105, %c1_106, %c2_107, %c0_108, %c0_109] : memref<2x3x4x1x8xf32, #tpu.memory_space<vmem>>, vector<1x1x1x1x8xf32>
    %99 = vector.shape_cast %98 : vector<1x1x1x1x8xf32> to vector<1x8xf32>
    %100 = vector.broadcast %99 : vector<1x8xf32> to vector<16x8xf32>
    %101 = arith.addf %97, %100 : vector<16x8xf32>
    %c0_110 = arith.constant 0 : index
    %c2_111 = arith.constant 2 : index
    %c2_112 = arith.constant 2 : index
    %c0_113 = arith.constant 0 : index
    %c0_114 = arith.constant 0 : index
    %102 = vector.load %arg2[%c0_110, %c2_111, %c2_112, %c0_113, %c0_114] : memref<2x3x4x32x8xf32, #tpu.memory_space<vmem>>, vector<1x1x1x32x8xf32>
    %103 = vector.shape_cast %102 : vector<1x1x1x32x8xf32> to vector<32x8xf32>
    %cst_115 = arith.constant dense<0.000000e+00> : vector<16x8xf32>
    %104 = tpu.matmul %4, %103, %cst_115 {dimension_numbers = #tpu.dot_dimension_numbers<[1], [0], [0], [1], [0, 0, 1, 1], [], []>} : vector<16x32xf32>, vector<32x8xf32>, vector<16x8xf32> -> vector<16x8xf32>
    %c0_116 = arith.constant 0 : index
    %c2_117 = arith.constant 2 : index
    %c2_118 = arith.constant 2 : index
    %c0_119 = arith.constant 0 : index
    %c0_120 = arith.constant 0 : index
    %105 = vector.load %arg3[%c0_116, %c2_117, %c2_118, %c0_119, %c0_120] : memref<2x3x4x1x8xf32, #tpu.memory_space<vmem>>, vector<1x1x1x1x8xf32>
    %106 = vector.shape_cast %105 : vector<1x1x1x1x8xf32> to vector<1x8xf32>
    %107 = vector.broadcast %106 : vector<1x8xf32> to vector<16x8xf32>
    %108 = arith.addf %104, %107 : vector<16x8xf32>
    %109 = vector.shape_cast %94 : vector<16x8xf32> to vector<2x8x8xf32>
    %110 = vector.shape_cast %101 : vector<16x8xf32> to vector<2x8x8xf32>
    %111 = vector.shape_cast %108 : vector<16x8xf32> to vector<2x8x8xf32>
    "tpu.trace_start"() <{level = 10 : i32, message = "ble,bme->blm"}> : () -> ()
    %cst_121 = arith.constant dense<0.000000e+00> : vector<2x8x8xf32>
    %112 = tpu.matmul %109, %110, %cst_121 {dimension_numbers = #tpu.dot_dimension_numbers<[2], [2], [1], [1], [0, 0, 0, 1, 1, 1], [0], [0]>} : vector<2x8x8xf32>, vector<2x8x8xf32>, vector<2x8x8xf32> -> vector<2x8x8xf32>
    "tpu.trace_stop"() : () -> ()
    %cst_122 = arith.constant 0.353553385 : f32
    %113 = vector.broadcast %cst_122 : f32 to vector<2x8x8xf32>
    %114 = arith.mulf %112, %113 : vector<2x8x8xf32>
    %cst_123 = arith.constant dense<0xFF800000> : vector<2x8xf32>
    %115 = vector.multi_reduction <maximumf>, %114, %cst_123 [2] : vector<2x8x8xf32> to vector<2x8xf32>
    %116 = vector.shape_cast %115 : vector<2x8xf32> to vector<2x8x1xf32>
    %117 = vector.broadcast %116 : vector<2x8x1xf32> to vector<2x8x8xf32>
    %118 = arith.subf %114, %117 : vector<2x8x8xf32>
    %119 = math.exp %118 : vector<2x8x8xf32>
    %cst_124 = arith.constant dense<0.000000e+00> : vector<2x8xf32>
    %120 = vector.multi_reduction <add>, %119, %cst_124 [2] : vector<2x8x8xf32> to vector<2x8xf32>
    %121 = vector.shape_cast %120 : vector<2x8xf32> to vector<2x8x1xf32>
    %122 = vector.broadcast %121 : vector<2x8x1xf32> to vector<2x8x8xf32>
    %123 = arith.divf %119, %122 : vector<2x8x8xf32>
    "tpu.trace_start"() <{level = 10 : i32, message = "blm,bme->ble"}> : () -> ()
    %cst_125 = arith.constant dense<0.000000e+00> : vector<2x8x8xf32>
    %124 = tpu.matmul %123, %111, %cst_125 {dimension_numbers = #tpu.dot_dimension_numbers<[2], [1], [1], [2], [0, 0, 0, 1, 1, 2], [0], [0]>} : vector<2x8x8xf32>, vector<2x8x8xf32>, vector<2x8x8xf32> -> vector<2x8x8xf32>
    "tpu.trace_stop"() : () -> ()
    %125 = vector.shape_cast %124 : vector<2x8x8xf32> to vector<16x8xf32>
    %c0_126 = arith.constant 0 : index
    %c2_127 = arith.constant 2 : index
    %c0_128 = arith.constant 0 : index
    %c0_129 = arith.constant 0 : index
    %126 = vector.load %arg4[%c0_126, %c2_127, %c0_128, %c0_129] : memref<2x4x8x32xf32, #tpu.memory_space<vmem>>, vector<1x1x8x32xf32>
    %127 = vector.shape_cast %126 : vector<1x1x8x32xf32> to vector<8x32xf32>
    %cst_130 = arith.constant dense<0.000000e+00> : vector<16x32xf32>
    %128 = tpu.matmul %125, %127, %cst_130 {dimension_numbers = #tpu.dot_dimension_numbers<[1], [0], [0], [1], [0, 0, 1, 1], [], []>} : vector<16x8xf32>, vector<8x32xf32>, vector<16x32xf32> -> vector<16x32xf32>
    %129 = arith.addf %87, %128 : vector<16x32xf32>
    %c0_131 = arith.constant 0 : index
    %c0_132 = arith.constant 0 : index
    %c3 = arith.constant 3 : index
    %c0_133 = arith.constant 0 : index
    %c0_134 = arith.constant 0 : index
    %130 = vector.load %arg2[%c0_131, %c0_132, %c3, %c0_133, %c0_134] : memref<2x3x4x32x8xf32, #tpu.memory_space<vmem>>, vector<1x1x1x32x8xf32>
    %131 = vector.shape_cast %130 : vector<1x1x1x32x8xf32> to vector<32x8xf32>
    %cst_135 = arith.constant dense<0.000000e+00> : vector<16x8xf32>
    %132 = tpu.matmul %4, %131, %cst_135 {dimension_numbers = #tpu.dot_dimension_numbers<[1], [0], [0], [1], [0, 0, 1, 1], [], []>} : vector<16x32xf32>, vector<32x8xf32>, vector<16x8xf32> -> vector<16x8xf32>
    %c0_136 = arith.constant 0 : index
    %c0_137 = arith.constant 0 : index
    %c3_138 = arith.constant 3 : index
    %c0_139 = arith.constant 0 : index
    %c0_140 = arith.constant 0 : index
    %133 = vector.load %arg3[%c0_136, %c0_137, %c3_138, %c0_139, %c0_140] : memref<2x3x4x1x8xf32, #tpu.memory_space<vmem>>, vector<1x1x1x1x8xf32>
    %134 = vector.shape_cast %133 : vector<1x1x1x1x8xf32> to vector<1x8xf32>
    %135 = vector.broadcast %134 : vector<1x8xf32> to vector<16x8xf32>
    %136 = arith.addf %132, %135 : vector<16x8xf32>
    %c0_141 = arith.constant 0 : index
    %c1_142 = arith.constant 1 : index
    %c3_143 = arith.constant 3 : index
    %c0_144 = arith.constant 0 : index
    %c0_145 = arith.constant 0 : index
    %137 = vector.load %arg2[%c0_141, %c1_142, %c3_143, %c0_144, %c0_145] : memref<2x3x4x32x8xf32, #tpu.memory_space<vmem>>, vector<1x1x1x32x8xf32>
    %138 = vector.shape_cast %137 : vector<1x1x1x32x8xf32> to vector<32x8xf32>
    %cst_146 = arith.constant dense<0.000000e+00> : vector<16x8xf32>
    %139 = tpu.matmul %4, %138, %cst_146 {dimension_numbers = #tpu.dot_dimension_numbers<[1], [0], [0], [1], [0, 0, 1, 1], [], []>} : vector<16x32xf32>, vector<32x8xf32>, vector<16x8xf32> -> vector<16x8xf32>
    %c0_147 = arith.constant 0 : index
    %c1_148 = arith.constant 1 : index
    %c3_149 = arith.constant 3 : index
    %c0_150 = arith.constant 0 : index
    %c0_151 = arith.constant 0 : index
    %140 = vector.load %arg3[%c0_147, %c1_148, %c3_149, %c0_150, %c0_151] : memref<2x3x4x1x8xf32, #tpu.memory_space<vmem>>, vector<1x1x1x1x8xf32>
    %141 = vector.shape_cast %140 : vector<1x1x1x1x8xf32> to vector<1x8xf32>
    %142 = vector.broadcast %141 : vector<1x8xf32> to vector<16x8xf32>
    %143 = arith.addf %139, %142 : vector<16x8xf32>
    %c0_152 = arith.constant 0 : index
    %c2_153 = arith.constant 2 : index
    %c3_154 = arith.constant 3 : index
    %c0_155 = arith.constant 0 : index
    %c0_156 = arith.constant 0 : index
    %144 = vector.load %arg2[%c0_152, %c2_153, %c3_154, %c0_155, %c0_156] : memref<2x3x4x32x8xf32, #tpu.memory_space<vmem>>, vector<1x1x1x32x8xf32>
    %145 = vector.shape_cast %144 : vector<1x1x1x32x8xf32> to vector<32x8xf32>
    %cst_157 = arith.constant dense<0.000000e+00> : vector<16x8xf32>
    %146 = tpu.matmul %4, %145, %cst_157 {dimension_numbers = #tpu.dot_dimension_numbers<[1], [0], [0], [1], [0, 0, 1, 1], [], []>} : vector<16x32xf32>, vector<32x8xf32>, vector<16x8xf32> -> vector<16x8xf32>
    %c0_158 = arith.constant 0 : index
    %c2_159 = arith.constant 2 : index
    %c3_160 = arith.constant 3 : index
    %c0_161 = arith.constant 0 : index
    %c0_162 = arith.constant 0 : index
    %147 = vector.load %arg3[%c0_158, %c2_159, %c3_160, %c0_161, %c0_162] : memref<2x3x4x1x8xf32, #tpu.memory_space<vmem>>, vector<1x1x1x1x8xf32>
    %148 = vector.shape_cast %147 : vector<1x1x1x1x8xf32> to vector<1x8xf32>
    %149 = vector.broadcast %148 : vector<1x8xf32> to vector<16x8xf32>
    %150 = arith.addf %146, %149 : vector<16x8xf32>
    %151 = vector.shape_cast %136 : vector<16x8xf32> to vector<2x8x8xf32>
    %152 = vector.shape_cast %143 : vector<16x8xf32> to vector<2x8x8xf32>
    %153 = vector.shape_cast %150 : vector<16x8xf32> to vector<2x8x8xf32>
    "tpu.trace_start"() <{level = 10 : i32, message = "ble,bme->blm"}> : () -> ()
    %cst_163 = arith.constant dense<0.000000e+00> : vector<2x8x8xf32>
    %154 = tpu.matmul %151, %152, %cst_163 {dimension_numbers = #tpu.dot_dimension_numbers<[2], [2], [1], [1], [0, 0, 0, 1, 1, 1], [0], [0]>} : vector<2x8x8xf32>, vector<2x8x8xf32>, vector<2x8x8xf32> -> vector<2x8x8xf32>
    "tpu.trace_stop"() : () -> ()
    %cst_164 = arith.constant 0.353553385 : f32
    %155 = vector.broadcast %cst_164 : f32 to vector<2x8x8xf32>
    %156 = arith.mulf %154, %155 : vector<2x8x8xf32>
    %cst_165 = arith.constant dense<0xFF800000> : vector<2x8xf32>
    %157 = vector.multi_reduction <maximumf>, %156, %cst_165 [2] : vector<2x8x8xf32> to vector<2x8xf32>
    %158 = vector.shape_cast %157 : vector<2x8xf32> to vector<2x8x1xf32>
    %159 = vector.broadcast %158 : vector<2x8x1xf32> to vector<2x8x8xf32>
    %160 = arith.subf %156, %159 : vector<2x8x8xf32>
    %161 = math.exp %160 : vector<2x8x8xf32>
    %cst_166 = arith.constant dense<0.000000e+00> : vector<2x8xf32>
    %162 = vector.multi_reduction <add>, %161, %cst_166 [2] : vector<2x8x8xf32> to vector<2x8xf32>
    %163 = vector.shape_cast %162 : vector<2x8xf32> to vector<2x8x1xf32>
    %164 = vector.broadcast %163 : vector<2x8x1xf32> to vector<2x8x8xf32>
    %165 = arith.divf %161, %164 : vector<2x8x8xf32>
    "tpu.trace_start"() <{level = 10 : i32, message = "blm,bme->ble"}> : () -> ()
    %cst_167 = arith.constant dense<0.000000e+00> : vector<2x8x8xf32>
    %166 = tpu.matmul %165, %153, %cst_167 {dimension_numbers = #tpu.dot_dimension_numbers<[2], [1], [1], [2], [0, 0, 0, 1, 1, 2], [0], [0]>} : vector<2x8x8xf32>, vector<2x8x8xf32>, vector<2x8x8xf32> -> vector<2x8x8xf32>
    "tpu.trace_stop"() : () -> ()
    %167 = vector.shape_cast %166 : vector<2x8x8xf32> to vector<16x8xf32>
    %c0_168 = arith.constant 0 : index
    %c3_169 = arith.constant 3 : index
    %c0_170 = arith.constant 0 : index
    %c0_171 = arith.constant 0 : index
    %168 = vector.load %arg4[%c0_168, %c3_169, %c0_170, %c0_171] : memref<2x4x8x32xf32, #tpu.memory_space<vmem>>, vector<1x1x8x32xf32>
    %169 = vector.shape_cast %168 : vector<1x1x8x32xf32> to vector<8x32xf32>
    %cst_172 = arith.constant dense<0.000000e+00> : vector<16x32xf32>
    %170 = tpu.matmul %167, %169, %cst_172 {dimension_numbers = #tpu.dot_dimension_numbers<[1], [0], [0], [1], [0, 0, 1, 1], [], []>} : vector<16x8xf32>, vector<8x32xf32>, vector<16x32xf32> -> vector<16x32xf32>
    %171 = arith.addf %129, %170 : vector<16x32xf32>
    %c0_173 = arith.constant 0 : index
    %c0_174 = arith.constant 0 : index
    %c0_175 = arith.constant 0 : index
    %172 = vector.load %arg8[%c0_173, %c0_174, %c0_175] : memref<15x1x32xf32, #tpu.memory_space<vmem>>, vector<1x1x32xf32>
    %173 = vector.shape_cast %172 : vector<1x1x32xf32> to vector<1x32xf32>
    %174 = vector.broadcast %173 : vector<1x32xf32> to vector<16x32xf32>
    %175 = arith.addf %171, %174 : vector<16x32xf32>
    %176 = arith.addf %4, %175 : vector<16x32xf32>
    %c1_176 = arith.constant 1 : index
    %c0_177 = arith.constant 0 : index
    %c0_178 = arith.constant 0 : index
    %177 = vector.load %arg8[%c1_176, %c0_177, %c0_178] : memref<15x1x32xf32, #tpu.memory_space<vmem>>, vector<1x1x32xf32>
    %178 = vector.shape_cast %177 : vector<1x1x32xf32> to vector<1x32xf32>
    %c2_179 = arith.constant 2 : index
    %c0_180 = arith.constant 0 : index
    %c0_181 = arith.constant 0 : index
    %179 = vector.load %arg8[%c2_179, %c0_180, %c0_181] : memref<15x1x32xf32, #tpu.memory_space<vmem>>, vector<1x1x32xf32>
    %180 = vector.shape_cast %179 : vector<1x1x32xf32> to vector<1x32xf32>
    %cst_182 = arith.constant dense<0.000000e+00> : vector<16xf32>
    %181 = vector.multi_reduction <add>, %176, %cst_182 [1] : vector<16x32xf32> to vector<16xf32>
    %182 = vector.shape_cast %181 : vector<16xf32> to vector<16x1xf32>
    %cst_183 = arith.constant 3.200000e+01 : f32
    %183 = vector.broadcast %cst_183 : f32 to vector<16x1xf32>
    %184 = arith.divf %182, %183 : vector<16x1xf32>
    %185 = vector.broadcast %184 : vector<16x1xf32> to vector<16x32xf32>
    %186 = arith.subf %176, %185 : vector<16x32xf32>
    %187 = arith.mulf %186, %186 : vector<16x32xf32>
    %cst_184 = arith.constant dense<0.000000e+00> : vector<16xf32>
    %188 = vector.multi_reduction <add>, %187, %cst_184 [1] : vector<16x32xf32> to vector<16xf32>
    %189 = vector.shape_cast %188 : vector<16xf32> to vector<16x1xf32>
    %cst_185 = arith.constant 3.200000e+01 : f32
    %190 = vector.broadcast %cst_185 : f32 to vector<16x1xf32>
    %191 = arith.divf %189, %190 : vector<16x1xf32>
    %cst_186 = arith.constant 9.99999974E-6 : f32
    %192 = vector.broadcast %cst_186 : f32 to vector<16x1xf32>
    %193 = arith.addf %191, %192 : vector<16x1xf32>
    %194 = math.rsqrt %193 : vector<16x1xf32>
    %195 = vector.broadcast %194 : vector<16x1xf32> to vector<16x32xf32>
    %196 = arith.mulf %186, %195 : vector<16x32xf32>
    %197 = vector.broadcast %178 : vector<1x32xf32> to vector<16x32xf32>
    %198 = arith.mulf %196, %197 : vector<16x32xf32>
    %199 = vector.broadcast %180 : vector<1x32xf32> to vector<16x32xf32>
    %200 = arith.addf %198, %199 : vector<16x32xf32>
    %c0_187 = arith.constant 0 : index
    %c0_188 = arith.constant 0 : index
    %c0_189 = arith.constant 0 : index
    %201 = vector.load %arg5[%c0_187, %c0_188, %c0_189] : memref<2x32x64xf32, #tpu.memory_space<vmem>>, vector<1x32x64xf32>
    %202 = vector.shape_cast %201 : vector<1x32x64xf32> to vector<32x64xf32>
    %cst_190 = arith.constant dense<0.000000e+00> : vector<16x64xf32>
    %203 = tpu.matmul %200, %202, %cst_190 {dimension_numbers = #tpu.dot_dimension_numbers<[1], [0], [0], [1], [0, 0, 1, 1], [], []>} : vector<16x32xf32>, vector<32x64xf32>, vector<16x64xf32> -> vector<16x64xf32>
    %c0_191 = arith.constant 0 : index
    %c0_192 = arith.constant 0 : index
    %c0_193 = arith.constant 0 : index
    %204 = vector.load %arg6[%c0_191, %c0_192, %c0_193] : memref<2x1x64xf32, #tpu.memory_space<vmem>>, vector<1x1x64xf32>
    %205 = vector.shape_cast %204 : vector<1x1x64xf32> to vector<1x64xf32>
    %206 = vector.broadcast %205 : vector<1x64xf32> to vector<16x64xf32>
    %207 = arith.addf %203, %206 : vector<16x64xf32>
    %cst_194 = arith.constant 5.000000e-01 : f32
    %208 = vector.broadcast %cst_194 : f32 to vector<16x64xf32>
    %209 = arith.mulf %208, %207 : vector<16x64xf32>
    %cst_195 = arith.constant 0.707106769 : f32
    %210 = vector.broadcast %cst_195 : f32 to vector<16x64xf32>
    %211 = arith.mulf %207, %210 : vector<16x64xf32>
    %212 = math.erf %211 : vector<16x64xf32>
    %cst_196 = arith.constant 1.000000e+00 : f32
    %213 = vector.broadcast %cst_196 : f32 to vector<16x64xf32>
    %214 = arith.addf %213, %212 : vector<16x64xf32>
    %215 = arith.mulf %209, %214 : vector<16x64xf32>
    %c0_197 = arith.constant 0 : index
    %c0_198 = arith.constant 0 : index
    %c0_199 = arith.constant 0 : index
    %216 = vector.load %arg7[%c0_197, %c0_198, %c0_199] : memref<2x64x32xf32, #tpu.memory_space<vmem>>, vector<1x64x32xf32>
    %217 = vector.shape_cast %216 : vector<1x64x32xf32> to vector<64x32xf32>
    %cst_200 = arith.constant dense<0.000000e+00> : vector<16x32xf32>
    %218 = tpu.matmul %215, %217, %cst_200 {dimension_numbers = #tpu.dot_dimension_numbers<[1], [0], [0], [1], [0, 0, 1, 1], [], []>} : vector<16x64xf32>, vector<64x32xf32>, vector<16x32xf32> -> vector<16x32xf32>
    %c3_201 = arith.constant 3 : index
    %c0_202 = arith.constant 0 : index
    %c0_203 = arith.constant 0 : index
    %219 = vector.load %arg8[%c3_201, %c0_202, %c0_203] : memref<15x1x32xf32, #tpu.memory_space<vmem>>, vector<1x1x32xf32>
    %220 = vector.shape_cast %219 : vector<1x1x32xf32> to vector<1x32xf32>
    %221 = vector.broadcast %220 : vector<1x32xf32> to vector<16x32xf32>
    %222 = arith.addf %218, %221 : vector<16x32xf32>
    %223 = arith.addf %200, %222 : vector<16x32xf32>
    %c4 = arith.constant 4 : index
    %c0_204 = arith.constant 0 : index
    %c0_205 = arith.constant 0 : index
    %224 = vector.load %arg8[%c4, %c0_204, %c0_205] : memref<15x1x32xf32, #tpu.memory_space<vmem>>, vector<1x1x32xf32>
    %225 = vector.shape_cast %224 : vector<1x1x32xf32> to vector<1x32xf32>
    %c5 = arith.constant 5 : index
    %c0_206 = arith.constant 0 : index
    %c0_207 = arith.constant 0 : index
    %226 = vector.load %arg8[%c5, %c0_206, %c0_207] : memref<15x1x32xf32, #tpu.memory_space<vmem>>, vector<1x1x32xf32>
    %227 = vector.shape_cast %226 : vector<1x1x32xf32> to vector<1x32xf32>
    %cst_208 = arith.constant dense<0.000000e+00> : vector<16xf32>
    %228 = vector.multi_reduction <add>, %223, %cst_208 [1] : vector<16x32xf32> to vector<16xf32>
    %229 = vector.shape_cast %228 : vector<16xf32> to vector<16x1xf32>
    %cst_209 = arith.constant 3.200000e+01 : f32
    %230 = vector.broadcast %cst_209 : f32 to vector<16x1xf32>
    %231 = arith.divf %229, %230 : vector<16x1xf32>
    %232 = vector.broadcast %231 : vector<16x1xf32> to vector<16x32xf32>
    %233 = arith.subf %223, %232 : vector<16x32xf32>
    %234 = arith.mulf %233, %233 : vector<16x32xf32>
    %cst_210 = arith.constant dense<0.000000e+00> : vector<16xf32>
    %235 = vector.multi_reduction <add>, %234, %cst_210 [1] : vector<16x32xf32> to vector<16xf32>
    %236 = vector.shape_cast %235 : vector<16xf32> to vector<16x1xf32>
    %cst_211 = arith.constant 3.200000e+01 : f32
    %237 = vector.broadcast %cst_211 : f32 to vector<16x1xf32>
    %238 = arith.divf %236, %237 : vector<16x1xf32>
    %cst_212 = arith.constant 9.99999974E-6 : f32
    %239 = vector.broadcast %cst_212 : f32 to vector<16x1xf32>
    %240 = arith.addf %238, %239 : vector<16x1xf32>
    %241 = math.rsqrt %240 : vector<16x1xf32>
    %242 = vector.broadcast %241 : vector<16x1xf32> to vector<16x32xf32>
    %243 = arith.mulf %233, %242 : vector<16x32xf32>
    %244 = vector.broadcast %225 : vector<1x32xf32> to vector<16x32xf32>
    %245 = arith.mulf %243, %244 : vector<16x32xf32>
    %246 = vector.broadcast %227 : vector<1x32xf32> to vector<16x32xf32>
    %247 = arith.addf %245, %246 : vector<16x32xf32>
    %c1_213 = arith.constant 1 : index
    %c0_214 = arith.constant 0 : index
    %c0_215 = arith.constant 0 : index
    %c0_216 = arith.constant 0 : index
    %c0_217 = arith.constant 0 : index
    %248 = vector.load %arg2[%c1_213, %c0_214, %c0_215, %c0_216, %c0_217] : memref<2x3x4x32x8xf32, #tpu.memory_space<vmem>>, vector<1x1x1x32x8xf32>
    %249 = vector.shape_cast %248 : vector<1x1x1x32x8xf32> to vector<32x8xf32>
    %cst_218 = arith.constant dense<0.000000e+00> : vector<16x8xf32>
    %250 = tpu.matmul %247, %249, %cst_218 {dimension_numbers = #tpu.dot_dimension_numbers<[1], [0], [0], [1], [0, 0, 1, 1], [], []>} : vector<16x32xf32>, vector<32x8xf32>, vector<16x8xf32> -> vector<16x8xf32>
    %c1_219 = arith.constant 1 : index
    %c0_220 = arith.constant 0 : index
    %c0_221 = arith.constant 0 : index
    %c0_222 = arith.constant 0 : index
    %c0_223 = arith.constant 0 : index
    %251 = vector.load %arg3[%c1_219, %c0_220, %c0_221, %c0_222, %c0_223] : memref<2x3x4x1x8xf32, #tpu.memory_space<vmem>>, vector<1x1x1x1x8xf32>
    %252 = vector.shape_cast %251 : vector<1x1x1x1x8xf32> to vector<1x8xf32>
    %253 = vector.broadcast %252 : vector<1x8xf32> to vector<16x8xf32>
    %254 = arith.addf %250, %253 : vector<16x8xf32>
    %c1_224 = arith.constant 1 : index
    %c1_225 = arith.constant 1 : index
    %c0_226 = arith.constant 0 : index
    %c0_227 = arith.constant 0 : index
    %c0_228 = arith.constant 0 : index
    %255 = vector.load %arg2[%c1_224, %c1_225, %c0_226, %c0_227, %c0_228] : memref<2x3x4x32x8xf32, #tpu.memory_space<vmem>>, vector<1x1x1x32x8xf32>
    %256 = vector.shape_cast %255 : vector<1x1x1x32x8xf32> to vector<32x8xf32>
    %cst_229 = arith.constant dense<0.000000e+00> : vector<16x8xf32>
    %257 = tpu.matmul %247, %256, %cst_229 {dimension_numbers = #tpu.dot_dimension_numbers<[1], [0], [0], [1], [0, 0, 1, 1], [], []>} : vector<16x32xf32>, vector<32x8xf32>, vector<16x8xf32> -> vector<16x8xf32>
    %c1_230 = arith.constant 1 : index
    %c1_231 = arith.constant 1 : index
    %c0_232 = arith.constant 0 : index
    %c0_233 = arith.constant 0 : index
    %c0_234 = arith.constant 0 : index
    %258 = vector.load %arg3[%c1_230, %c1_231, %c0_232, %c0_233, %c0_234] : memref<2x3x4x1x8xf32, #tpu.memory_space<vmem>>, vector<1x1x1x1x8xf32>
    %259 = vector.shape_cast %258 : vector<1x1x1x1x8xf32> to vector<1x8xf32>
    %260 = vector.broadcast %259 : vector<1x8xf32> to vector<16x8xf32>
    %261 = arith.addf %257, %260 : vector<16x8xf32>
    %c1_235 = arith.constant 1 : index
    %c2_236 = arith.constant 2 : index
    %c0_237 = arith.constant 0 : index
    %c0_238 = arith.constant 0 : index
    %c0_239 = arith.constant 0 : index
    %262 = vector.load %arg2[%c1_235, %c2_236, %c0_237, %c0_238, %c0_239] : memref<2x3x4x32x8xf32, #tpu.memory_space<vmem>>, vector<1x1x1x32x8xf32>
    %263 = vector.shape_cast %262 : vector<1x1x1x32x8xf32> to vector<32x8xf32>
    %cst_240 = arith.constant dense<0.000000e+00> : vector<16x8xf32>
    %264 = tpu.matmul %247, %263, %cst_240 {dimension_numbers = #tpu.dot_dimension_numbers<[1], [0], [0], [1], [0, 0, 1, 1], [], []>} : vector<16x32xf32>, vector<32x8xf32>, vector<16x8xf32> -> vector<16x8xf32>
    %c1_241 = arith.constant 1 : index
    %c2_242 = arith.constant 2 : index
    %c0_243 = arith.constant 0 : index
    %c0_244 = arith.constant 0 : index
    %c0_245 = arith.constant 0 : index
    %265 = vector.load %arg3[%c1_241, %c2_242, %c0_243, %c0_244, %c0_245] : memref<2x3x4x1x8xf32, #tpu.memory_space<vmem>>, vector<1x1x1x1x8xf32>
    %266 = vector.shape_cast %265 : vector<1x1x1x1x8xf32> to vector<1x8xf32>
    %267 = vector.broadcast %266 : vector<1x8xf32> to vector<16x8xf32>
    %268 = arith.addf %264, %267 : vector<16x8xf32>
    %269 = vector.shape_cast %254 : vector<16x8xf32> to vector<2x8x8xf32>
    %270 = vector.shape_cast %261 : vector<16x8xf32> to vector<2x8x8xf32>
    %271 = vector.shape_cast %268 : vector<16x8xf32> to vector<2x8x8xf32>
    "tpu.trace_start"() <{level = 10 : i32, message = "ble,bme->blm"}> : () -> ()
    %cst_246 = arith.constant dense<0.000000e+00> : vector<2x8x8xf32>
    %272 = tpu.matmul %269, %270, %cst_246 {dimension_numbers = #tpu.dot_dimension_numbers<[2], [2], [1], [1], [0, 0, 0, 1, 1, 1], [0], [0]>} : vector<2x8x8xf32>, vector<2x8x8xf32>, vector<2x8x8xf32> -> vector<2x8x8xf32>
    "tpu.trace_stop"() : () -> ()
    %cst_247 = arith.constant 0.353553385 : f32
    %273 = vector.broadcast %cst_247 : f32 to vector<2x8x8xf32>
    %274 = arith.mulf %272, %273 : vector<2x8x8xf32>
    %cst_248 = arith.constant dense<0xFF800000> : vector<2x8xf32>
    %275 = vector.multi_reduction <maximumf>, %274, %cst_248 [2] : vector<2x8x8xf32> to vector<2x8xf32>
    %276 = vector.shape_cast %275 : vector<2x8xf32> to vector<2x8x1xf32>
    %277 = vector.broadcast %276 : vector<2x8x1xf32> to vector<2x8x8xf32>
    %278 = arith.subf %274, %277 : vector<2x8x8xf32>
    %279 = math.exp %278 : vector<2x8x8xf32>
    %cst_249 = arith.constant dense<0.000000e+00> : vector<2x8xf32>
    %280 = vector.multi_reduction <add>, %279, %cst_249 [2] : vector<2x8x8xf32> to vector<2x8xf32>
    %281 = vector.shape_cast %280 : vector<2x8xf32> to vector<2x8x1xf32>
    %282 = vector.broadcast %281 : vector<2x8x1xf32> to vector<2x8x8xf32>
    %283 = arith.divf %279, %282 : vector<2x8x8xf32>
    "tpu.trace_start"() <{level = 10 : i32, message = "blm,bme->ble"}> : () -> ()
    %cst_250 = arith.constant dense<0.000000e+00> : vector<2x8x8xf32>
    %284 = tpu.matmul %283, %271, %cst_250 {dimension_numbers = #tpu.dot_dimension_numbers<[2], [1], [1], [2], [0, 0, 0, 1, 1, 2], [0], [0]>} : vector<2x8x8xf32>, vector<2x8x8xf32>, vector<2x8x8xf32> -> vector<2x8x8xf32>
    "tpu.trace_stop"() : () -> ()
    %285 = vector.shape_cast %284 : vector<2x8x8xf32> to vector<16x8xf32>
    %c1_251 = arith.constant 1 : index
    %c0_252 = arith.constant 0 : index
    %c0_253 = arith.constant 0 : index
    %c0_254 = arith.constant 0 : index
    %286 = vector.load %arg4[%c1_251, %c0_252, %c0_253, %c0_254] : memref<2x4x8x32xf32, #tpu.memory_space<vmem>>, vector<1x1x8x32xf32>
    %287 = vector.shape_cast %286 : vector<1x1x8x32xf32> to vector<8x32xf32>
    %cst_255 = arith.constant dense<0.000000e+00> : vector<16x32xf32>
    %288 = tpu.matmul %285, %287, %cst_255 {dimension_numbers = #tpu.dot_dimension_numbers<[1], [0], [0], [1], [0, 0, 1, 1], [], []>} : vector<16x8xf32>, vector<8x32xf32>, vector<16x32xf32> -> vector<16x32xf32>
    %c1_256 = arith.constant 1 : index
    %c0_257 = arith.constant 0 : index
    %c1_258 = arith.constant 1 : index
    %c0_259 = arith.constant 0 : index
    %c0_260 = arith.constant 0 : index
    %289 = vector.load %arg2[%c1_256, %c0_257, %c1_258, %c0_259, %c0_260] : memref<2x3x4x32x8xf32, #tpu.memory_space<vmem>>, vector<1x1x1x32x8xf32>
    %290 = vector.shape_cast %289 : vector<1x1x1x32x8xf32> to vector<32x8xf32>
    %cst_261 = arith.constant dense<0.000000e+00> : vector<16x8xf32>
    %291 = tpu.matmul %247, %290, %cst_261 {dimension_numbers = #tpu.dot_dimension_numbers<[1], [0], [0], [1], [0, 0, 1, 1], [], []>} : vector<16x32xf32>, vector<32x8xf32>, vector<16x8xf32> -> vector<16x8xf32>
    %c1_262 = arith.constant 1 : index
    %c0_263 = arith.constant 0 : index
    %c1_264 = arith.constant 1 : index
    %c0_265 = arith.constant 0 : index
    %c0_266 = arith.constant 0 : index
    %292 = vector.load %arg3[%c1_262, %c0_263, %c1_264, %c0_265, %c0_266] : memref<2x3x4x1x8xf32, #tpu.memory_space<vmem>>, vector<1x1x1x1x8xf32>
    %293 = vector.shape_cast %292 : vector<1x1x1x1x8xf32> to vector<1x8xf32>
    %294 = vector.broadcast %293 : vector<1x8xf32> to vector<16x8xf32>
    %295 = arith.addf %291, %294 : vector<16x8xf32>
    %c1_267 = arith.constant 1 : index
    %c1_268 = arith.constant 1 : index
    %c1_269 = arith.constant 1 : index
    %c0_270 = arith.constant 0 : index
    %c0_271 = arith.constant 0 : index
    %296 = vector.load %arg2[%c1_267, %c1_268, %c1_269, %c0_270, %c0_271] : memref<2x3x4x32x8xf32, #tpu.memory_space<vmem>>, vector<1x1x1x32x8xf32>
    %297 = vector.shape_cast %296 : vector<1x1x1x32x8xf32> to vector<32x8xf32>
    %cst_272 = arith.constant dense<0.000000e+00> : vector<16x8xf32>
    %298 = tpu.matmul %247, %297, %cst_272 {dimension_numbers = #tpu.dot_dimension_numbers<[1], [0], [0], [1], [0, 0, 1, 1], [], []>} : vector<16x32xf32>, vector<32x8xf32>, vector<16x8xf32> -> vector<16x8xf32>
    %c1_273 = arith.constant 1 : index
    %c1_274 = arith.constant 1 : index
    %c1_275 = arith.constant 1 : index
    %c0_276 = arith.constant 0 : index
    %c0_277 = arith.constant 0 : index
    %299 = vector.load %arg3[%c1_273, %c1_274, %c1_275, %c0_276, %c0_277] : memref<2x3x4x1x8xf32, #tpu.memory_space<vmem>>, vector<1x1x1x1x8xf32>
    %300 = vector.shape_cast %299 : vector<1x1x1x1x8xf32> to vector<1x8xf32>
    %301 = vector.broadcast %300 : vector<1x8xf32> to vector<16x8xf32>
    %302 = arith.addf %298, %301 : vector<16x8xf32>
    %c1_278 = arith.constant 1 : index
    %c2_279 = arith.constant 2 : index
    %c1_280 = arith.constant 1 : index
    %c0_281 = arith.constant 0 : index
    %c0_282 = arith.constant 0 : index
    %303 = vector.load %arg2[%c1_278, %c2_279, %c1_280, %c0_281, %c0_282] : memref<2x3x4x32x8xf32, #tpu.memory_space<vmem>>, vector<1x1x1x32x8xf32>
    %304 = vector.shape_cast %303 : vector<1x1x1x32x8xf32> to vector<32x8xf32>
    %cst_283 = arith.constant dense<0.000000e+00> : vector<16x8xf32>
    %305 = tpu.matmul %247, %304, %cst_283 {dimension_numbers = #tpu.dot_dimension_numbers<[1], [0], [0], [1], [0, 0, 1, 1], [], []>} : vector<16x32xf32>, vector<32x8xf32>, vector<16x8xf32> -> vector<16x8xf32>
    %c1_284 = arith.constant 1 : index
    %c2_285 = arith.constant 2 : index
    %c1_286 = arith.constant 1 : index
    %c0_287 = arith.constant 0 : index
    %c0_288 = arith.constant 0 : index
    %306 = vector.load %arg3[%c1_284, %c2_285, %c1_286, %c0_287, %c0_288] : memref<2x3x4x1x8xf32, #tpu.memory_space<vmem>>, vector<1x1x1x1x8xf32>
    %307 = vector.shape_cast %306 : vector<1x1x1x1x8xf32> to vector<1x8xf32>
    %308 = vector.broadcast %307 : vector<1x8xf32> to vector<16x8xf32>
    %309 = arith.addf %305, %308 : vector<16x8xf32>
    %310 = vector.shape_cast %295 : vector<16x8xf32> to vector<2x8x8xf32>
    %311 = vector.shape_cast %302 : vector<16x8xf32> to vector<2x8x8xf32>
    %312 = vector.shape_cast %309 : vector<16x8xf32> to vector<2x8x8xf32>
    "tpu.trace_start"() <{level = 10 : i32, message = "ble,bme->blm"}> : () -> ()
    %cst_289 = arith.constant dense<0.000000e+00> : vector<2x8x8xf32>
    %313 = tpu.matmul %310, %311, %cst_289 {dimension_numbers = #tpu.dot_dimension_numbers<[2], [2], [1], [1], [0, 0, 0, 1, 1, 1], [0], [0]>} : vector<2x8x8xf32>, vector<2x8x8xf32>, vector<2x8x8xf32> -> vector<2x8x8xf32>
    "tpu.trace_stop"() : () -> ()
    %cst_290 = arith.constant 0.353553385 : f32
    %314 = vector.broadcast %cst_290 : f32 to vector<2x8x8xf32>
    %315 = arith.mulf %313, %314 : vector<2x8x8xf32>
    %cst_291 = arith.constant dense<0xFF800000> : vector<2x8xf32>
    %316 = vector.multi_reduction <maximumf>, %315, %cst_291 [2] : vector<2x8x8xf32> to vector<2x8xf32>
    %317 = vector.shape_cast %316 : vector<2x8xf32> to vector<2x8x1xf32>
    %318 = vector.broadcast %317 : vector<2x8x1xf32> to vector<2x8x8xf32>
    %319 = arith.subf %315, %318 : vector<2x8x8xf32>
    %320 = math.exp %319 : vector<2x8x8xf32>
    %cst_292 = arith.constant dense<0.000000e+00> : vector<2x8xf32>
    %321 = vector.multi_reduction <add>, %320, %cst_292 [2] : vector<2x8x8xf32> to vector<2x8xf32>
    %322 = vector.shape_cast %321 : vector<2x8xf32> to vector<2x8x1xf32>
    %323 = vector.broadcast %322 : vector<2x8x1xf32> to vector<2x8x8xf32>
    %324 = arith.divf %320, %323 : vector<2x8x8xf32>
    "tpu.trace_start"() <{level = 10 : i32, message = "blm,bme->ble"}> : () -> ()
    %cst_293 = arith.constant dense<0.000000e+00> : vector<2x8x8xf32>
    %325 = tpu.matmul %324, %312, %cst_293 {dimension_numbers = #tpu.dot_dimension_numbers<[2], [1], [1], [2], [0, 0, 0, 1, 1, 2], [0], [0]>} : vector<2x8x8xf32>, vector<2x8x8xf32>, vector<2x8x8xf32> -> vector<2x8x8xf32>
    "tpu.trace_stop"() : () -> ()
    %326 = vector.shape_cast %325 : vector<2x8x8xf32> to vector<16x8xf32>
    %c1_294 = arith.constant 1 : index
    %c1_295 = arith.constant 1 : index
    %c0_296 = arith.constant 0 : index
    %c0_297 = arith.constant 0 : index
    %327 = vector.load %arg4[%c1_294, %c1_295, %c0_296, %c0_297] : memref<2x4x8x32xf32, #tpu.memory_space<vmem>>, vector<1x1x8x32xf32>
    %328 = vector.shape_cast %327 : vector<1x1x8x32xf32> to vector<8x32xf32>
    %cst_298 = arith.constant dense<0.000000e+00> : vector<16x32xf32>
    %329 = tpu.matmul %326, %328, %cst_298 {dimension_numbers = #tpu.dot_dimension_numbers<[1], [0], [0], [1], [0, 0, 1, 1], [], []>} : vector<16x8xf32>, vector<8x32xf32>, vector<16x32xf32> -> vector<16x32xf32>
    %330 = arith.addf %288, %329 : vector<16x32xf32>
    %c1_299 = arith.constant 1 : index
    %c0_300 = arith.constant 0 : index
    %c2_301 = arith.constant 2 : index
    %c0_302 = arith.constant 0 : index
    %c0_303 = arith.constant 0 : index
    %331 = vector.load %arg2[%c1_299, %c0_300, %c2_301, %c0_302, %c0_303] : memref<2x3x4x32x8xf32, #tpu.memory_space<vmem>>, vector<1x1x1x32x8xf32>
    %332 = vector.shape_cast %331 : vector<1x1x1x32x8xf32> to vector<32x8xf32>
    %cst_304 = arith.constant dense<0.000000e+00> : vector<16x8xf32>
    %333 = tpu.matmul %247, %332, %cst_304 {dimension_numbers = #tpu.dot_dimension_numbers<[1], [0], [0], [1], [0, 0, 1, 1], [], []>} : vector<16x32xf32>, vector<32x8xf32>, vector<16x8xf32> -> vector<16x8xf32>
    %c1_305 = arith.constant 1 : index
    %c0_306 = arith.constant 0 : index
    %c2_307 = arith.constant 2 : index
    %c0_308 = arith.constant 0 : index
    %c0_309 = arith.constant 0 : index
    %334 = vector.load %arg3[%c1_305, %c0_306, %c2_307, %c0_308, %c0_309] : memref<2x3x4x1x8xf32, #tpu.memory_space<vmem>>, vector<1x1x1x1x8xf32>
    %335 = vector.shape_cast %334 : vector<1x1x1x1x8xf32> to vector<1x8xf32>
    %336 = vector.broadcast %335 : vector<1x8xf32> to vector<16x8xf32>
    %337 = arith.addf %333, %336 : vector<16x8xf32>
    %c1_310 = arith.constant 1 : index
    %c1_311 = arith.constant 1 : index
    %c2_312 = arith.constant 2 : index
    %c0_313 = arith.constant 0 : index
    %c0_314 = arith.constant 0 : index
    %338 = vector.load %arg2[%c1_310, %c1_311, %c2_312, %c0_313, %c0_314] : memref<2x3x4x32x8xf32, #tpu.memory_space<vmem>>, vector<1x1x1x32x8xf32>
    %339 = vector.shape_cast %338 : vector<1x1x1x32x8xf32> to vector<32x8xf32>
    %cst_315 = arith.constant dense<0.000000e+00> : vector<16x8xf32>
    %340 = tpu.matmul %247, %339, %cst_315 {dimension_numbers = #tpu.dot_dimension_numbers<[1], [0], [0], [1], [0, 0, 1, 1], [], []>} : vector<16x32xf32>, vector<32x8xf32>, vector<16x8xf32> -> vector<16x8xf32>
    %c1_316 = arith.constant 1 : index
    %c1_317 = arith.constant 1 : index
    %c2_318 = arith.constant 2 : index
    %c0_319 = arith.constant 0 : index
    %c0_320 = arith.constant 0 : index
    %341 = vector.load %arg3[%c1_316, %c1_317, %c2_318, %c0_319, %c0_320] : memref<2x3x4x1x8xf32, #tpu.memory_space<vmem>>, vector<1x1x1x1x8xf32>
    %342 = vector.shape_cast %341 : vector<1x1x1x1x8xf32> to vector<1x8xf32>
    %343 = vector.broadcast %342 : vector<1x8xf32> to vector<16x8xf32>
    %344 = arith.addf %340, %343 : vector<16x8xf32>
    %c1_321 = arith.constant 1 : index
    %c2_322 = arith.constant 2 : index
    %c2_323 = arith.constant 2 : index
    %c0_324 = arith.constant 0 : index
    %c0_325 = arith.constant 0 : index
    %345 = vector.load %arg2[%c1_321, %c2_322, %c2_323, %c0_324, %c0_325] : memref<2x3x4x32x8xf32, #tpu.memory_space<vmem>>, vector<1x1x1x32x8xf32>
    %346 = vector.shape_cast %345 : vector<1x1x1x32x8xf32> to vector<32x8xf32>
    %cst_326 = arith.constant dense<0.000000e+00> : vector<16x8xf32>
    %347 = tpu.matmul %247, %346, %cst_326 {dimension_numbers = #tpu.dot_dimension_numbers<[1], [0], [0], [1], [0, 0, 1, 1], [], []>} : vector<16x32xf32>, vector<32x8xf32>, vector<16x8xf32> -> vector<16x8xf32>
    %c1_327 = arith.constant 1 : index
    %c2_328 = arith.constant 2 : index
    %c2_329 = arith.constant 2 : index
    %c0_330 = arith.constant 0 : index
    %c0_331 = arith.constant 0 : index
    %348 = vector.load %arg3[%c1_327, %c2_328, %c2_329, %c0_330, %c0_331] : memref<2x3x4x1x8xf32, #tpu.memory_space<vmem>>, vector<1x1x1x1x8xf32>
    %349 = vector.shape_cast %348 : vector<1x1x1x1x8xf32> to vector<1x8xf32>
    %350 = vector.broadcast %349 : vector<1x8xf32> to vector<16x8xf32>
    %351 = arith.addf %347, %350 : vector<16x8xf32>
    %352 = vector.shape_cast %337 : vector<16x8xf32> to vector<2x8x8xf32>
    %353 = vector.shape_cast %344 : vector<16x8xf32> to vector<2x8x8xf32>
    %354 = vector.shape_cast %351 : vector<16x8xf32> to vector<2x8x8xf32>
    "tpu.trace_start"() <{level = 10 : i32, message = "ble,bme->blm"}> : () -> ()
    %cst_332 = arith.constant dense<0.000000e+00> : vector<2x8x8xf32>
    %355 = tpu.matmul %352, %353, %cst_332 {dimension_numbers = #tpu.dot_dimension_numbers<[2], [2], [1], [1], [0, 0, 0, 1, 1, 1], [0], [0]>} : vector<2x8x8xf32>, vector<2x8x8xf32>, vector<2x8x8xf32> -> vector<2x8x8xf32>
    "tpu.trace_stop"() : () -> ()
    %cst_333 = arith.constant 0.353553385 : f32
    %356 = vector.broadcast %cst_333 : f32 to vector<2x8x8xf32>
    %357 = arith.mulf %355, %356 : vector<2x8x8xf32>
    %cst_334 = arith.constant dense<0xFF800000> : vector<2x8xf32>
    %358 = vector.multi_reduction <maximumf>, %357, %cst_334 [2] : vector<2x8x8xf32> to vector<2x8xf32>
    %359 = vector.shape_cast %358 : vector<2x8xf32> to vector<2x8x1xf32>
    %360 = vector.broadcast %359 : vector<2x8x1xf32> to vector<2x8x8xf32>
    %361 = arith.subf %357, %360 : vector<2x8x8xf32>
    %362 = math.exp %361 : vector<2x8x8xf32>
    %cst_335 = arith.constant dense<0.000000e+00> : vector<2x8xf32>
    %363 = vector.multi_reduction <add>, %362, %cst_335 [2] : vector<2x8x8xf32> to vector<2x8xf32>
    %364 = vector.shape_cast %363 : vector<2x8xf32> to vector<2x8x1xf32>
    %365 = vector.broadcast %364 : vector<2x8x1xf32> to vector<2x8x8xf32>
    %366 = arith.divf %362, %365 : vector<2x8x8xf32>
    "tpu.trace_start"() <{level = 10 : i32, message = "blm,bme->ble"}> : () -> ()
    %cst_336 = arith.constant dense<0.000000e+00> : vector<2x8x8xf32>
    %367 = tpu.matmul %366, %354, %cst_336 {dimension_numbers = #tpu.dot_dimension_numbers<[2], [1], [1], [2], [0, 0, 0, 1, 1, 2], [0], [0]>} : vector<2x8x8xf32>, vector<2x8x8xf32>, vector<2x8x8xf32> -> vector<2x8x8xf32>
    "tpu.trace_stop"() : () -> ()
    %368 = vector.shape_cast %367 : vector<2x8x8xf32> to vector<16x8xf32>
    %c1_337 = arith.constant 1 : index
    %c2_338 = arith.constant 2 : index
    %c0_339 = arith.constant 0 : index
    %c0_340 = arith.constant 0 : index
    %369 = vector.load %arg4[%c1_337, %c2_338, %c0_339, %c0_340] : memref<2x4x8x32xf32, #tpu.memory_space<vmem>>, vector<1x1x8x32xf32>
    %370 = vector.shape_cast %369 : vector<1x1x8x32xf32> to vector<8x32xf32>
    %cst_341 = arith.constant dense<0.000000e+00> : vector<16x32xf32>
    %371 = tpu.matmul %368, %370, %cst_341 {dimension_numbers = #tpu.dot_dimension_numbers<[1], [0], [0], [1], [0, 0, 1, 1], [], []>} : vector<16x8xf32>, vector<8x32xf32>, vector<16x32xf32> -> vector<16x32xf32>
    %372 = arith.addf %330, %371 : vector<16x32xf32>
    %c1_342 = arith.constant 1 : index
    %c0_343 = arith.constant 0 : index
    %c3_344 = arith.constant 3 : index
    %c0_345 = arith.constant 0 : index
    %c0_346 = arith.constant 0 : index
    %373 = vector.load %arg2[%c1_342, %c0_343, %c3_344, %c0_345, %c0_346] : memref<2x3x4x32x8xf32, #tpu.memory_space<vmem>>, vector<1x1x1x32x8xf32>
    %374 = vector.shape_cast %373 : vector<1x1x1x32x8xf32> to vector<32x8xf32>
    %cst_347 = arith.constant dense<0.000000e+00> : vector<16x8xf32>
    %375 = tpu.matmul %247, %374, %cst_347 {dimension_numbers = #tpu.dot_dimension_numbers<[1], [0], [0], [1], [0, 0, 1, 1], [], []>} : vector<16x32xf32>, vector<32x8xf32>, vector<16x8xf32> -> vector<16x8xf32>
    %c1_348 = arith.constant 1 : index
    %c0_349 = arith.constant 0 : index
    %c3_350 = arith.constant 3 : index
    %c0_351 = arith.constant 0 : index
    %c0_352 = arith.constant 0 : index
    %376 = vector.load %arg3[%c1_348, %c0_349, %c3_350, %c0_351, %c0_352] : memref<2x3x4x1x8xf32, #tpu.memory_space<vmem>>, vector<1x1x1x1x8xf32>
    %377 = vector.shape_cast %376 : vector<1x1x1x1x8xf32> to vector<1x8xf32>
    %378 = vector.broadcast %377 : vector<1x8xf32> to vector<16x8xf32>
    %379 = arith.addf %375, %378 : vector<16x8xf32>
    %c1_353 = arith.constant 1 : index
    %c1_354 = arith.constant 1 : index
    %c3_355 = arith.constant 3 : index
    %c0_356 = arith.constant 0 : index
    %c0_357 = arith.constant 0 : index
    %380 = vector.load %arg2[%c1_353, %c1_354, %c3_355, %c0_356, %c0_357] : memref<2x3x4x32x8xf32, #tpu.memory_space<vmem>>, vector<1x1x1x32x8xf32>
    %381 = vector.shape_cast %380 : vector<1x1x1x32x8xf32> to vector<32x8xf32>
    %cst_358 = arith.constant dense<0.000000e+00> : vector<16x8xf32>
    %382 = tpu.matmul %247, %381, %cst_358 {dimension_numbers = #tpu.dot_dimension_numbers<[1], [0], [0], [1], [0, 0, 1, 1], [], []>} : vector<16x32xf32>, vector<32x8xf32>, vector<16x8xf32> -> vector<16x8xf32>
    %c1_359 = arith.constant 1 : index
    %c1_360 = arith.constant 1 : index
    %c3_361 = arith.constant 3 : index
    %c0_362 = arith.constant 0 : index
    %c0_363 = arith.constant 0 : index
    %383 = vector.load %arg3[%c1_359, %c1_360, %c3_361, %c0_362, %c0_363] : memref<2x3x4x1x8xf32, #tpu.memory_space<vmem>>, vector<1x1x1x1x8xf32>
    %384 = vector.shape_cast %383 : vector<1x1x1x1x8xf32> to vector<1x8xf32>
    %385 = vector.broadcast %384 : vector<1x8xf32> to vector<16x8xf32>
    %386 = arith.addf %382, %385 : vector<16x8xf32>
    %c1_364 = arith.constant 1 : index
    %c2_365 = arith.constant 2 : index
    %c3_366 = arith.constant 3 : index
    %c0_367 = arith.constant 0 : index
    %c0_368 = arith.constant 0 : index
    %387 = vector.load %arg2[%c1_364, %c2_365, %c3_366, %c0_367, %c0_368] : memref<2x3x4x32x8xf32, #tpu.memory_space<vmem>>, vector<1x1x1x32x8xf32>
    %388 = vector.shape_cast %387 : vector<1x1x1x32x8xf32> to vector<32x8xf32>
    %cst_369 = arith.constant dense<0.000000e+00> : vector<16x8xf32>
    %389 = tpu.matmul %247, %388, %cst_369 {dimension_numbers = #tpu.dot_dimension_numbers<[1], [0], [0], [1], [0, 0, 1, 1], [], []>} : vector<16x32xf32>, vector<32x8xf32>, vector<16x8xf32> -> vector<16x8xf32>
    %c1_370 = arith.constant 1 : index
    %c2_371 = arith.constant 2 : index
    %c3_372 = arith.constant 3 : index
    %c0_373 = arith.constant 0 : index
    %c0_374 = arith.constant 0 : index
    %390 = vector.load %arg3[%c1_370, %c2_371, %c3_372, %c0_373, %c0_374] : memref<2x3x4x1x8xf32, #tpu.memory_space<vmem>>, vector<1x1x1x1x8xf32>
    %391 = vector.shape_cast %390 : vector<1x1x1x1x8xf32> to vector<1x8xf32>
    %392 = vector.broadcast %391 : vector<1x8xf32> to vector<16x8xf32>
    %393 = arith.addf %389, %392 : vector<16x8xf32>
    %394 = vector.shape_cast %379 : vector<16x8xf32> to vector<2x8x8xf32>
    %395 = vector.shape_cast %386 : vector<16x8xf32> to vector<2x8x8xf32>
    %396 = vector.shape_cast %393 : vector<16x8xf32> to vector<2x8x8xf32>
    "tpu.trace_start"() <{level = 10 : i32, message = "ble,bme->blm"}> : () -> ()
    %cst_375 = arith.constant dense<0.000000e+00> : vector<2x8x8xf32>
    %397 = tpu.matmul %394, %395, %cst_375 {dimension_numbers = #tpu.dot_dimension_numbers<[2], [2], [1], [1], [0, 0, 0, 1, 1, 1], [0], [0]>} : vector<2x8x8xf32>, vector<2x8x8xf32>, vector<2x8x8xf32> -> vector<2x8x8xf32>
    "tpu.trace_stop"() : () -> ()
    %cst_376 = arith.constant 0.353553385 : f32
    %398 = vector.broadcast %cst_376 : f32 to vector<2x8x8xf32>
    %399 = arith.mulf %397, %398 : vector<2x8x8xf32>
    %cst_377 = arith.constant dense<0xFF800000> : vector<2x8xf32>
    %400 = vector.multi_reduction <maximumf>, %399, %cst_377 [2] : vector<2x8x8xf32> to vector<2x8xf32>
    %401 = vector.shape_cast %400 : vector<2x8xf32> to vector<2x8x1xf32>
    %402 = vector.broadcast %401 : vector<2x8x1xf32> to vector<2x8x8xf32>
    %403 = arith.subf %399, %402 : vector<2x8x8xf32>
    %404 = math.exp %403 : vector<2x8x8xf32>
    %cst_378 = arith.constant dense<0.000000e+00> : vector<2x8xf32>
    %405 = vector.multi_reduction <add>, %404, %cst_378 [2] : vector<2x8x8xf32> to vector<2x8xf32>
    %406 = vector.shape_cast %405 : vector<2x8xf32> to vector<2x8x1xf32>
    %407 = vector.broadcast %406 : vector<2x8x1xf32> to vector<2x8x8xf32>
    %408 = arith.divf %404, %407 : vector<2x8x8xf32>
    "tpu.trace_start"() <{level = 10 : i32, message = "blm,bme->ble"}> : () -> ()
    %cst_379 = arith.constant dense<0.000000e+00> : vector<2x8x8xf32>
    %409 = tpu.matmul %408, %396, %cst_379 {dimension_numbers = #tpu.dot_dimension_numbers<[2], [1], [1], [2], [0, 0, 0, 1, 1, 2], [0], [0]>} : vector<2x8x8xf32>, vector<2x8x8xf32>, vector<2x8x8xf32> -> vector<2x8x8xf32>
    "tpu.trace_stop"() : () -> ()
    %410 = vector.shape_cast %409 : vector<2x8x8xf32> to vector<16x8xf32>
    %c1_380 = arith.constant 1 : index
    %c3_381 = arith.constant 3 : index
    %c0_382 = arith.constant 0 : index
    %c0_383 = arith.constant 0 : index
    %411 = vector.load %arg4[%c1_380, %c3_381, %c0_382, %c0_383] : memref<2x4x8x32xf32, #tpu.memory_space<vmem>>, vector<1x1x8x32xf32>
    %412 = vector.shape_cast %411 : vector<1x1x8x32xf32> to vector<8x32xf32>
    %cst_384 = arith.constant dense<0.000000e+00> : vector<16x32xf32>
    %413 = tpu.matmul %410, %412, %cst_384 {dimension_numbers = #tpu.dot_dimension_numbers<[1], [0], [0], [1], [0, 0, 1, 1], [], []>} : vector<16x8xf32>, vector<8x32xf32>, vector<16x32xf32> -> vector<16x32xf32>
    %414 = arith.addf %372, %413 : vector<16x32xf32>
    %c6 = arith.constant 6 : index
    %c0_385 = arith.constant 0 : index
    %c0_386 = arith.constant 0 : index
    %415 = vector.load %arg8[%c6, %c0_385, %c0_386] : memref<15x1x32xf32, #tpu.memory_space<vmem>>, vector<1x1x32xf32>
    %416 = vector.shape_cast %415 : vector<1x1x32xf32> to vector<1x32xf32>
    %417 = vector.broadcast %416 : vector<1x32xf32> to vector<16x32xf32>
    %418 = arith.addf %414, %417 : vector<16x32xf32>
    %419 = arith.addf %247, %418 : vector<16x32xf32>
    %c7 = arith.constant 7 : index
    %c0_387 = arith.constant 0 : index
    %c0_388 = arith.constant 0 : index
    %420 = vector.load %arg8[%c7, %c0_387, %c0_388] : memref<15x1x32xf32, #tpu.memory_space<vmem>>, vector<1x1x32xf32>
    %421 = vector.shape_cast %420 : vector<1x1x32xf32> to vector<1x32xf32>
    %c8 = arith.constant 8 : index
    %c0_389 = arith.constant 0 : index
    %c0_390 = arith.constant 0 : index
    %422 = vector.load %arg8[%c8, %c0_389, %c0_390] : memref<15x1x32xf32, #tpu.memory_space<vmem>>, vector<1x1x32xf32>
    %423 = vector.shape_cast %422 : vector<1x1x32xf32> to vector<1x32xf32>
    %cst_391 = arith.constant dense<0.000000e+00> : vector<16xf32>
    %424 = vector.multi_reduction <add>, %419, %cst_391 [1] : vector<16x32xf32> to vector<16xf32>
    %425 = vector.shape_cast %424 : vector<16xf32> to vector<16x1xf32>
    %cst_392 = arith.constant 3.200000e+01 : f32
    %426 = vector.broadcast %cst_392 : f32 to vector<16x1xf32>
    %427 = arith.divf %425, %426 : vector<16x1xf32>
    %428 = vector.broadcast %427 : vector<16x1xf32> to vector<16x32xf32>
    %429 = arith.subf %419, %428 : vector<16x32xf32>
    %430 = arith.mulf %429, %429 : vector<16x32xf32>
    %cst_393 = arith.constant dense<0.000000e+00> : vector<16xf32>
    %431 = vector.multi_reduction <add>, %430, %cst_393 [1] : vector<16x32xf32> to vector<16xf32>
    %432 = vector.shape_cast %431 : vector<16xf32> to vector<16x1xf32>
    %cst_394 = arith.constant 3.200000e+01 : f32
    %433 = vector.broadcast %cst_394 : f32 to vector<16x1xf32>
    %434 = arith.divf %432, %433 : vector<16x1xf32>
    %cst_395 = arith.constant 9.99999974E-6 : f32
    %435 = vector.broadcast %cst_395 : f32 to vector<16x1xf32>
    %436 = arith.addf %434, %435 : vector<16x1xf32>
    %437 = math.rsqrt %436 : vector<16x1xf32>
    %438 = vector.broadcast %437 : vector<16x1xf32> to vector<16x32xf32>
    %439 = arith.mulf %429, %438 : vector<16x32xf32>
    %440 = vector.broadcast %421 : vector<1x32xf32> to vector<16x32xf32>
    %441 = arith.mulf %439, %440 : vector<16x32xf32>
    %442 = vector.broadcast %423 : vector<1x32xf32> to vector<16x32xf32>
    %443 = arith.addf %441, %442 : vector<16x32xf32>
    %c1_396 = arith.constant 1 : index
    %c0_397 = arith.constant 0 : index
    %c0_398 = arith.constant 0 : index
    %444 = vector.load %arg5[%c1_396, %c0_397, %c0_398] : memref<2x32x64xf32, #tpu.memory_space<vmem>>, vector<1x32x64xf32>
    %445 = vector.shape_cast %444 : vector<1x32x64xf32> to vector<32x64xf32>
    %cst_399 = arith.constant dense<0.000000e+00> : vector<16x64xf32>
    %446 = tpu.matmul %443, %445, %cst_399 {dimension_numbers = #tpu.dot_dimension_numbers<[1], [0], [0], [1], [0, 0, 1, 1], [], []>} : vector<16x32xf32>, vector<32x64xf32>, vector<16x64xf32> -> vector<16x64xf32>
    %c1_400 = arith.constant 1 : index
    %c0_401 = arith.constant 0 : index
    %c0_402 = arith.constant 0 : index
    %447 = vector.load %arg6[%c1_400, %c0_401, %c0_402] : memref<2x1x64xf32, #tpu.memory_space<vmem>>, vector<1x1x64xf32>
    %448 = vector.shape_cast %447 : vector<1x1x64xf32> to vector<1x64xf32>
    %449 = vector.broadcast %448 : vector<1x64xf32> to vector<16x64xf32>
    %450 = arith.addf %446, %449 : vector<16x64xf32>
    %cst_403 = arith.constant 5.000000e-01 : f32
    %451 = vector.broadcast %cst_403 : f32 to vector<16x64xf32>
    %452 = arith.mulf %451, %450 : vector<16x64xf32>
    %cst_404 = arith.constant 0.707106769 : f32
    %453 = vector.broadcast %cst_404 : f32 to vector<16x64xf32>
    %454 = arith.mulf %450, %453 : vector<16x64xf32>
    %455 = math.erf %454 : vector<16x64xf32>
    %cst_405 = arith.constant 1.000000e+00 : f32
    %456 = vector.broadcast %cst_405 : f32 to vector<16x64xf32>
    %457 = arith.addf %456, %455 : vector<16x64xf32>
    %458 = arith.mulf %452, %457 : vector<16x64xf32>
    %c1_406 = arith.constant 1 : index
    %c0_407 = arith.constant 0 : index
    %c0_408 = arith.constant 0 : index
    %459 = vector.load %arg7[%c1_406, %c0_407, %c0_408] : memref<2x64x32xf32, #tpu.memory_space<vmem>>, vector<1x64x32xf32>
    %460 = vector.shape_cast %459 : vector<1x64x32xf32> to vector<64x32xf32>
    %cst_409 = arith.constant dense<0.000000e+00> : vector<16x32xf32>
    %461 = tpu.matmul %458, %460, %cst_409 {dimension_numbers = #tpu.dot_dimension_numbers<[1], [0], [0], [1], [0, 0, 1, 1], [], []>} : vector<16x64xf32>, vector<64x32xf32>, vector<16x32xf32> -> vector<16x32xf32>
    %c9 = arith.constant 9 : index
    %c0_410 = arith.constant 0 : index
    %c0_411 = arith.constant 0 : index
    %462 = vector.load %arg8[%c9, %c0_410, %c0_411] : memref<15x1x32xf32, #tpu.memory_space<vmem>>, vector<1x1x32xf32>
    %463 = vector.shape_cast %462 : vector<1x1x32xf32> to vector<1x32xf32>
    %464 = vector.broadcast %463 : vector<1x32xf32> to vector<16x32xf32>
    %465 = arith.addf %461, %464 : vector<16x32xf32>
    %466 = arith.addf %443, %465 : vector<16x32xf32>
    %c10 = arith.constant 10 : index
    %c0_412 = arith.constant 0 : index
    %c0_413 = arith.constant 0 : index
    %467 = vector.load %arg8[%c10, %c0_412, %c0_413] : memref<15x1x32xf32, #tpu.memory_space<vmem>>, vector<1x1x32xf32>
    %468 = vector.shape_cast %467 : vector<1x1x32xf32> to vector<1x32xf32>
    %c11 = arith.constant 11 : index
    %c0_414 = arith.constant 0 : index
    %c0_415 = arith.constant 0 : index
    %469 = vector.load %arg8[%c11, %c0_414, %c0_415] : memref<15x1x32xf32, #tpu.memory_space<vmem>>, vector<1x1x32xf32>
    %470 = vector.shape_cast %469 : vector<1x1x32xf32> to vector<1x32xf32>
    %cst_416 = arith.constant dense<0.000000e+00> : vector<16xf32>
    %471 = vector.multi_reduction <add>, %466, %cst_416 [1] : vector<16x32xf32> to vector<16xf32>
    %472 = vector.shape_cast %471 : vector<16xf32> to vector<16x1xf32>
    %cst_417 = arith.constant 3.200000e+01 : f32
    %473 = vector.broadcast %cst_417 : f32 to vector<16x1xf32>
    %474 = arith.divf %472, %473 : vector<16x1xf32>
    %475 = vector.broadcast %474 : vector<16x1xf32> to vector<16x32xf32>
    %476 = arith.subf %466, %475 : vector<16x32xf32>
    %477 = arith.mulf %476, %476 : vector<16x32xf32>
    %cst_418 = arith.constant dense<0.000000e+00> : vector<16xf32>
    %478 = vector.multi_reduction <add>, %477, %cst_418 [1] : vector<16x32xf32> to vector<16xf32>
    %479 = vector.shape_cast %478 : vector<16xf32> to vector<16x1xf32>
    %cst_419 = arith.constant 3.200000e+01 : f32
    %480 = vector.broadcast %cst_419 : f32 to vector<16x1xf32>
    %481 = arith.divf %479, %480 : vector<16x1xf32>
    %cst_420 = arith.constant 9.99999974E-6 : f32
    %482 = vector.broadcast %cst_420 : f32 to vector<16x1xf32>
    %483 = arith.addf %481, %482 : vector<16x1xf32>
    %484 = math.rsqrt %483 : vector<16x1xf32>
    %485 = vector.broadcast %484 : vector<16x1xf32> to vector<16x32xf32>
    %486 = arith.mulf %476, %485 : vector<16x32xf32>
    %487 = vector.broadcast %468 : vector<1x32xf32> to vector<16x32xf32>
    %488 = arith.mulf %486, %487 : vector<16x32xf32>
    %489 = vector.broadcast %470 : vector<1x32xf32> to vector<16x32xf32>
    %490 = arith.addf %488, %489 : vector<16x32xf32>
    %c12 = arith.constant 12 : index
    %c0_421 = arith.constant 0 : index
    %c0_422 = arith.constant 0 : index
    %491 = vector.load %arg8[%c12, %c0_421, %c0_422] : memref<15x1x32xf32, #tpu.memory_space<vmem>>, vector<1x1x32xf32>
    %492 = vector.shape_cast %491 : vector<1x1x32xf32> to vector<1x32xf32>
    %c13 = arith.constant 13 : index
    %c0_423 = arith.constant 0 : index
    %c0_424 = arith.constant 0 : index
    %493 = vector.load %arg8[%c13, %c0_423, %c0_424] : memref<15x1x32xf32, #tpu.memory_space<vmem>>, vector<1x1x32xf32>
    %494 = vector.shape_cast %493 : vector<1x1x32xf32> to vector<1x32xf32>
    %cst_425 = arith.constant dense<0.000000e+00> : vector<16xf32>
    %495 = vector.multi_reduction <add>, %490, %cst_425 [1] : vector<16x32xf32> to vector<16xf32>
    %496 = vector.shape_cast %495 : vector<16xf32> to vector<16x1xf32>
    %cst_426 = arith.constant 3.200000e+01 : f32
    %497 = vector.broadcast %cst_426 : f32 to vector<16x1xf32>
    %498 = arith.divf %496, %497 : vector<16x1xf32>
    %499 = vector.broadcast %498 : vector<16x1xf32> to vector<16x32xf32>
    %500 = arith.subf %490, %499 : vector<16x32xf32>
    %501 = arith.mulf %500, %500 : vector<16x32xf32>
    %cst_427 = arith.constant dense<0.000000e+00> : vector<16xf32>
    %502 = vector.multi_reduction <add>, %501, %cst_427 [1] : vector<16x32xf32> to vector<16xf32>
    %503 = vector.shape_cast %502 : vector<16xf32> to vector<16x1xf32>
    %cst_428 = arith.constant 3.200000e+01 : f32
    %504 = vector.broadcast %cst_428 : f32 to vector<16x1xf32>
    %505 = arith.divf %503, %504 : vector<16x1xf32>
    %cst_429 = arith.constant 9.99999974E-6 : f32
    %506 = vector.broadcast %cst_429 : f32 to vector<16x1xf32>
    %507 = arith.addf %505, %506 : vector<16x1xf32>
    %508 = math.rsqrt %507 : vector<16x1xf32>
    %509 = vector.broadcast %508 : vector<16x1xf32> to vector<16x32xf32>
    %510 = arith.mulf %500, %509 : vector<16x32xf32>
    %511 = vector.broadcast %492 : vector<1x32xf32> to vector<16x32xf32>
    %512 = arith.mulf %510, %511 : vector<16x32xf32>
    %513 = vector.broadcast %494 : vector<1x32xf32> to vector<16x32xf32>
    %514 = arith.addf %512, %513 : vector<16x32xf32>
    %cst_430 = arith.constant 5.000000e-01 : f32
    %515 = vector.broadcast %cst_430 : f32 to vector<16x32xf32>
    %516 = arith.mulf %515, %514 : vector<16x32xf32>
    %cst_431 = arith.constant 0.707106769 : f32
    %517 = vector.broadcast %cst_431 : f32 to vector<16x32xf32>
    %518 = arith.mulf %514, %517 : vector<16x32xf32>
    %519 = math.erf %518 : vector<16x32xf32>
    %cst_432 = arith.constant 1.000000e+00 : f32
    %520 = vector.broadcast %cst_432 : f32 to vector<16x32xf32>
    %521 = arith.addf %520, %519 : vector<16x32xf32>
    %522 = arith.mulf %516, %521 : vector<16x32xf32>
    %523 = vector.shape_cast %522 : vector<16x32xf32> to vector<2x8x32xf32>
    %524 = vector.extract_strided_slice %523 {offsets = [0, 0, 0], sizes = [2, 1, 32], strides = [1, 1, 1]} : vector<2x8x32xf32> to vector<2x1x32xf32>
    %525 = vector.shape_cast %524 : vector<2x1x32xf32> to vector<2x32xf32>
    %c0_433 = arith.constant 0 : index
    %c0_434 = arith.constant 0 : index
    %c0_435 = arith.constant 0 : index
    %526 = vector.load %arg9[%c0_433, %c0_434, %c0_435] : memref<8x32x2xf32, #tpu.memory_space<vmem>>, vector<1x32x2xf32>
    %527 = vector.shape_cast %526 : vector<1x32x2xf32> to vector<32x2xf32>
    %cst_436 = arith.constant dense<0.000000e+00> : vector<2x2xf32>
    %528 = tpu.matmul %525, %527, %cst_436 {dimension_numbers = #tpu.dot_dimension_numbers<[1], [0], [0], [1], [0, 0, 1, 1], [], []>} : vector<2x32xf32>, vector<32x2xf32>, vector<2x2xf32> -> vector<2x2xf32>
    %529 = vector.extract_strided_slice %523 {offsets = [0, 1, 0], sizes = [2, 1, 32], strides = [1, 1, 1]} : vector<2x8x32xf32> to vector<2x1x32xf32>
    %530 = vector.shape_cast %529 : vector<2x1x32xf32> to vector<2x32xf32>
    %c1_437 = arith.constant 1 : index
    %c0_438 = arith.constant 0 : index
    %c0_439 = arith.constant 0 : index
    %531 = vector.load %arg9[%c1_437, %c0_438, %c0_439] : memref<8x32x2xf32, #tpu.memory_space<vmem>>, vector<1x32x2xf32>
    %532 = vector.shape_cast %531 : vector<1x32x2xf32> to vector<32x2xf32>
    %cst_440 = arith.constant dense<0.000000e+00> : vector<2x2xf32>
    %533 = tpu.matmul %530, %532, %cst_440 {dimension_numbers = #tpu.dot_dimension_numbers<[1], [0], [0], [1], [0, 0, 1, 1], [], []>} : vector<2x32xf32>, vector<32x2xf32>, vector<2x2xf32> -> vector<2x2xf32>
    %534 = arith.addf %528, %533 : vector<2x2xf32>
    %535 = vector.extract_strided_slice %523 {offsets = [0, 2, 0], sizes = [2, 1, 32], strides = [1, 1, 1]} : vector<2x8x32xf32> to vector<2x1x32xf32>
    %536 = vector.shape_cast %535 : vector<2x1x32xf32> to vector<2x32xf32>
    %c2_441 = arith.constant 2 : index
    %c0_442 = arith.constant 0 : index
    %c0_443 = arith.constant 0 : index
    %537 = vector.load %arg9[%c2_441, %c0_442, %c0_443] : memref<8x32x2xf32, #tpu.memory_space<vmem>>, vector<1x32x2xf32>
    %538 = vector.shape_cast %537 : vector<1x32x2xf32> to vector<32x2xf32>
    %cst_444 = arith.constant dense<0.000000e+00> : vector<2x2xf32>
    %539 = tpu.matmul %536, %538, %cst_444 {dimension_numbers = #tpu.dot_dimension_numbers<[1], [0], [0], [1], [0, 0, 1, 1], [], []>} : vector<2x32xf32>, vector<32x2xf32>, vector<2x2xf32> -> vector<2x2xf32>
    %540 = arith.addf %534, %539 : vector<2x2xf32>
    %541 = vector.extract_strided_slice %523 {offsets = [0, 3, 0], sizes = [2, 1, 32], strides = [1, 1, 1]} : vector<2x8x32xf32> to vector<2x1x32xf32>
    %542 = vector.shape_cast %541 : vector<2x1x32xf32> to vector<2x32xf32>
    %c3_445 = arith.constant 3 : index
    %c0_446 = arith.constant 0 : index
    %c0_447 = arith.constant 0 : index
    %543 = vector.load %arg9[%c3_445, %c0_446, %c0_447] : memref<8x32x2xf32, #tpu.memory_space<vmem>>, vector<1x32x2xf32>
    %544 = vector.shape_cast %543 : vector<1x32x2xf32> to vector<32x2xf32>
    %cst_448 = arith.constant dense<0.000000e+00> : vector<2x2xf32>
    %545 = tpu.matmul %542, %544, %cst_448 {dimension_numbers = #tpu.dot_dimension_numbers<[1], [0], [0], [1], [0, 0, 1, 1], [], []>} : vector<2x32xf32>, vector<32x2xf32>, vector<2x2xf32> -> vector<2x2xf32>
    %546 = arith.addf %540, %545 : vector<2x2xf32>
    %547 = vector.extract_strided_slice %523 {offsets = [0, 4, 0], sizes = [2, 1, 32], strides = [1, 1, 1]} : vector<2x8x32xf32> to vector<2x1x32xf32>
    %548 = vector.shape_cast %547 : vector<2x1x32xf32> to vector<2x32xf32>
    %c4_449 = arith.constant 4 : index
    %c0_450 = arith.constant 0 : index
    %c0_451 = arith.constant 0 : index
    %549 = vector.load %arg9[%c4_449, %c0_450, %c0_451] : memref<8x32x2xf32, #tpu.memory_space<vmem>>, vector<1x32x2xf32>
    %550 = vector.shape_cast %549 : vector<1x32x2xf32> to vector<32x2xf32>
    %cst_452 = arith.constant dense<0.000000e+00> : vector<2x2xf32>
    %551 = tpu.matmul %548, %550, %cst_452 {dimension_numbers = #tpu.dot_dimension_numbers<[1], [0], [0], [1], [0, 0, 1, 1], [], []>} : vector<2x32xf32>, vector<32x2xf32>, vector<2x2xf32> -> vector<2x2xf32>
    %552 = arith.addf %546, %551 : vector<2x2xf32>
    %553 = vector.extract_strided_slice %523 {offsets = [0, 5, 0], sizes = [2, 1, 32], strides = [1, 1, 1]} : vector<2x8x32xf32> to vector<2x1x32xf32>
    %554 = vector.shape_cast %553 : vector<2x1x32xf32> to vector<2x32xf32>
    %c5_453 = arith.constant 5 : index
    %c0_454 = arith.constant 0 : index
    %c0_455 = arith.constant 0 : index
    %555 = vector.load %arg9[%c5_453, %c0_454, %c0_455] : memref<8x32x2xf32, #tpu.memory_space<vmem>>, vector<1x32x2xf32>
    %556 = vector.shape_cast %555 : vector<1x32x2xf32> to vector<32x2xf32>
    %cst_456 = arith.constant dense<0.000000e+00> : vector<2x2xf32>
    %557 = tpu.matmul %554, %556, %cst_456 {dimension_numbers = #tpu.dot_dimension_numbers<[1], [0], [0], [1], [0, 0, 1, 1], [], []>} : vector<2x32xf32>, vector<32x2xf32>, vector<2x2xf32> -> vector<2x2xf32>
    %558 = arith.addf %552, %557 : vector<2x2xf32>
    %559 = vector.extract_strided_slice %523 {offsets = [0, 6, 0], sizes = [2, 1, 32], strides = [1, 1, 1]} : vector<2x8x32xf32> to vector<2x1x32xf32>
    %560 = vector.shape_cast %559 : vector<2x1x32xf32> to vector<2x32xf32>
    %c6_457 = arith.constant 6 : index
    %c0_458 = arith.constant 0 : index
    %c0_459 = arith.constant 0 : index
    %561 = vector.load %arg9[%c6_457, %c0_458, %c0_459] : memref<8x32x2xf32, #tpu.memory_space<vmem>>, vector<1x32x2xf32>
    %562 = vector.shape_cast %561 : vector<1x32x2xf32> to vector<32x2xf32>
    %cst_460 = arith.constant dense<0.000000e+00> : vector<2x2xf32>
    %563 = tpu.matmul %560, %562, %cst_460 {dimension_numbers = #tpu.dot_dimension_numbers<[1], [0], [0], [1], [0, 0, 1, 1], [], []>} : vector<2x32xf32>, vector<32x2xf32>, vector<2x2xf32> -> vector<2x2xf32>
    %564 = arith.addf %558, %563 : vector<2x2xf32>
    %565 = vector.extract_strided_slice %523 {offsets = [0, 7, 0], sizes = [2, 1, 32], strides = [1, 1, 1]} : vector<2x8x32xf32> to vector<2x1x32xf32>
    %566 = vector.shape_cast %565 : vector<2x1x32xf32> to vector<2x32xf32>
    %c7_461 = arith.constant 7 : index
    %c0_462 = arith.constant 0 : index
    %c0_463 = arith.constant 0 : index
    %567 = vector.load %arg9[%c7_461, %c0_462, %c0_463] : memref<8x32x2xf32, #tpu.memory_space<vmem>>, vector<1x32x2xf32>
    %568 = vector.shape_cast %567 : vector<1x32x2xf32> to vector<32x2xf32>
    %cst_464 = arith.constant dense<0.000000e+00> : vector<2x2xf32>
    %569 = tpu.matmul %566, %568, %cst_464 {dimension_numbers = #tpu.dot_dimension_numbers<[1], [0], [0], [1], [0, 0, 1, 1], [], []>} : vector<2x32xf32>, vector<32x2xf32>, vector<2x2xf32> -> vector<2x2xf32>
    %570 = arith.addf %564, %569 : vector<2x2xf32>
    %c14 = arith.constant 14 : index
    %c0_465 = arith.constant 0 : index
    %c0_466 = arith.constant 0 : index
    %571 = vector.load %arg8[%c14, %c0_465, %c0_466] : memref<15x1x32xf32, #tpu.memory_space<vmem>>, vector<1x1x32xf32>
    %572 = vector.shape_cast %571 : vector<1x1x32xf32> to vector<1x32xf32>
    %573 = vector.extract_strided_slice %572 {offsets = [0, 0], sizes = [1, 2], strides = [1, 1]} : vector<1x32xf32> to vector<1x2xf32>
    %574 = vector.broadcast %573 : vector<1x2xf32> to vector<2x2xf32>
    %575 = arith.addf %570, %574 : vector<2x2xf32>
    %c0_467 = arith.constant 0 : index
    %c0_468 = arith.constant 0 : index
    %576 = vector.load %arg10[%c0_467, %c0_468] : memref<2x2xf32, #tpu.memory_space<vmem>>, vector<2x2xf32>
    tpu.vector_store %arg10[%c0_467, %c0_468], %575 {strides = array<i32>} : memref<2x2xf32, #tpu.memory_space<vmem>>, vector<2x2xf32>,
    return
  }
}

</mosaic_0001>

<bundles_post_ra>
// kernel: transformer_forward.1
= control target key start
LH: loop header
LB: loop body
LE: loop exit
PB: predicated region body
PF: predicated region fallthrough
CT: control target
= control target key end

     0   :  { %15 = vsyncpa [#allocation3], 0  ;;  %s4517_s0 = inlined_call_operand.vmem [shape: f32[16,16], index: 0, kind: input, shape index: {}]   ;;  %s4518_s1 = inlined_call_operand.hbm [shape: f32[32,32], index: 1, kind: input, shape index: {}]   ;;  %s4519_s2 = inlined_call_operand.hbm [shape: f32[2,3,4,32,8], index: 2, kind: input, shape index: {}]   ;;  %s4520_s3 = inlined_call_operand.hbm [shape: f32[2,3,4,1,8], index: 3, kind: input, shape index: {}]   ;;  %s4521_s4 = inlined_call_operand.hbm [shape: f32[2,4,8,32], index: 4, kind: input, shape index: {}]   ;;  %s4522_s5 = inlined_call_operand.vmem [shape: f32[2,32,64], index: 5, kind: input, shape index: {}]   ;;  %s4523_s6 = inlined_call_operand.vmem [shape: f32[2,1,64], index: 6, kind: input, shape index: {}]   ;;  %s4524_s7 = inlined_call_operand.vmem [shape: f32[2,64,32], index: 7, kind: input, shape index: {}]   ;;  %s4525_s8 = inlined_call_operand.vmem [shape: f32[15,1,32], index: 8, kind: input, shape index: {}]   ;;  %s4526_s9 = inlined_call_operand.hbm [shape: f32[8,32,2], index: 9, kind: input, shape index: {}]   ;;  %s4527_s10 = inlined_call_operand.hbm [shape: f32[2,2], index: 10, kind: output, shape index: {}]  }
   0x1   :  { %16 = vsyncpa [#allocation6], 0 }
   0x2   :  { %17 = vsyncpa [#allocation9], 0 }
   0x3   :  { %18 = vsyncpa [#allocation4], 0  ;;  %s38_s15 = sshll.u32 %s4519_s2, 4  ;;  %s3875_s16 = smov [#allocation5]   ;;  %s39_s15 = int_to_ptr.hbm [resolvable:$true] %s38_s15 }
   0x4   :  { %s40_s17 = sshll.u32 %s3875_s16, 4  ;;  %s64_s20 = sshll.u32 %s4521_s4, 4  ;;  %s41_s17 = int_to_ptr.vmem [resolvable:$true] %s40_s17  ;;  %s65_s20 = int_to_ptr.hbm [resolvable:$true] %s64_s20 }
   0x5   :  { %s3876_s21 = smov 128   ;;  %s3877_s22 = smov 8  }
   0x6   :  { %46 = dma.hbm_to_vmem [thread:$0]  %s39_s15, 12288, %s41_s17, [#allocation6], %s3876_s21, %s3876_s21, %s3877_s22  }
   0x7   :  { %s3878_s23 = smov [#allocation8]   ;;  %s25_s2 = sshll.u32 %s4518_s1, 4  ;;  %s26_s2 = int_to_ptr.hbm [resolvable:$true] %s25_s2 }
   0x8   :  { %s66_s24 = sshll.u32 %s3878_s23, 4  ;;  %s51_s28 = sshll.u32 %s4520_s3, 4  ;;  %s67_s24 = int_to_ptr.vmem [resolvable:$true] %s66_s24  ;;  %s52_s28 = int_to_ptr.hbm [resolvable:$true] %s51_s28 }
   0x9   :  { %72 = dma.hbm_to_vmem [thread:$0]  %s65_s20, 1024, %s67_s24, [#allocation9], %s3876_s21, %s3876_s21, %s3877_s22  }
   0xa   :  { %s3879_s29 = smov [#allocation2]   ;;  %s3880_s11 = smov [#allocation7]  }
   0xb   :  { %s27_s30 = sshll.u32 %s3879_s29, 4  ;;  %s53_s1 = sshll.u32 %s3880_s11, 4  ;;  %s28_s30 = int_to_ptr.vmem [resolvable:$true] %s27_s30  ;;  %s54_s1 = int_to_ptr.vmem [resolvable:$true] %s53_s1 }
   0xc   :  { %33 = dma.hbm_to_vmem [thread:$0]  %s26_s2, 512, %s28_s30, [#allocation3], %s3876_s21, %s3876_s21, %s3877_s22  }
   0xd   :  { %s3881_s12 = smov 16   ;;  %s3882_s13 = smov 1  }
   0xe   :  { %59 = dma.hbm_to_vmem [thread:$0]  %s52_s28, 384, %s54_s1, [#allocation6], %s3881_s12, %s3881_s12, %s3882_s13  }
   0xf   :  { %s85_s16 = sshll.u32 %s4526_s9, 4  ;;  %s3883_s3 = smov [#allocation10]   ;;  %s86_s16 = int_to_ptr.hbm [resolvable:$true] %s85_s16 }
  0x10   :  { %s87_s17 = sshll.u32 %s3883_s3, 4  ;;  %s88_s17 = int_to_ptr.vmem [resolvable:$true] %s87_s17 }
  0x11   :  { %93 = dma.hbm_to_vmem [thread:$0]  %s86_s16, 4096, %s88_s17, [#allocation9], %s3876_s21, %s3876_s21, %s3877_s22  }
  0x12   :  { %3867 = dma.done.wait [#allocation3], 512  }
  0x13   :  { %3868 = vsyncadd [#allocation3], 4294966784 }
  0x14   :  { %3869 = dma.done.wait [#allocation6], 12672  }
  0x15   :  { %3870 = vsyncadd [#allocation6], 4294954624 }
  0x16   :  { %3871 = dma.done.wait [#allocation9], 5120  }
  0x17   :  { %3872 = vsyncadd [#allocation9], 4294962176  ;;  %v117_v0 = vld [vmem:[#allocation2 + $0x8] sm:$0xff]  ;;  %v116_v1 = vld [vmem:[#allocation2] sm:$0xff]  ;;  %vm120_vm0 = vcmask 130048   ;;  %vm158_vm1 = vcmask 261120  }
  0x18   :  { %141 = vmatpush.msra.mxu0 %v117_v0  ;;  %v114_v2 = vld [vmem:[%s4517_s0] sm:$0xff]  ;;  %v153_v3 = vld [vmem:[#allocation5 + $0x18] sm:$0xff]  ;;  %v152_v6 = vld [vmem:[#allocation5 + $0x10] sm:$0xff]  ;;  %vm254_vm2 = vcmask 64512   ;;  %s3398_s23 = sshll.u32 %s4527_s10, 4  ;;  %s3399_s23 = int_to_ptr.hbm [resolvable:$true] %s3398_s23 }
  0x19   :  { %v192_v4 = vld [vmem:[#allocation5 + $0x98] sm:$0xff]  ;;  %177 = vmatpush.msra.mxu1 %v153_v3  ;;  %v191_v7 = vld [vmem:[#allocation5 + $0x90] sm:$0xff]  ;;  %v115_v9 = vld [vmem:[%s4517_s0 + $0x8] sm:$0xff]  ;;  %s3885_s0 = smov [#allocation11]  }
  0x1a   :  { %210 = vmatpush.msra.mxu2 %v192_v4  ;;  %v225_v5 = vld [vmem:[#allocation5 + $0x118] sm:$0xff]  ;;  %142 = vmatpush.msra.mxu0 %v116_v1  ;;  %v224_v8 = vld [vmem:[#allocation5 + $0x110] sm:$0xff]  ;;  %v151_v10 = vld [vmem:[#allocation5 + $0x8] sm:$0xff]  ;;  %s3396_s21 = sshll.u32 %s3885_s0, 4  ;;  %s3397_s21 = int_to_ptr.vmem [resolvable:$true] %s3396_s21 }
  0x1b   :  { %243 = vmatpush.msra.mxu3 %v225_v5  ;;  %3410 = vmatmul.msk.f32.vlgmr.msra.gmra.mxu0 %vm120_vm0, %v114_v2  ;;  %v190_v11 = vld [vmem:[#allocation5 + $0x88] sm:$0xff]  ;;  %v150_v13 = vld [vmem:[#allocation5] sm:$0xff]  ;;  %v118_v16 = vld [vmem:[#allocation2 + $0x10] sm:$0xff] }
  0x1c   :  { %178 = vmatpush.msra.mxu1 %v152_v6  ;;  %211 = vmatpush.msra.mxu2 %v191_v7  ;;  %v223_v12 = vld [vmem:[#allocation5 + $0x108] sm:$0xff]  ;;  %v189_v14 = vld [vmem:[#allocation5 + $0x80] sm:$0xff]  ;;  %v119_v19 = vld [vmem:[#allocation2 + $0x18] sm:$0xff] }
  0x1d   :  { %244 = vmatpush.msra.mxu3 %v224_v8  ;;  %v222_v15 = vld [vmem:[#allocation5 + $0x100] sm:$0xff]  ;;  %v3586_v23 = vld [vmem:[#allocation7 + $0x8] ss:$0 sm:$0xff]  ;;  %v408_v29 = vld [vmem:[#allocation5 + $0x38] sm:$0xff] }
  0x1e   :  { %179 = vmatpush.msra.mxu1 %v151_v10  ;;  %212 = vmatpush.msra.mxu2 %v190_v11  ;;  %v3585_v22 = vld [vmem:[#allocation7 + $0x4] ss:$0 sm:$0xff]  ;;  %v3584_v25 = vld [vmem:[#allocation7] ss:$0 sm:$0xff]  ;;  %v407_v32 = vld [vmem:[#allocation5 + $0x30] sm:$0xff] }
  0x1f   :  { %245 = vmatpush.msra.mxu3 %v223_v12  ;;  %v406_v33 = vld [vmem:[#allocation5 + $0x28] sm:$0xff]  ;;  %v405_v35 = vld [vmem:[#allocation5 + $0x20] sm:$0xff]  ;;  %v441_v39 = vld [vmem:[#allocation5 + $0xb8] sm:$0xff] }
  0x20   :  { %180 = vmatpush.msra.mxu1 %v150_v13  ;;  %213 = vmatpush.msra.mxu2 %v189_v14  ;;  %v440_v42 = vld [vmem:[#allocation5 + $0xb0] sm:$0xff]  ;;  %v439_v43 = vld [vmem:[#allocation5 + $0xa8] sm:$0xff]  ;;  %v438_v44 = vld [vmem:[#allocation5 + $0xa0] sm:$0xff] }
  0x21   :  { %246 = vmatpush.msra.mxu3 %v222_v15  ;;  %v3588_v51 = vld [vmem:[#allocation7 + $0x5] ss:$0 sm:$0xff]  ;;  %v474_v0 = vld [vmem:[#allocation5 + $0x138] sm:$0xff]  ;;  %v473_v1 = vld [vmem:[#allocation5 + $0x130] sm:$0xff] }
  0x22   :  { %v472_v2 = vld [vmem:[#allocation5 + $0x128] sm:$0xff]  ;;  %v471_v3 = vld [vmem:[#allocation5 + $0x120] sm:$0xff] }
  0x23   :  { %3411 = vmatmul.msk.f32.gmra.mxu0 %vm120_vm0, %v115_v9 }
  0x98   :  { %v144_v17 = vpop.f32.mrf.mxu0 }
  0x99   :  { %v3976_v18 = vadd.f32 %v144_v17, %v118_v16 }
  0x9b   :  { %3412 = vmatmul.msk.f32.vlgmr.msra.gmra.mxu1 %vm158_vm1, %v3976_v18  ;;  %3414 = vmatmul.msk.f32.vlgmr.msra.gmra.mxu2 %vm158_vm1, %v3976_v18 }
  0x9c   :  { %3416 = vmatmul.msk.f32.vlgmr.msra.gmra.mxu3 %vm158_vm1, %v3976_v18 }
  0xa0   :  { %v147_v20 = vpop.f32.mrf.mxu0 }
  0xa1   :  { %v3984_v21 = vadd.f32 %v147_v20, %v119_v19 }
  0xa3   :  { %3413 = vmatmul.msk.f32.gmra.mxu1 %vm158_vm1, %v3984_v21  ;;  %3415 = vmatmul.msk.f32.gmra.mxu2 %vm158_vm1, %v3984_v21 }
  0xa4   :  { %3417 = vmatmul.msk.f32.gmra.mxu3 %vm158_vm1, %v3984_v21 }
 0x118   :  { %v182_v24 = vpop.f32.mrf.mxu1 }
 0x119   :  { %v183_v31 = vadd.f32 %v3584_v25, %v182_v24 }
 0x11e   :  { %v215_v26 = vpop.f32.mrf.mxu2 }
 0x11f   :  { %v216_v27 = vadd.f32 %v3585_v22, %v215_v26  ;;  %v248_v28 = vpop.f32.mrf.mxu3 }
 0x120   :  { %v249_v30 = vadd.f32 %v3586_v23, %v248_v28  ;;  %v185_v36 = vpop.f32.mrf.mxu1 }
 0x121   :  { %3418 = vmatpush.xpose.msk.msrb.mxu0 %vm254_vm2, %v216_v27  ;;  %v186_v41 = vadd.f32 %v3584_v25, %v185_v36 }
 0x122   :  { %375 = vmatpush.msrb.mxu2 %v249_v30 }
 0x124   :  { %3419 = vmatmul.msk.f32.vlgmr.msrb.gmra.mxu0 %vm254_vm2, %v183_v31  ;;  %492 = vmatpush.msra.mxu2 %v474_v0  ;;  %v745_v0 = vld [vmem:[#allocation5 + $0xc0] sm:$0xff] }
 0x125   :  { %426 = vmatpush.msra.mxu0 %v408_v29 }
 0x126   :  { %v218_v34 = vpop.f32.mrf.mxu2  ;;  %493 = vmatpush.msra.mxu2 %v473_v1  ;;  %v715_v1 = vld [vmem:[#allocation5 + $0x58] sm:$0xff] }
 0x127   :  { %427 = vmatpush.msra.mxu0 %v407_v32  ;;  %v219_v37 = vadd.f32 %v3585_v22, %v218_v34  ;;  %v251_v38 = vpop.f32.mrf.mxu3 }
 0x128   :  { %v252_v40 = vadd.f32 %v3586_v23, %v251_v38  ;;  %494 = vmatpush.msra.mxu2 %v472_v2  ;;  %v714_v2 = vld [vmem:[#allocation5 + $0x50] sm:$0xff] }
 0x129   :  { %428 = vmatpush.msra.mxu0 %v406_v33  ;;  %3420 = vmatpush.xpose.msk.msrb.mxu1 %vm254_vm2, %v219_v37  ;;  %v3587_v33 = vld [vmem:[#allocation7 + $0x1] ss:$0 sm:$0xff]  ;;  %v403_v37 = vld [vmem:[#allocation8] sm:$0xff] }
 0x12a   :  { %398 = vmatpush.msrb.mxu3 %v252_v40  ;;  %495 = vmatpush.msra.mxu2 %v471_v3  ;;  %v713_v3 = vld [vmem:[#allocation5 + $0x48] sm:$0xff] }
 0x12b   :  { %429 = vmatpush.msra.mxu0 %v405_v35 }
 0x12c   :  { %3421 = vmatmul.msk.f32.vlgmr.msrb.gmra.mxu1 %vm254_vm2, %v186_v41  ;;  %3424 = vmatmul.msk.f32.vlgmr.msra.gmra.mxu0 %vm158_vm1, %v3976_v18 }
 0x12d   :  { %459 = vmatpush.msra.mxu1 %v441_v39  ;;  %v3589_v39 = vld [vmem:[#allocation7 + $0x9] ss:$0 sm:$0xff] }
 0x12f   :  { %460 = vmatpush.msra.mxu1 %v440_v42 }
 0x131   :  { %461 = vmatpush.msra.mxu1 %v439_v43 }
 0x133   :  { %462 = vmatpush.msra.mxu1 %v438_v44 }
 0x134   :  { %3425 = vmatmul.msk.f32.gmra.mxu0 %vm158_vm1, %v3984_v21  ;;  %3426 = vmatmul.msk.f32.vlgmr.msra.gmra.mxu1 %vm158_vm1, %v3976_v18 }
 0x13c   :  { %3427 = vmatmul.msk.f32.gmra.mxu1 %vm158_vm1, %v3984_v21 }
 0x1a1   :  { %v278_v45 = vpop.f32.mrf.mxu0 }
 0x1a2   :  { %v307_v46 = vmul.f32 0.35355338, %v278_v45 }
 0x1a4   :  { %v309_v47 = vsel %vm254_vm2, %v307_v46, -inf }
 0x1a5   :  { %310 = vmax.xlane.f32.xlu1 %v309_v47 }
 0x1a9   :  { %v304_v48 = vpop.f32.mrf.mxu1  ;;  %v431_v32 = vpop.f32.mrf.mxu0 }
 0x1aa   :  { %v308_v49 = vmul.f32 0.35355338, %v304_v48  ;;  %v432_v34 = vadd.f32 %v3587_v33, %v431_v32  ;;  %v781_v32 = vld [vmem:[#allocation5 + $0x158] sm:$0xff] }
 0x1ac   :  { %v312_v50 = vsel %vm254_vm2, %v308_v49, -inf }
 0x1ad   :  { %313 = vmax.xlane.f32.xlu0 %v312_v50 }
 0x1b1   :  { %v464_v52 = vpop.f32.mrf.mxu1  ;;  %v434_v35 = vpop.f32.mrf.mxu0 }
 0x1b2   :  { %v465_v53 = vadd.f32 %v3588_v51, %v464_v52  ;;  %v435_v36 = vadd.f32 %v3587_v33, %v434_v35  ;;  %v780_v33 = vld [vmem:[#allocation5 + $0x150] sm:$0xff]  ;;  %v778_v35 = vld [vmem:[#allocation5 + $0x140] sm:$0xff] }
 0x1b4   :  { %3430 = vmatpush.xpose.msk.msra.mxu3 %vm254_vm2, %v465_v53 }
 0x1b9   :  { %v467_v27 = vpop.f32.mrf.mxu1 }
 0x1ba   :  { %v468_v31 = vadd.f32 %v3588_v51, %v467_v27 }
 0x218   :  { %v311_v54 = vpop.xlane.xlu1 %310 }
 0x219   :  { %v315_v55 = vsub.f32 %v307_v46, %v311_v54 }
 0x21b   :  { %v317_v56 = vmul.f32 1.442695, %v315_v55 }
 0x21d   :  { %3625 = vpow2.f32 %v317_v56 }
 0x220   :  { %v314_v57 = vpop.xlane.xlu0 %313 }
 0x221   :  { %v316_v58 = vsub.f32 %v308_v49, %v314_v57 }
 0x223   :  { %v3626_v59 = vpop.eup %3625  ;;  %v319_v60 = vmul.f32 1.442695, %v316_v58 }
 0x224   :  { %v321_v61 = vsel %vm254_vm2, %v3626_v59, 0.0 }
 0x225   :  { %3627 = vpow2.f32 %v319_v60  ;;  %322 = vadd.xlane.f32.xlu1 %v321_v61  ;;  %v748_v61 = vld [vmem:[#allocation5 + $0xd8] sm:$0xff] }
 0x22b   :  { %v3628_v62 = vpop.eup %3627 }
 0x22c   :  { %v324_v63 = vsel %vm254_vm2, %v3628_v62, 0.0 }
 0x22d   :  { %325 = vadd.xlane.f32.xlu0 %v324_v63  ;;  %v746_v63 = vld [vmem:[#allocation5 + $0xc8] sm:$0xff] }
 0x298   :  { %v323_v4 = vpop.xlane.xlu1 %322 }
 0x299   :  { %3629 = vrcp.f32 %v323_v4  ;;  %v338_v9 = vand.u32 2147483648, %v323_v4  ;;  %v336_v11 = vand.u32 2147483647, %v323_v4  ;;  %vm332_vm4 = vweird.f32 %v323_v4 }
 0x29b   :  { %v339_v14 = vor.u32 1.1754944e-38, %v338_v9  ;;  %vm337_vm6 = vcmp.eq.f32.partialorder %v336_v11, 8.507059e+37 }
 0x29f   :  { %v3630_v5 = vpop.eup %3629 }
 0x2a0   :  { %v328_v6 = vmul.f32 %v3630_v5, %v323_v4  ;;  %v326_v7 = vpop.xlane.xlu0 %325  ;;  %vm333_vm3 = vweird.f32 %v3630_v5 }
 0x2a1   :  { %3631 = vrcp.f32 %v326_v7  ;;  %vm334_vm5 = vmor %vm332_vm4, %vm333_vm3  ;;  %v353_v22 = vand.u32 2147483648, %v326_v7  ;;  %v351_v24 = vand.u32 2147483647, %v326_v7  ;;  %vm347_vm8 = vweird.f32 %v326_v7 }
 0x2a2   :  { %v329_v8 = vsub.f32 1.0, %v328_v6 }
 0x2a3   :  { %v354_v26 = vor.u32 1.1754944e-38, %v353_v22  ;;  %vm352_vm10 = vcmp.eq.f32.partialorder %v351_v24, 8.507059e+37 }
 0x2a4   :  { %v330_v10 = vmul.f32 %v3630_v5, %v329_v8 }
 0x2a6   :  { %v331_v12 = vadd.f32 %v3630_v5, %v330_v10 }
 0x2a7   :  { %v3632_v13 = vpop.eup %3631 }
 0x2a8   :  { %v343_v15 = vmul.f32 %v3632_v13, %v326_v7  ;;  %v335_v16 = vsel %vm334_vm5, %v3630_v5, %v331_v12  ;;  %vm348_vm7 = vweird.f32 %v3632_v13  ;;  %v712_v5 = vld [vmem:[#allocation5 + $0x40] sm:$0xff] }
 0x2a9   :  { %v340_v17 = vsel %vm337_vm6, %v339_v14, %v335_v16  ;;  %vm349_vm9 = vmor %vm347_vm8, %vm348_vm7 }
 0x2aa   :  { %v344_v19 = vsub.f32 1.0, %v343_v15  ;;  %v341_v20 = vmul.f32 %v3626_v59, %v340_v17 }
 0x2ac   :  { %v345_v23 = vmul.f32 %v3632_v13, %v344_v19  ;;  %3422 = vmatmul.msk.f32.vlgmr.msrb.gmra.mxu2 %vm254_vm2, %v341_v20 }
 0x2ae   :  { %v346_v25 = vadd.f32 %v3632_v13, %v345_v23 }
 0x2b0   :  { %v350_v28 = vsel %vm349_vm9, %v3632_v13, %v346_v25 }
 0x2b1   :  { %v355_v29 = vsel %vm352_vm10, %v354_v26, %v350_v28 }
 0x2b2   :  { %v356_v30 = vmul.f32 %v3628_v62, %v355_v29  ;;  %v747_v62 = vld [vmem:[#allocation5 + $0xd0] sm:$0xff] }
 0x2b4   :  { %3423 = vmatmul.msk.f32.vlgmr.msrb.gmra.mxu3 %vm254_vm2, %v356_v30  ;;  %3428 = vmatmul.msk.f32.vlgmr.msra.gmra.mxu2 %vm158_vm1, %v3976_v18 }
 0x2b5   :  { %3432 = vmatpush.xpose.msk.msrb.mxu3 %vm254_vm2, %v468_v31  ;;  %v652_v31 = vld [vmem:[#allocation8 + $0x8] sm:$0xff] }
 0x2b6   :  { %674 = vmatpush.msrb.mxu2 %v652_v31 }
 0x2b8   :  { %799 = vmatpush.msra.mxu2 %v781_v32 }
 0x2ba   :  { %800 = vmatpush.msra.mxu2 %v780_v33 }
 0x2bc   :  { %3429 = vmatmul.msk.f32.gmra.mxu2 %vm158_vm1, %v3984_v21  ;;  %3431 = vmatmul.msk.f32.vlgmr.msra.gmra.mxu3 %vm254_vm2, %v432_v34  ;;  %v779_v34 = vld [vmem:[#allocation5 + $0x148] sm:$0xff] }
 0x2bd   :  { %703 = vmatpush.msra.mxu3 %v403_v37  ;;  %801 = vmatpush.msra.mxu2 %v779_v34  ;;  %v3590_v37 = vld [vmem:[#allocation7 + $0x6] ss:$0 sm:$0xff] }
 0x2bf   :  { %802 = vmatpush.msra.mxu2 %v778_v35 }
 0x2c4   :  { %3433 = vmatmul.msk.f32.vlgmr.msrb.gmra.mxu3 %vm254_vm2, %v435_v36 }
 0x32f   :  { %v377_v38 = vpop.f32.mrf.mxu2 }
 0x330   :  { %3438 = vmatmul.msk.f32.vlgmr.msra.gmra.mxu3 %vm254_vm2, %v377_v38  ;;  %v1028_v38 = vld [vmem:[#allocation5 + $0xf8] sm:$0xff] }
 0x337   :  { %v400_v40 = vpop.f32.mrf.mxu3  ;;  %v497_v41 = vpop.f32.mrf.mxu2 }
 0x338   :  { %v498_v42 = vadd.f32 %v3589_v39, %v497_v41  ;;  %3439 = vmatmul.msk.f32.gmra.mxu3 %vm254_vm2, %v400_v40 }
 0x33a   :  { %623 = vmatpush.msrb.mxu0 %v498_v42  ;;  %v1027_v42 = vld [vmem:[#allocation5 + $0xf0] sm:$0xff] }
 0x33c   :  { %733 = vmatpush.msra.mxu0 %v715_v1 }
 0x33e   :  { %734 = vmatpush.msra.mxu0 %v714_v2 }
 0x33f   :  { %v500_v43 = vpop.f32.mrf.mxu2  ;;  %v526_v44 = vpop.f32.mrf.mxu3 }
 0x340   :  { %v501_v45 = vadd.f32 %v3589_v39, %v500_v43  ;;  %v555_v49 = vmul.f32 0.35355338, %v526_v44  ;;  %735 = vmatpush.msra.mxu0 %v713_v3  ;;  %v1026_v43 = vld [vmem:[#allocation5 + $0xe8] sm:$0xff]  ;;  %v3591_v44 = vld [vmem:[#allocation7 + $0x2] ss:$0 sm:$0xff] }
 0x342   :  { %646 = vmatpush.msrb.mxu1 %v501_v45  ;;  %v557_v50 = vsel %vm254_vm2, %v555_v49, -inf  ;;  %736 = vmatpush.msra.mxu0 %v712_v5  ;;  %v1025_v45 = vld [vmem:[#allocation5 + $0xe0] sm:$0xff] }
 0x343   :  { %v4056_v5 = vld [vmem:[#allocation7 + $0x7] ss:$0 sm:$0xff] }
 0x344   :  { %766 = vmatpush.msra.mxu1 %v748_v61 }
 0x346   :  { %767 = vmatpush.msra.mxu1 %v747_v62 }
 0x347   :  { %v552_v46 = vpop.f32.mrf.mxu3 }
 0x348   :  { %v556_v47 = vmul.f32 0.35355338, %v552_v46  ;;  %768 = vmatpush.msra.mxu1 %v746_v63  ;;  %v3592_v63 = vld [vmem:[#allocation7 + $0xa] ss:$0 sm:$0xff] }
 0x34a   :  { %v560_v48 = vsel %vm254_vm2, %v556_v47, -inf  ;;  %769 = vmatpush.msra.mxu1 %v745_v0 }
 0x34b   :  { %561 = vmax.xlane.f32.xlu2 %v560_v48 }
 0x353   :  { %558 = vmax.xlane.f32.xlu2 %v557_v50 }
 0x3be   :  { %v562_v51 = vpop.xlane.xlu2 %561 }
 0x3bf   :  { %v564_v52 = vsub.f32 %v556_v47, %v562_v51 }
 0x3c1   :  { %v567_v53 = vmul.f32 1.442695, %v564_v52  ;;  %v4048_v52 = vpop.f32.mrf.mxu3 }
 0x3c3   :  { %3633 = vpow2.f32 %v567_v53 }
 0x3c6   :  { %v559_v54 = vpop.xlane.xlu2 %558 }
 0x3c7   :  { %v563_v55 = vsub.f32 %v555_v49, %v559_v54  ;;  %v959_v54 = vld [vmem:[#allocation8 + $0x10] sm:$0xff] }
 0x3c9   :  { %v3634_v56 = vpop.eup %3633  ;;  %v565_v57 = vmul.f32 1.442695, %v563_v55  ;;  %v708_v55 = vpop.f32.mrf.mxu3 }
 0x3ca   :  { %v572_v58 = vsel %vm254_vm2, %v3634_v56, 0.0 }
 0x3cb   :  { %3635 = vpow2.f32 %v565_v57  ;;  %573 = vadd.xlane.f32.xlu0 %v572_v58 }
 0x3d1   :  { %v3636_v59 = vpop.eup %3635 }
 0x3d2   :  { %v569_v60 = vsel %vm254_vm2, %v3636_v59, 0.0 }
 0x3d3   :  { %570 = vadd.xlane.f32.xlu1 %v569_v60 }
 0x43e   :  { %v574_v4 = vpop.xlane.xlu0 %573 }
 0x43f   :  { %3637 = vrcp.f32 %v574_v4  ;;  %v601_v10 = vand.u32 2147483648, %v574_v4  ;;  %v599_v12 = vand.u32 2147483647, %v574_v4  ;;  %vm595_vm12 = vweird.f32 %v574_v4 }
 0x441   :  { %v602_v15 = vor.u32 1.1754944e-38, %v601_v10  ;;  %vm600_vm14 = vcmp.eq.f32.partialorder %v599_v12, 8.507059e+37 }
 0x445   :  { %v3638_v6 = vpop.eup %3637 }
 0x446   :  { %v591_v7 = vmul.f32 %v3638_v6, %v574_v4  ;;  %v571_v8 = vpop.xlane.xlu1 %570  ;;  %vm596_vm11 = vweird.f32 %v3638_v6 }
 0x447   :  { %3639 = vrcp.f32 %v571_v8  ;;  %vm597_vm13 = vmor %vm595_vm12, %vm596_vm11  ;;  %v586_v23 = vand.u32 2147483648, %v571_v8  ;;  %v584_v25 = vand.u32 2147483647, %v571_v8  ;;  %vm580_vm0 = vweird.f32 %v571_v8 }
 0x448   :  { %v592_v9 = vsub.f32 1.0, %v591_v7 }
 0x449   :  { %v587_v27 = vor.u32 1.1754944e-38, %v586_v23  ;;  %vm585_vm4 = vcmp.eq.f32.partialorder %v584_v25, 8.507059e+37  ;;  %v992_v23 = vld [vmem:[#allocation5 + $0x60] sm:$0xff]  ;;  %v1060_v25 = vld [vmem:[#allocation5 + $0x170] sm:$0xff] }
 0x44a   :  { %v593_v11 = vmul.f32 %v3638_v6, %v592_v9 }
 0x44c   :  { %v594_v13 = vadd.f32 %v3638_v6, %v593_v11 }
 0x44d   :  { %v3640_v14 = vpop.eup %3639 }
 0x44e   :  { %v598_v16 = vsel %vm597_vm13, %v3638_v6, %v594_v13  ;;  %v576_v17 = vmul.f32 %v3640_v14, %v571_v8  ;;  %vm581_vm15 = vweird.f32 %v3640_v14 }
 0x44f   :  { %v603_v19 = vsel %vm600_vm14, %v602_v15, %v598_v16  ;;  %vm582_vm3 = vmor %vm580_vm0, %vm581_vm15 }
 0x450   :  { %v577_v20 = vsub.f32 1.0, %v576_v17  ;;  %v604_v22 = vmul.f32 %v3634_v56, %v603_v19  ;;  %v995_v19 = vld [vmem:[#allocation5 + $0x78] sm:$0xff] }
 0x452   :  { %v578_v24 = vmul.f32 %v3640_v14, %v577_v20  ;;  %3435 = vmatmul.msk.f32.vlgmr.msrb.gmra.mxu1 %vm254_vm2, %v604_v22  ;;  %v994_v20 = vld [vmem:[#allocation5 + $0x70] sm:$0xff]  ;;  %v993_v22 = vld [vmem:[#allocation5 + $0x68] sm:$0xff] }
 0x454   :  { %v579_v26 = vadd.f32 %v3640_v14, %v578_v24  ;;  %v1061_v24 = vld [vmem:[#allocation5 + $0x178] sm:$0xff] }
 0x456   :  { %v583_v28 = vsel %vm582_vm3, %v3640_v14, %v579_v26  ;;  %v1059_v26 = vld [vmem:[#allocation5 + $0x168] sm:$0xff] }
 0x457   :  { %v588_v29 = vsel %vm585_vm4, %v587_v27, %v583_v28  ;;  %v1058_v27 = vld [vmem:[#allocation5 + $0x160] sm:$0xff] }
 0x458   :  { %v589_v30 = vmul.f32 %v3636_v59, %v588_v29 }
 0x45a   :  { %3434 = vmatmul.msk.f32.vlgmr.msrb.gmra.mxu0 %vm254_vm2, %v589_v30  ;;  %3442 = vmatmul.msk.f32.vlgmr.msra.gmra.mxu1 %vm158_vm1, %v3976_v18 }
 0x462   :  { %3440 = vmatmul.msk.f32.vlgmr.msra.gmra.mxu0 %vm158_vm1, %v3976_v18  ;;  %3443 = vmatmul.msk.f32.gmra.mxu1 %vm158_vm1, %v3984_v21 }
 0x46a   :  { %3441 = vmatmul.msk.f32.gmra.mxu0 %vm158_vm1, %v3984_v21 }
 0x4cf   :  { %v648_v36 = vpop.f32.mrf.mxu1 }
 0x4d7   :  { %v625_v39 = vpop.f32.mrf.mxu0  ;;  %v771_v40 = vpop.f32.mrf.mxu1 }
 0x4d8   :  { %v772_v41 = vadd.f32 %v3590_v37, %v771_v40  ;;  %3436 = vmatmul.msk.f32.vlgmr.msrb.gmra.mxu2 %vm254_vm2, %v625_v39 }
 0x4d9   :  { %1046 = vmatpush.msrb.mxu2 %v1028_v38 }
 0x4da   :  { %3446 = vmatpush.xpose.msk.msrb.mxu3 %vm254_vm2, %v772_v41 }
 0x4db   :  { %1047 = vmatpush.msrb.mxu2 %v1027_v42 }
 0x4dd   :  { %1048 = vmatpush.msrb.mxu2 %v1026_v43 }
 0x4df   :  { %v738_v46 = vpop.f32.mrf.mxu0  ;;  %v774_v47 = vpop.f32.mrf.mxu1  ;;  %1049 = vmatpush.msrb.mxu2 %v1025_v45 }
 0x4e0   :  { %v739_v48 = vadd.f32 %v3591_v44, %v738_v46  ;;  %v775_v49 = vadd.f32 %v3590_v37, %v774_v47  ;;  %3437 = vmatmul.msk.f32.gmra.mxu2 %vm254_vm2, %v648_v36 }
 0x4e2   :  { %3447 = vmatmul.msk.f32.vlgmr.msrb.gmra.mxu3 %vm254_vm2, %v739_v48  ;;  %3448 = vmatpush.xpose.msk.msrb.mxu0 %vm254_vm2, %v775_v49 }
 0x4e6   :  { %981 = vmatpush.msra.mxu0 %v959_v54 }
 0x4e7   :  { %v741_v50 = vpop.f32.mrf.mxu0 }
 0x4e8   :  { %v742_v51 = vadd.f32 %v3591_v44, %v741_v50  ;;  %3444 = vmatmul.msk.f32.vlgmr.msra.gmra.mxu2 %vm158_vm1, %v3976_v18 }
 0x4ea   :  { %3449 = vmatmul.msk.f32.vlgmr.msrb.gmra.mxu0 %vm254_vm2, %v742_v51 }
 0x4f0   :  { %3445 = vmatmul.msk.f32.gmra.mxu2 %vm158_vm1, %v3984_v21 }
 0x4f8   :  { %3456 = vmatmul.msk.f32.vlgmr.msrb.gmra.mxu2 %vm158_vm1, %v3976_v18 }
 0x500   :  { %3457 = vmatmul.msk.f32.gmra.mxu2 %vm158_vm1, %v3984_v21 }
 0x55b   :  { %v4050_v53 = vpop.f32.mrf.mxu2 }
 0x563   :  { %v679_v56 = vpop.f32.mrf.mxu2 }
 0x564   :  { %v4052_v57 = vadd.f32 %v708_v55, %v679_v56 }
 0x565   :  { %v833_v58 = vpop.f32.mrf.mxu3 }
 0x566   :  { %v862_v59 = vmul.f32 0.35355338, %v833_v58 }
 0x567   :  { %v859_v60 = vpop.f32.mrf.mxu0 }
 0x568   :  { %v863_v61 = vmul.f32 0.35355338, %v859_v60  ;;  %v864_v62 = vsel %vm254_vm2, %v862_v59, -inf  ;;  %v3594_v60 = vld [vmem:[#allocation7 + $0x3] ss:$0 sm:$0xff] }
 0x569   :  { %865 = vmax.xlane.f32.xlu2 %v864_v62 }
 0x56a   :  { %v867_v0 = vsel %vm254_vm2, %v863_v61, -inf }
 0x56b   :  { %868 = vmax.xlane.f32.xlu0 %v867_v0  ;;  %v804_v1 = vpop.f32.mrf.mxu2 }
 0x56c   :  { %v805_v2 = vadd.f32 %v3592_v63, %v804_v1 }
 0x56e   :  { %930 = vmatpush.msrb.mxu1 %v805_v2 }
 0x570   :  { %1013 = vmatpush.msra.mxu1 %v995_v19 }
 0x572   :  { %1014 = vmatpush.msra.mxu1 %v994_v20 }
 0x573   :  { %v807_v3 = vpop.f32.mrf.mxu2 }
 0x574   :  { %v808_v4 = vadd.f32 %v3592_v63, %v807_v3  ;;  %1015 = vmatpush.msra.mxu1 %v993_v22 }
 0x576   :  { %953 = vmatpush.msra.mxu3 %v808_v4  ;;  %1016 = vmatpush.msra.mxu1 %v992_v23 }
 0x578   :  { %1079 = vmatpush.msrb.mxu3 %v1061_v24 }
 0x57a   :  { %1080 = vmatpush.msrb.mxu3 %v1060_v25 }
 0x57b   :  { %v1051_v6 = vpop.f32.mrf.mxu2 }
 0x57c   :  { %v1052_v7 = vadd.f32 %v4056_v5, %v1051_v6  ;;  %1081 = vmatpush.msrb.mxu3 %v1059_v26 }
 0x57e   :  { %3460 = vmatpush.xpose.msk.msrb.mxu0 %vm254_vm2, %v1052_v7  ;;  %1082 = vmatpush.msrb.mxu3 %v1058_v27 }
 0x583   :  { %v1054_v44 = vpop.f32.mrf.mxu2 }
 0x584   :  { %v1055_v51 = vadd.f32 %v4056_v5, %v1054_v44  ;;  %v706_v5 = vadd.f32 %v4048_v52, %v4050_v53 }
 0x5dc   :  { %v866_v8 = vpop.xlane.xlu2 %865 }
 0x5dd   :  { %v870_v9 = vsub.f32 %v862_v59, %v866_v8 }
 0x5de   :  { %v869_v10 = vpop.xlane.xlu0 %868 }
 0x5df   :  { %v872_v11 = vmul.f32 1.442695, %v870_v9  ;;  %v871_v12 = vsub.f32 %v863_v61, %v869_v10  ;;  %v3595_v61 = vld [vmem:[#allocation7 + $0xb] ss:$0 sm:$0xff] }
 0x5e1   :  { %3641 = vpow2.f32 %v872_v11  ;;  %v874_v13 = vmul.f32 1.442695, %v871_v12 }
 0x5e3   :  { %3643 = vpow2.f32 %v874_v13 }
 0x5e7   :  { %v3642_v14 = vpop.eup %3641 }
 0x5e8   :  { %v876_v15 = vsel %vm254_vm2, %v3642_v14, 0.0 }
 0x5e9   :  { %v3644_v16 = vpop.eup %3643  ;;  %877 = vadd.xlane.f32.xlu1 %v876_v15 }
 0x5ea   :  { %v879_v17 = vsel %vm254_vm2, %v3644_v16, 0.0 }
 0x5eb   :  { %880 = vadd.xlane.f32.xlu2 %v879_v17 }
 0x65c   :  { %v878_v28 = vpop.xlane.xlu1 %877 }
 0x65d   :  { %3645 = vrcp.f32 %v878_v28  ;;  %v893_v35 = vand.u32 2147483648, %v878_v28  ;;  %v891_v37 = vand.u32 2147483647, %v878_v28  ;;  %vm887_vm6 = vweird.f32 %v878_v28 }
 0x65e   :  { %v881_v29 = vpop.xlane.xlu2 %880 }
 0x65f   :  { %3647 = vrcp.f32 %v881_v29  ;;  %v908_v39 = vand.u32 2147483648, %v881_v29  ;;  %v906_v42 = vand.u32 2147483647, %v881_v29  ;;  %v894_v43 = vor.u32 1.1754944e-38, %v893_v35 }
 0x660   :  { %vm892_vm9 = vcmp.eq.f32.partialorder %v891_v37, 8.507059e+37  ;;  %vm902_vm10 = vweird.f32 %v881_v29 }
 0x661   :  { %v909_v48 = vor.u32 1.1754944e-38, %v908_v39  ;;  %vm907_vm12 = vcmp.eq.f32.partialorder %v906_v42, 8.507059e+37 }
 0x663   :  { %v3646_v30 = vpop.eup %3645 }
 0x664   :  { %v883_v31 = vmul.f32 %v3646_v30, %v878_v28  ;;  %vm888_vm5 = vweird.f32 %v3646_v30 }
 0x665   :  { %v3648_v32 = vpop.eup %3647  ;;  %vm889_vm8 = vmor %vm887_vm6, %vm888_vm5 }
 0x666   :  { %v884_v33 = vsub.f32 1.0, %v883_v31  ;;  %v898_v34 = vmul.f32 %v3648_v32, %v881_v29  ;;  %vm903_vm7 = vweird.f32 %v3648_v32 }
 0x667   :  { %vm904_vm11 = vmor %vm902_vm10, %vm903_vm7 }
 0x668   :  { %v885_v36 = vmul.f32 %v3646_v30, %v884_v33  ;;  %v899_v38 = vsub.f32 1.0, %v898_v34 }
 0x66a   :  { %v886_v40 = vadd.f32 %v3646_v30, %v885_v36  ;;  %v900_v41 = vmul.f32 %v3648_v32, %v899_v38 }
 0x66c   :  { %v890_v45 = vsel %vm889_vm8, %v3646_v30, %v886_v40  ;;  %v901_v46 = vadd.f32 %v3648_v32, %v900_v41 }
 0x66d   :  { %v895_v47 = vsel %vm892_vm9, %v894_v43, %v890_v45 }
 0x66e   :  { %v905_v49 = vsel %vm904_vm11, %v3648_v32, %v901_v46  ;;  %v896_v50 = vmul.f32 %v3642_v14, %v895_v47 }
 0x66f   :  { %v910_v54 = vsel %vm907_vm12, %v909_v48, %v905_v49  ;;  %v1239_v49 = vld [vmem:[#allocation8 + $0x18] sm:$0xff] }
 0x670   :  { %3450 = vmatmul.msk.f32.vlgmr.msrb.gmra.mxu1 %vm254_vm2, %v896_v50  ;;  %v911_v55 = vmul.f32 %v3644_v16, %v910_v54  ;;  %v3596_v54 = vld [vmem:[%s4525_s8] ss:$0 sm:$0xff] }
 0x671   :  { %3462 = vmatpush.xpose.msk.msrb.mxu1 %vm254_vm2, %v1055_v51 }
 0x672   :  { %3451 = vmatmul.msk.f32.vlgmr.msra.gmra.mxu3 %vm254_vm2, %v911_v55 }
 0x678   :  { %3454 = vmatmul.msk.f32.vlgmr.msra.gmra.mxu1 %vm158_vm1, %v3976_v18 }
 0x67a   :  { %3458 = vmatmul.msk.f32.vlgmr.msrb.gmra.mxu3 %vm158_vm1, %v3976_v18 }
 0x680   :  { %3455 = vmatmul.msk.f32.gmra.mxu1 %vm158_vm1, %v3984_v21 }
 0x682   :  { %3459 = vmatmul.msk.f32.gmra.mxu3 %vm158_vm1, %v3984_v21 }
 0x6ed   :  { %v932_v56 = vpop.f32.mrf.mxu1 }
 0x6ee   :  { %3452 = vmatmul.msk.f32.vlgmr.msra.gmra.mxu0 %vm254_vm2, %v932_v56 }
 0x6ef   :  { %1261 = vmatpush.msra.mxu0 %v1239_v49 }
 0x6f5   :  { %v955_v58 = vpop.f32.mrf.mxu3  ;;  %v1018_v59 = vpop.f32.mrf.mxu1 }
 0x6f6   :  { %3453 = vmatmul.msk.f32.gmra.mxu0 %vm254_vm2, %v955_v58  ;;  %v1019_v62 = vadd.f32 %v3594_v60, %v1018_v59 }
 0x6fd   :  { %v1021_v63 = vpop.f32.mrf.mxu1  ;;  %v1084_v0 = vpop.f32.mrf.mxu3 }
 0x6fe   :  { %v1022_v1 = vadd.f32 %v3594_v60, %v1021_v63  ;;  %v1085_v2 = vadd.f32 %v3595_v61, %v1084_v0  ;;  %3461 = vmatmul.msk.f32.vlgmr.msrb.gmra.mxu0 %vm254_vm2, %v1019_v62 }
 0x700   :  { %3463 = vmatmul.msk.f32.vlgmr.msrb.gmra.mxu1 %vm254_vm2, %v1022_v1  ;;  %1210 = vmatpush.msra.mxu2 %v1085_v2  ;;  %v3884_v2 = vmov 32.0  }
 0x705   :  { %v1087_v3 = vpop.f32.mrf.mxu3 }
 0x706   :  { %v1088_v4 = vadd.f32 %v3595_v61, %v1087_v3 }
 0x708   :  { %1233 = vmatpush.msra.mxu3 %v1088_v4 }
 0x76b   :  { %v983_v6 = vpop.f32.mrf.mxu0 }
 0x76c   :  { %v4080_v7 = vadd.f32 %v983_v6, %v706_v5 }
 0x773   :  { %v986_v8 = vpop.f32.mrf.mxu0 }
 0x774   :  { %v4083_v9 = vadd.f32 %v986_v8, %v4052_v57 }
 0x77b   :  { %v1113_v10 = vpop.f32.mrf.mxu0 }
 0x77c   :  { %v1142_v11 = vmul.f32 0.35355338, %v1113_v10 }
 0x77d   :  { %v1139_v12 = vpop.f32.mrf.mxu1 }
 0x77e   :  { %v1143_v13 = vmul.f32 0.35355338, %v1139_v12  ;;  %v1144_v14 = vsel %vm254_vm2, %v1142_v11, -inf }
 0x77f   :  { %1145 = vmax.xlane.f32.xlu0 %v1144_v14 }
 0x780   :  { %v1147_v15 = vsel %vm254_vm2, %v1143_v13, -inf }
 0x781   :  { %1148 = vmax.xlane.f32.xlu1 %v1147_v15 }
 0x7f2   :  { %v1146_v16 = vpop.xlane.xlu0 %1145 }
 0x7f3   :  { %v1150_v17 = vsub.f32 %v1142_v11, %v1146_v16 }
 0x7f4   :  { %v1149_v52 = vpop.xlane.xlu1 %1148 }
 0x7f5   :  { %v1152_v53 = vmul.f32 1.442695, %v1150_v17  ;;  %v1151_v19 = vsub.f32 %v1143_v13, %v1149_v52  ;;  %v1347_v17 = vld [vmem:[%s4522_s5 + $0x18] sm:$0xff]  ;;  %v1346_v52 = vld [vmem:[%s4522_s5 + $0x10] sm:$0xff] }
 0x7f6   :  { %1370 = vmatpush.msra.mxu1 %v1347_v17 }
 0x7f7   :  { %3649 = vpow2.f32 %v1152_v53  ;;  %v1154_v20 = vmul.f32 1.442695, %v1151_v19  ;;  %v1345_v53 = vld [vmem:[%s4522_s5 + $0x8] sm:$0xff]  ;;  %v1344_v19 = vld [vmem:[%s4522_s5] sm:$0xff] }
 0x7f8   :  { %1371 = vmatpush.msra.mxu1 %v1346_v52  ;;  %v1470_v52 = vld [vmem:[%s4524_s7 + $0x8] sm:$0xff] }
 0x7f9   :  { %3651 = vpow2.f32 %v1154_v20 }
 0x7fa   :  { %1372 = vmatpush.msra.mxu1 %v1345_v53 }
 0x7fc   :  { %1373 = vmatpush.msra.mxu1 %v1344_v19 }
 0x7fd   :  { %v3650_v57 = vpop.eup %3649 }
 0x7fe   :  { %v1156_v22 = vsel %vm254_vm2, %v3650_v57, 0.0 }
 0x7ff   :  { %v3652_v23 = vpop.eup %3651  ;;  %1157 = vadd.xlane.f32.xlu2 %v1156_v22 }
 0x800   :  { %v1159_v24 = vsel %vm254_vm2, %v3652_v23, 0.0 }
 0x801   :  { %1160 = vadd.xlane.f32.xlu0 %v1159_v24 }
 0x872   :  { %v1158_v25 = vpop.xlane.xlu2 %1157 }
 0x873   :  { %3653 = vrcp.f32 %v1158_v25  ;;  %v1173_v32 = vand.u32 2147483648, %v1158_v25  ;;  %v1171_v34 = vand.u32 2147483647, %v1158_v25  ;;  %vm1167_vm14 = vweird.f32 %v1158_v25 }
 0x874   :  { %v1161_v26 = vpop.xlane.xlu0 %1160 }
 0x875   :  { %3655 = vrcp.f32 %v1161_v26  ;;  %v1188_v36 = vand.u32 2147483648, %v1161_v26  ;;  %v1186_v39 = vand.u32 2147483647, %v1161_v26  ;;  %v1174_v40 = vor.u32 1.1754944e-38, %v1173_v32 }
 0x876   :  { %vm1172_vm3 = vcmp.eq.f32.partialorder %v1171_v34, 8.507059e+37  ;;  %vm1182_vm4 = vweird.f32 %v1161_v26  ;;  %3657 = vrcp.f32 %v3884_v2  ;;  %v3597_v34 = vld [vmem:[%s4525_s8 + $0x1] ss:$0 sm:$0xff]  ;;  %v1474_v2 = vld [vmem:[%s4524_s7 + $0x28] sm:$0xff] }
 0x877   :  { %v1189_v44 = vor.u32 1.1754944e-38, %v1188_v36  ;;  %vm1187_vm6 = vcmp.eq.f32.partialorder %v1186_v39, 8.507059e+37 }
 0x879   :  { %v3654_v27 = vpop.eup %3653 }
 0x87a   :  { %v1163_v28 = vmul.f32 %v3654_v27, %v1158_v25  ;;  %vm1168_vm13 = vweird.f32 %v3654_v27 }
 0x87b   :  { %v3656_v29 = vpop.eup %3655  ;;  %vm1169_vm0 = vmor %vm1167_vm14, %vm1168_vm13 }
 0x87c   :  { %v1164_v30 = vsub.f32 1.0, %v1163_v28  ;;  %v1178_v31 = vmul.f32 %v3656_v29, %v1161_v26  ;;  %vm1183_vm15 = vweird.f32 %v3656_v29  ;;  %v3658_v3 = vpop.eup %3657 }
 0x87d   :  { %vm1184_vm5 = vmor %vm1182_vm4, %vm1183_vm15  ;;  %v1290_v4 = vmul.f32 32.0, %v3658_v3  ;;  %vm1294_vm7 = vweird.f32 %v3658_v3 }
 0x87e   :  { %v1165_v33 = vmul.f32 %v3654_v27, %v1164_v30  ;;  %v1179_v35 = vsub.f32 1.0, %v1178_v31 }
 0x87f   :  { %v1291_v5 = vsub.f32 1.0, %v1290_v4 }
 0x880   :  { %v1166_v37 = vadd.f32 %v3654_v27, %v1165_v33  ;;  %v1180_v38 = vmul.f32 %v3656_v29, %v1179_v35 }
 0x881   :  { %v1292_v6 = vmul.f32 %v3658_v3, %v1291_v5 }
 0x882   :  { %v1170_v41 = vsel %vm1169_vm0, %v3654_v27, %v1166_v37  ;;  %v1181_v42 = vadd.f32 %v3656_v29, %v1180_v38  ;;  %v3598_v38 = vld [vmem:[%s4525_s8 + $0x2] ss:$0 sm:$0xff] }
 0x883   :  { %v1175_v43 = vsel %vm1172_vm3, %v1174_v40, %v1170_v41 }
 0x884   :  { %v1185_v45 = vsel %vm1184_vm5, %v3656_v29, %v1181_v42  ;;  %v1176_v46 = vmul.f32 %v3650_v57, %v1175_v43 }
 0x885   :  { %v1190_v47 = vsel %vm1187_vm6, %v1189_v44, %v1185_v45  ;;  %vm1482_vm6 = vcmask 523264  }
 0x886   :  { %3464 = vmatmul.msk.f32.vlgmr.msra.gmra.mxu2 %vm254_vm2, %v1176_v46  ;;  %v1191_v48 = vmul.f32 %v3652_v23, %v1190_v47 }
 0x888   :  { %3465 = vmatmul.msk.f32.vlgmr.msra.gmra.mxu3 %vm254_vm2, %v1191_v48  ;;  %v3599_v48 = vld [vmem:[%s4523_s6] ss:$0 sm:$0xff] }
 0x909   :  { %v1212_v50 = vpop.f32.mrf.mxu2 }
 0x90a   :  { %3466 = vmatmul.msk.f32.vlgmr.msra.gmra.mxu0 %vm254_vm2, %v1212_v50 }
 0x90b   :  { %v1235_v51 = vpop.f32.mrf.mxu3 }
 0x912   :  { %3467 = vmatmul.msk.f32.gmra.mxu0 %vm254_vm2, %v1235_v51 }
 0x987   :  { %v1263_v55 = vpop.f32.mrf.mxu0 }
 0x988   :  { %v1269_v56 = vadd.f32 %v1263_v55, %v4080_v7  ;;  %v1293_v7 = vadd.f32 %v3658_v3, %v1292_v6  ;;  %v1473_v6 = vld [vmem:[%s4524_s7 + $0x20] sm:$0xff] }
 0x98a   :  { %v1275_v58 = vadd.f32 %v3596_v54, %v1269_v56 }
 0x98c   :  { %v1277_v59 = vadd.f32 %v1275_v58, %v3976_v18  ;;  %v4102_v18 = vsel %vm1294_vm7, %v3658_v3, %v1293_v7  ;;  %v1476_v58 = vld [vmem:[%s4524_s7 + $0x38] sm:$0xff] }
 0x98d   :  { %1497 = vmatpush.msrb.mxu2 %v1476_v58 }
 0x98e   :  { %v1283_v60 = vsel %vm158_vm1, %v1277_v59, 0.0 }
 0x98f   :  { %1284 = vadd.xlane.f32.xlu1 %v1283_v60  ;;  %v1266_v61 = vpop.f32.mrf.mxu0 }
 0x990   :  { %v1270_v62 = vadd.f32 %v1266_v61, %v4083_v9 }
 0x992   :  { %v1276_v63 = vadd.f32 %v3596_v54, %v1270_v62  ;;  %v1475_v62 = vld [vmem:[%s4524_s7 + $0x30] sm:$0xff] }
 0x993   :  { %1498 = vmatpush.msrb.mxu2 %v1475_v62 }
 0x994   :  { %v1278_v0 = vadd.f32 %v1276_v63, %v3984_v21 }
 0x995   :  { %1499 = vmatpush.msrb.mxu2 %v1474_v2 }
 0x996   :  { %v1286_v1 = vsel %vm158_vm1, %v1278_v0, 0.0 }
 0x997   :  { %1287 = vadd.xlane.f32.xlu2 %v1286_v1  ;;  %1500 = vmatpush.msrb.mxu2 %v1473_v6 }
 0xa02   :  { %v1285_v8 = vpop.xlane.xlu1 %1284 }
 0xa03   :  { %v1296_v10 = vmul.f32 %v4102_v18, %v1285_v8 }
 0xa05   :  { %v1298_v9 = vsub.f32 %v1277_v59, %v1296_v10 }
 0xa07   :  { %v1300_v11 = vmul.f32 %v1298_v9, %v1298_v9 }
 0xa09   :  { %v1302_v21 = vsel %vm158_vm1, %v1300_v11, 0.0 }
 0xa0a   :  { %1303 = vadd.xlane.f32.xlu0 %v1302_v21  ;;  %v1288_v12 = vpop.xlane.xlu2 %1287 }
 0xa0b   :  { %v1297_v13 = vmul.f32 %v4102_v18, %v1288_v12 }
 0xa0d   :  { %v1299_v14 = vsub.f32 %v1278_v0, %v1297_v13  ;;  %v1471_v13 = vld [vmem:[%s4524_s7 + $0x10] sm:$0xff] }
 0xa0f   :  { %v1301_v15 = vmul.f32 %v1299_v14, %v1299_v14 }
 0xa11   :  { %v1305_v16 = vsel %vm158_vm1, %v1301_v15, 0.0 }
 0xa12   :  { %1306 = vadd.xlane.f32.xlu1 %v1305_v16 }
 0xa7d   :  { %v1304_v20 = vpop.xlane.xlu0 %1303 }
 0xa7e   :  { %v1308_v57 = vmul.f32 %v1304_v20, %v4102_v18 }
 0xa80   :  { %v1310_v22 = vadd.f32 1e-05, %v1308_v57  ;;  %v1469_v57 = vld [vmem:[%s4524_s7] sm:$0xff] }
 0xa82   :  { %3659 = vrsqrt.f32 %v1310_v22  ;;  %vm1318_vm9 = vweird.f32 %v1310_v22 }
 0xa85   :  { %v1307_v23 = vpop.xlane.xlu1 %1306 }
 0xa86   :  { %v1309_v24 = vmul.f32 %v1307_v23, %v4102_v18 }
 0xa88   :  { %v3660_v25 = vpop.eup %3659  ;;  %v1311_v26 = vadd.f32 1e-05, %v1309_v24 }
 0xa89   :  { %v1313_v27 = vmul.f32 %v3660_v25, %v1310_v22  ;;  %vm1319_vm8 = vweird.f32 %v3660_v25 }
 0xa8a   :  { %3661 = vrsqrt.f32 %v1311_v26  ;;  %vm1320_vm10 = vmor %vm1318_vm9, %vm1319_vm8  ;;  %vm1328_vm12 = vweird.f32 %v1311_v26 }
 0xa8b   :  { %v1314_v28 = vmul.f32 %v3660_v25, %v1313_v27 }
 0xa8d   :  { %v1315_v29 = vmul.f32 0.5, %v1314_v28 }
 0xa8f   :  { %v1316_v30 = vsub.f32 1.5, %v1315_v29 }
 0xa90   :  { %v3662_v31 = vpop.eup %3661 }
 0xa91   :  { %v1317_v32 = vmul.f32 %v3660_v25, %v1316_v30  ;;  %v1323_v33 = vmul.f32 %v3662_v31, %v1311_v26  ;;  %vm1329_vm11 = vweird.f32 %v3662_v31 }
 0xa92   :  { %vm1330_vm13 = vmor %vm1328_vm12, %vm1329_vm11 }
 0xa93   :  { %v1321_v35 = vsel %vm1320_vm10, %v3660_v25, %v1317_v32  ;;  %v1324_v36 = vmul.f32 %v3662_v31, %v1323_v33 }
 0xa94   :  { %v1332_v37 = vmul.f32 %v1321_v35, %v1298_v9  ;;  %v1472_v9 = vld [vmem:[%s4524_s7 + $0x18] sm:$0xff] }
 0xa95   :  { %v1325_v39 = vmul.f32 0.5, %v1324_v36  ;;  %1501 = vmatpush.msrb.mxu2 %v1472_v9 }
 0xa96   :  { %v1337_v40 = vmul.f32 %v3597_v34, %v1332_v37 }
 0xa97   :  { %v1326_v41 = vsub.f32 1.5, %v1325_v39  ;;  %1502 = vmatpush.msrb.mxu2 %v1471_v13 }
 0xa98   :  { %v4128_v42 = vadd.f32 %v3598_v38, %v1337_v40 }
 0xa99   :  { %v1327_v43 = vmul.f32 %v3662_v31, %v1326_v41  ;;  %1503 = vmatpush.msrb.mxu2 %v1470_v52  ;;  %v3600_v52 = vld [vmem:[%s4525_s8 + $0x3] ss:$0 sm:$0xff] }
 0xa9a   :  { %3470 = vmatmul.msk.f32.vlgmr.msra.gmra.mxu1 %vm158_vm1, %v4128_v42 }
 0xa9b   :  { %v1331_v44 = vsel %vm1330_vm13, %v3662_v31, %v1327_v43  ;;  %1504 = vmatpush.msrb.mxu2 %v1469_v57 }
 0xa9c   :  { %v1333_v45 = vmul.f32 %v1331_v44, %v1299_v14 }
 0xa9e   :  { %v1338_v46 = vmul.f32 %v3597_v34, %v1333_v45 }
 0xaa0   :  { %v4132_v47 = vadd.f32 %v3598_v38, %v1338_v46 }
 0xaa2   :  { %3471 = vmatmul.msk.f32.gmra.mxu1 %vm158_vm1, %v4132_v47 }
 0xb17   :  { %v1375_v49 = vpop.f32.mrf.mxu1 }
 0xb18   :  { %v4139_v50 = vadd.f32 %v3599_v48, %v1375_v49 }
 0xb1a   :  { %v4142_v51 = vmul.f32 0.70710677, %v4139_v50 }
 0xb1c   :  { %v1385_v54 = vmul.f32 %v4142_v51, %v4142_v51 }
 0xb1e   :  { %v1386_v55 = vmin.f32 %v1385_v54, 16.0 }
 0xb1f   :  { %v1378_v56 = vpop.f32.mrf.mxu1 }
 0xb20   :  { %v1387_v59 = vmul.f32 2.1237322e-06, %v1386_v55  ;;  %v1398_v60 = vmul.f32 3.8918573e-05, %v1386_v55  ;;  %v4149_v61 = vadd.f32 %v3599_v48, %v1378_v56 }
 0xb22   :  { %v1388_v63 = vadd.f32 0.00028619796, %v1387_v59  ;;  %v1399_v0 = vadd.f32 0.001143296, %v1398_v60  ;;  %v4155_v1 = vmul.f32 0.70710677, %v4149_v61 }
 0xb24   :  { %v1389_v3 = vmul.f32 %v1388_v63, %v1386_v55  ;;  %v1400_v4 = vmul.f32 %v1399_v0, %v1386_v55  ;;  %v1425_v5 = vmul.f32 %v4155_v1, %v4155_v1 }
 0xb26   :  { %v1401_v7 = vadd.f32 0.014752088, %v1400_v4  ;;  %v1390_v8 = vadd.f32 0.0036580483, %v1389_v3  ;;  %v1426_v10 = vmin.f32 %v1425_v5, 16.0 }
 0xb28   :  { %v1402_v11 = vmul.f32 %v1401_v7, %v1386_v55  ;;  %v1427_v21 = vmul.f32 2.1237322e-06, %v1426_v10  ;;  %v1438_v12 = vmul.f32 3.8918573e-05, %v1426_v10  ;;  %v1391_v15 = vmul.f32 %v1390_v8, %v1386_v55 }
 0xb29   :  { %v1381_v8 = vmul.f32 0.5, %v4139_v50 }
 0xb2a   :  { %v1403_v14 = vadd.f32 0.112945676, %v1402_v11  ;;  %v1428_v16 = vadd.f32 0.00028619796, %v1427_v21  ;;  %v1439_v17 = vadd.f32 0.001143296, %v1438_v12 }
 0xb2b   :  { %v1392_v23 = vadd.f32 0.05243302, %v1391_v15 }
 0xb2c   :  { %v1404_v53 = vmul.f32 %v1403_v14, %v1386_v55  ;;  %v1429_v19 = vmul.f32 %v1428_v16, %v1426_v10  ;;  %v1440_v20 = vmul.f32 %v1439_v17, %v1426_v10  ;;  %v1382_v16 = vmul.f32 0.5, %v4149_v61 }
 0xb2d   :  { %v1393_v29 = vmul.f32 %v1392_v23, %v1386_v55 }
 0xb2e   :  { %v1405_v22 = vadd.f32 0.4994258, %v1404_v53  ;;  %v1441_v24 = vadd.f32 0.014752088, %v1440_v20  ;;  %v1430_v26 = vadd.f32 0.0036580483, %v1429_v19 }
 0xb2f   :  { %v1394_v33 = vadd.f32 0.18741608, %v1393_v29 }
 0xb30   :  { %v1406_v25 = vmul.f32 %v1405_v22, %v1386_v55  ;;  %v1442_v27 = vmul.f32 %v1441_v24, %v1426_v10  ;;  %v1431_v31 = vmul.f32 %v1430_v26, %v1426_v10 }
 0xb31   :  { %v1395_v38 = vmul.f32 %v1394_v33, %v1386_v55  ;;  %v1615_v33 = vld [vmem:[#allocation5 + $0x218] sm:$0xff] }
 0xb32   :  { %v1407_v28 = vadd.f32 1.0, %v1406_v25  ;;  %v1443_v30 = vadd.f32 0.112945676, %v1442_v27  ;;  %v1432_v35 = vadd.f32 0.05243302, %v1431_v31  ;;  %1633 = vmatpush.msrb.mxu0 %v1615_v33 }
 0xb33   :  { %v1396_v45 = vadd.f32 1.1283791, %v1395_v38  ;;  %v1574_v38 = vld [vmem:[#allocation5 + $0x188] sm:$0xff] }
 0xb34   :  { %3663 = vrcp.f32 %v1407_v28  ;;  %v1444_v32 = vmul.f32 %v1443_v30, %v1426_v10  ;;  %v1433_v41 = vmul.f32 %v1432_v35, %v1426_v10  ;;  %v1419_v44 = vand.u32 2147483648, %v1407_v28  ;;  %v1575_v35 = vld [vmem:[#allocation5 + $0x190] sm:$0xff] }
 0xb35   :  { %v1417_v48 = vand.u32 2147483647, %v1407_v28  ;;  %vm1413_vm15 = vweird.f32 %v1407_v28  ;;  %v1397_v59 = vmul.f32 %v1396_v45, %v4142_v51 }
 0xb36   :  { %v1445_v34 = vadd.f32 0.4994258, %v1444_v32  ;;  %v1434_v49 = vadd.f32 0.18741608, %v1433_v41  ;;  %v1420_v56 = vor.u32 1.1754944e-38, %v1419_v44  ;;  %v1576_v32 = vld [vmem:[#allocation5 + $0x198] sm:$0xff] }
 0xb37   :  { %vm1418_vm3 = vcmp.eq.f32.partialorder %v1417_v48, 8.507059e+37  ;;  %1600 = vmatpush.msrb.mxu3 %v1576_v32  ;;  %v1573_v41 = vld [vmem:[#allocation5 + $0x180] sm:$0xff] }
 0xb38   :  { %v1446_v36 = vmul.f32 %v1445_v34, %v1426_v10  ;;  %v1435_v62 = vmul.f32 %v1434_v49, %v1426_v10  ;;  %v1648_v34 = vld [vmem:[#allocation5 + $0x298] sm:$0xff]  ;;  %v1645_v44 = vld [vmem:[#allocation5 + $0x280] sm:$0xff] }
 0xb39   :  { %1666 = vmatpush.msrb.mxu1 %v1648_v34  ;;  %1601 = vmatpush.msrb.mxu3 %v1575_v35  ;;  %v1831_v49 = vld [vmem:[#allocation5 + $0x1b8] sm:$0xff] }
 0xb3a   :  { %v3664_v37 = vpop.eup %3663  ;;  %v1447_v40 = vadd.f32 1.0, %v1446_v36  ;;  %v1436_v5 = vadd.f32 1.1283791, %v1435_v62  ;;  %v1614_v36 = vld [vmem:[#allocation5 + $0x210] sm:$0xff] }
 0xb3b   :  { %v1409_v39 = vmul.f32 %v3664_v37, %v1407_v28  ;;  %vm1414_vm14 = vweird.f32 %v3664_v37  ;;  %1634 = vmatpush.msrb.mxu0 %v1614_v36  ;;  %1602 = vmatpush.msrb.mxu3 %v1574_v38  ;;  %v3607_v38 = vld [vmem:[#allocation7 + $0x11] ss:$0 sm:$0xff] }
 0xb3c   :  { %3665 = vrcp.f32 %v1447_v40  ;;  %vm1415_vm0 = vmor %vm1413_vm15, %vm1414_vm14  ;;  %v1459_v4 = vand.u32 2147483648, %v1447_v40  ;;  %v1457_v7 = vand.u32 2147483647, %v1447_v40  ;;  %vm1453_vm5 = vweird.f32 %v1447_v40 }
 0xb3d   :  { %v1410_v43 = vsub.f32 1.0, %v1409_v39  ;;  %v1437_v10 = vmul.f32 %v1436_v5, %v4155_v1  ;;  %v1613_v39 = vld [vmem:[#allocation5 + $0x208] sm:$0xff]  ;;  %1603 = vmatpush.msrb.mxu3 %v1573_v41 }
 0xb3e   :  { %v1460_v21 = vor.u32 1.1754944e-38, %v1459_v4  ;;  %vm1458_vm8 = vcmp.eq.f32.partialorder %v1457_v7, 8.507059e+37  ;;  %1635 = vmatpush.msrb.mxu0 %v1613_v39 }
 0xb3f   :  { %v1411_v46 = vmul.f32 %v3664_v37, %v1410_v43  ;;  %v1612_v43 = vld [vmem:[#allocation5 + $0x200] sm:$0xff] }
 0xb40   :  { %1636 = vmatpush.msrb.mxu0 %v1612_v43 }
 0xb41   :  { %v1412_v54 = vadd.f32 %v3664_v37, %v1411_v46 }
 0xb42   :  { %v3666_v58 = vpop.eup %3665 }
 0xb43   :  { %v1416_v60 = vsel %vm1415_vm0, %v3664_v37, %v1412_v54  ;;  %v1449_v63 = vmul.f32 %v3666_v58, %v1447_v40  ;;  %vm1454_vm4 = vweird.f32 %v3666_v58  ;;  %v1647_v37 = vld [vmem:[#allocation5 + $0x290] sm:$0xff]  ;;  %v1646_v40 = vld [vmem:[#allocation5 + $0x288] sm:$0xff] }
 0xb44   :  { %v1421_v55 = vsel %vm1418_vm3, %v1420_v56, %v1416_v60  ;;  %vm1455_vm7 = vmor %vm1453_vm5, %vm1454_vm4  ;;  %1667 = vmatpush.msrb.mxu1 %v1647_v37  ;;  %v1830_v54 = vld [vmem:[#allocation5 + $0x1b0] sm:$0xff] }
 0xb45   :  { %v1422_v0 = vmul.f32 %v1421_v55, %v1397_v59  ;;  %v1450_v2 = vsub.f32 1.0, %v1449_v63  ;;  %v1828_v55 = vld [vmem:[#allocation5 + $0x1a0] sm:$0xff] }
 0xb46   :  { %1668 = vmatpush.msrb.mxu1 %v1646_v40 }
 0xb47   :  { %v3472_v3 = vclamps-f32 %v1422_v0, 1.0  ;;  %v1451_v6 = vmul.f32 %v3666_v58, %v1450_v2 }
 0xb48   :  { %1669 = vmatpush.msrb.mxu1 %v1645_v44 }
 0xb49   :  { %v1465_v9 = vadd.f32 1.0, %v3472_v3  ;;  %v1452_v11 = vadd.f32 %v3666_v58, %v1451_v6  ;;  %v3601_v6 = vld [vmem:[%s4525_s8 + $0x4] ss:$0 sm:$0xff] }
 0xb4a   :  { %1849 = vmatpush.msra.mxu1 %v1831_v49 }
 0xb4b   :  { %v1467_v51 = vmul.f32 %v1465_v9, %v1381_v8  ;;  %v1456_v12 = vsel %vm1455_vm7, %v3666_v58, %v1452_v11  ;;  %v1829_v58 = vld [vmem:[#allocation5 + $0x1a8] sm:$0xff]  ;;  %v3602_v9 = vld [vmem:[%s4525_s8 + $0x5] ss:$0 sm:$0xff] }
 0xb4c   :  { %v1461_v13 = vsel %vm1458_vm8, %v1460_v21, %v1456_v12  ;;  %1850 = vmatpush.msra.mxu1 %v1830_v54 }
 0xb4d   :  { %3475 = vmatmul.msk.f32.vlgmr.msrb.gmra.mxu2 %vm1482_vm6, %v1467_v51  ;;  %v1462_v14 = vmul.f32 %v1461_v13, %v1437_v10 }
 0xb4e   :  { %1851 = vmatpush.msra.mxu1 %v1829_v58 }
 0xb4f   :  { %v3473_v15 = vclamps-f32 %v1462_v14, 1.0 }
 0xb50   :  { %1852 = vmatpush.msra.mxu1 %v1828_v55  ;;  %v1895_v55 = vld [vmem:[#allocation5 + $0x2a8] sm:$0xff] }
 0xb51   :  { %v1466_v17 = vadd.f32 1.0, %v3473_v15 }
 0xb53   :  { %v1468_v50 = vmul.f32 %v1466_v17, %v1382_v16 }
 0xb55   :  { %3476 = vmatmul.msk.f32.gmra.mxu2 %vm1482_vm6, %v1468_v50 }
 0xbd0   :  { %v1506_v53 = vpop.f32.mrf.mxu2 }
 0xbd1   :  { %v1507_v19 = vadd.f32 %v3600_v52, %v1506_v53  ;;  %v3604_v53 = vld [vmem:[#allocation7 + $0x14] ss:$0 sm:$0xff] }
 0xbd3   :  { %v1512_v1 = vadd.f32 %v1507_v19, %v4128_v42 }
 0xbd5   :  { %v1518_v20 = vsel %vm158_vm1, %v1512_v1, 0.0 }
 0xbd6   :  { %1519 = vadd.xlane.f32.xlu2 %v1518_v20 }
 0xbd8   :  { %v1509_v57 = vpop.f32.mrf.mxu2 }
 0xbd9   :  { %v1510_v22 = vadd.f32 %v3600_v52, %v1509_v57  ;;  %v3603_v52 = vld [vmem:[#allocation7 + $0x10] ss:$0 sm:$0xff] }
 0xbdb   :  { %v1513_v23 = vadd.f32 %v1510_v22, %v4132_v47  ;;  %v3605_v22 = vld [vmem:[#allocation7 + $0xc] ss:$0 sm:$0xff] }
 0xbdd   :  { %v1521_v61 = vsel %vm158_vm1, %v1513_v23, 0.0 }
 0xbde   :  { %1522 = vadd.xlane.f32.xlu0 %v1521_v61 }
 0xc49   :  { %v1520_v24 = vpop.xlane.xlu2 %1519 }
 0xc4a   :  { %v1524_v25 = vmul.f32 %v1520_v24, %v4102_v18 }
 0xc4c   :  { %v4191_v26 = vsub.f32 %v1512_v1, %v1524_v25 }
 0xc4e   :  { %v1528_v27 = vmul.f32 %v4191_v26, %v4191_v26 }
 0xc50   :  { %v1530_v42 = vsel %vm158_vm1, %v1528_v27, 0.0  ;;  %v1864_v27 = vld [vmem:[#allocation5 + $0x238] sm:$0xff] }
 0xc51   :  { %1531 = vadd.xlane.f32.xlu1 %v1530_v42  ;;  %v1523_v28 = vpop.xlane.xlu0 %1522 }
 0xc52   :  { %v1525_v29 = vmul.f32 %v1523_v28, %v4102_v18  ;;  %v1863_v28 = vld [vmem:[#allocation5 + $0x230] sm:$0xff] }
 0xc54   :  { %v4197_v30 = vsub.f32 %v1513_v23, %v1525_v29  ;;  %v1862_v29 = vld [vmem:[#allocation5 + $0x228] sm:$0xff] }
 0xc56   :  { %v1529_v47 = vmul.f32 %v4197_v30, %v4197_v30 }
 0xc58   :  { %v1533_v31 = vsel %vm158_vm1, %v1529_v47, 0.0 }
 0xc59   :  { %1534 = vadd.xlane.f32.xlu2 %v1533_v31  ;;  %v1861_v31 = vld [vmem:[#allocation5 + $0x220] sm:$0xff] }
 0xcc4   :  { %v1532_v45 = vpop.xlane.xlu1 %1531 }
 0xcc5   :  { %v1536_v46 = vmul.f32 %v1532_v45, %v4102_v18 }
 0xcc7   :  { %v1538_v48 = vadd.f32 1e-05, %v1536_v46 }
 0xcc9   :  { %3667 = vrsqrt.f32 %v1538_v48  ;;  %vm1546_vm10 = vweird.f32 %v1538_v48 }
 0xccc   :  { %v1535_v56 = vpop.xlane.xlu2 %1534 }
 0xccd   :  { %v1537_v59 = vmul.f32 %v1535_v56, %v4102_v18 }
 0xccf   :  { %v3668_v60 = vpop.eup %3667  ;;  %v1539_v63 = vadd.f32 1e-05, %v1537_v59  ;;  %v1897_v59 = vld [vmem:[#allocation5 + $0x2b8] sm:$0xff] }
 0xcd0   :  { %v1541_v62 = vmul.f32 %v3668_v60, %v1538_v48  ;;  %vm1547_vm9 = vweird.f32 %v3668_v60 }
 0xcd1   :  { %3669 = vrsqrt.f32 %v1539_v63  ;;  %vm1548_vm11 = vmor %vm1546_vm10, %vm1547_vm9  ;;  %vm1556_vm13 = vweird.f32 %v1539_v63 }
 0xcd2   :  { %v1542_v0 = vmul.f32 %v3668_v60, %v1541_v62  ;;  %v1894_v62 = vld [vmem:[#allocation5 + $0x2a0] sm:$0xff] }
 0xcd4   :  { %v1543_v2 = vmul.f32 0.5, %v1542_v0 }
 0xcd6   :  { %v1544_v3 = vsub.f32 1.5, %v1543_v2 }
 0xcd7   :  { %v3670_v4 = vpop.eup %3669 }
 0xcd8   :  { %v1545_v5 = vmul.f32 %v3668_v60, %v1544_v3  ;;  %v1551_v7 = vmul.f32 %v3670_v4, %v1539_v63  ;;  %vm1557_vm12 = vweird.f32 %v3670_v4 }
 0xcd9   :  { %vm1558_vm14 = vmor %vm1556_vm13, %vm1557_vm12 }
 0xcda   :  { %v1549_v8 = vsel %vm1548_vm11, %v3668_v60, %v1545_v5  ;;  %v1552_v51 = vmul.f32 %v3670_v4, %v1551_v7  ;;  %v1896_v60 = vld [vmem:[#allocation5 + $0x2b0] sm:$0xff] }
 0xcdb   :  { %v1560_v11 = vmul.f32 %v1549_v8, %v4191_v26 }
 0xcdc   :  { %v1553_v10 = vmul.f32 0.5, %v1552_v51 }
 0xcdd   :  { %v1565_v21 = vmul.f32 %v3601_v6, %v1560_v11 }
 0xcde   :  { %v1554_v13 = vsub.f32 1.5, %v1553_v10 }
 0xcdf   :  { %v4211_v12 = vadd.f32 %v3602_v9, %v1565_v21 }
 0xce0   :  { %v1555_v14 = vmul.f32 %v3670_v4, %v1554_v13 }
 0xce1   :  { %3479 = vmatmul.msk.f32.vlgmr.msrb.gmra.mxu3 %vm158_vm1, %v4211_v12  ;;  %3481 = vmatmul.msk.f32.vlgmr.msrb.gmra.mxu0 %vm158_vm1, %v4211_v12 }
 0xce2   :  { %3483 = vmatmul.msk.f32.vlgmr.msrb.gmra.mxu1 %vm158_vm1, %v4211_v12  ;;  %v1559_v15 = vsel %vm1558_vm14, %v3670_v4, %v1555_v14 }
 0xce3   :  { %v1561_v16 = vmul.f32 %v1559_v15, %v4197_v30 }
 0xce5   :  { %v1566_v17 = vmul.f32 %v3601_v6, %v1561_v16 }
 0xce7   :  { %v4220_v50 = vadd.f32 %v3602_v9, %v1566_v17 }
 0xce9   :  { %3480 = vmatmul.msk.f32.gmra.mxu3 %vm158_vm1, %v4220_v50  ;;  %3482 = vmatmul.msk.f32.gmra.mxu0 %vm158_vm1, %v4220_v50 }
 0xcea   :  { %3484 = vmatmul.msk.f32.gmra.mxu1 %vm158_vm1, %v4220_v50 }
 0xcf2   :  { %3491 = vmatmul.msk.f32.vlgmr.msra.gmra.mxu1 %vm158_vm1, %v4211_v12 }
 0xcfa   :  { %3492 = vmatmul.msk.f32.gmra.mxu1 %vm158_vm1, %v4220_v50 }
 0xd5e   :  { %v1638_v19 = vpop.f32.mrf.mxu0 }
 0xd5f   :  { %v1639_v1 = vadd.f32 %v3603_v52, %v1638_v19  ;;  %v1671_v20 = vpop.f32.mrf.mxu1 }
 0xd60   :  { %v1672_v57 = vadd.f32 %v3604_v53, %v1671_v20 }
 0xd61   :  { %3485 = vmatpush.xpose.msk.msra.mxu3 %vm254_vm2, %v1639_v1 }
 0xd64   :  { %v1605_v23 = vpop.f32.mrf.mxu3 }
 0xd65   :  { %1797 = vmatpush.msrb.mxu3 %v1672_v57  ;;  %v1606_v61 = vadd.f32 %v3605_v22, %v1605_v23 }
 0xd66   :  { %v1641_v24 = vpop.f32.mrf.mxu0 }
 0xd67   :  { %3486 = vmatmul.msk.f32.vlgmr.msra.gmra.mxu3 %vm254_vm2, %v1606_v61  ;;  %v1642_v25 = vadd.f32 %v3603_v52, %v1641_v24  ;;  %v1674_v26 = vpop.f32.mrf.mxu1  ;;  %v3606_v61 = vld [vmem:[#allocation7 + $0xd] ss:$0 sm:$0xff] }
 0xd68   :  { %v1675_v42 = vadd.f32 %v3604_v53, %v1674_v26  ;;  %1915 = vmatpush.msra.mxu3 %v1897_v59  ;;  %v2136_v59 = vld [vmem:[#allocation5 + $0x1c8] sm:$0xff] }
 0xd69   :  { %3487 = vmatpush.xpose.msk.msra.mxu2 %vm254_vm2, %v1642_v25 }
 0xd6a   :  { %1820 = vmatpush.msra.mxu0 %v1675_v42  ;;  %1916 = vmatpush.msra.mxu3 %v1896_v60  ;;  %v2135_v60 = vld [vmem:[#allocation5 + $0x1c0] sm:$0xff] }
 0xd6c   :  { %v1608_v30 = vpop.f32.mrf.mxu3  ;;  %1917 = vmatpush.msra.mxu3 %v1895_v55  ;;  %v2171_v55 = vld [vmem:[#allocation5 + $0x258] sm:$0xff] }
 0xd6d   :  { %1882 = vmatpush.msrb.mxu2 %v1864_v27  ;;  %v1609_v47 = vadd.f32 %v3605_v22, %v1608_v30  ;;  %v1826_v27 = vld [vmem:[#allocation8 + $0x20] sm:$0xff] }
 0xd6e   :  { %1918 = vmatpush.msra.mxu3 %v1894_v62  ;;  %v2170_v62 = vld [vmem:[#allocation5 + $0x250] sm:$0xff] }
 0xd6f   :  { %1883 = vmatpush.msrb.mxu2 %v1863_v28  ;;  %v1854_v23 = vpop.f32.mrf.mxu1 }
 0xd70   :  { %3488 = vmatmul.msk.f32.vlgmr.msra.gmra.mxu2 %vm254_vm2, %v1609_v47  ;;  %v1855_v24 = vadd.f32 %v3606_v61, %v1854_v23  ;;  %v2075_v23 = vld [vmem:[#allocation8 + $0x28] sm:$0xff] }
 0xd71   :  { %1884 = vmatpush.msrb.mxu2 %v1862_v29  ;;  %v3608_v29 = vld [vmem:[#allocation7 + $0x15] ss:$0 sm:$0xff] }
 0xd73   :  { %1885 = vmatpush.msrb.mxu2 %v1861_v31 }
 0xd77   :  { %v1857_v25 = vpop.f32.mrf.mxu1 }
 0xd78   :  { %3493 = vmatmul.msk.f32.vlgmr.msrb.gmra.mxu2 %vm158_vm1, %v4211_v12  ;;  %v1858_v26 = vadd.f32 %v3606_v61, %v1857_v25  ;;  %v2204_v61 = vld [vmem:[#allocation5 + $0x2d8] sm:$0xff]  ;;  %v2202_v25 = vld [vmem:[#allocation5 + $0x2c8] sm:$0xff] }
 0xd80   :  { %3494 = vmatmul.msk.f32.gmra.mxu2 %vm158_vm1, %v4220_v50 }
 0xdea   :  { %v1700_v32 = vpop.f32.mrf.mxu3 }
 0xdeb   :  { %v1729_v33 = vmul.f32 0.35355338, %v1700_v32 }
 0xded   :  { %v1731_v34 = vsel %vm254_vm2, %v1729_v33, -inf }
 0xdee   :  { %1732 = vmax.xlane.f32.xlu2 %v1731_v34 }
 0xdf3   :  { %v1726_v35 = vpop.f32.mrf.mxu2 }
 0xdf4   :  { %v1730_v36 = vmul.f32 0.35355338, %v1726_v35 }
 0xdf6   :  { %v1734_v37 = vsel %vm254_vm2, %v1730_v36, -inf }
 0xdf7   :  { %1735 = vmax.xlane.f32.xlu0 %v1734_v37 }
 0xdfb   :  { %v1887_v39 = vpop.f32.mrf.mxu2 }
 0xdfc   :  { %v1888_v40 = vadd.f32 %v3607_v38, %v1887_v39 }
 0xdfe   :  { %3497 = vmatpush.xpose.msk.msrb.mxu0 %vm254_vm2, %v1888_v40 }
 0xe03   :  { %v1890_v19 = vpop.f32.mrf.mxu2 }
 0xe04   :  { %v1891_v22 = vadd.f32 %v3607_v38, %v1890_v19 }
 0xe61   :  { %v1733_v41 = vpop.xlane.xlu2 %1732 }
 0xe62   :  { %v1737_v43 = vsub.f32 %v1729_v33, %v1733_v41 }
 0xe64   :  { %v1739_v44 = vmul.f32 1.442695, %v1737_v43 }
 0xe66   :  { %3671 = vpow2.f32 %v1739_v44 }
 0xe6a   :  { %v1736_v45 = vpop.xlane.xlu0 %1735 }
 0xe6b   :  { %v1738_v46 = vsub.f32 %v1730_v36, %v1736_v45 }
 0xe6c   :  { %v3672_v48 = vpop.eup %3671 }
 0xe6d   :  { %v1741_v49 = vmul.f32 1.442695, %v1738_v46  ;;  %v1743_v54 = vsel %vm254_vm2, %v3672_v48, 0.0 }
 0xe6e   :  { %1744 = vadd.xlane.f32.xlu0 %v1743_v54 }
 0xe6f   :  { %3673 = vpow2.f32 %v1741_v49 }
 0xe75   :  { %v3674_v56 = vpop.eup %3673 }
 0xe76   :  { %v1746_v58 = vsel %vm254_vm2, %v3674_v56, 0.0 }
 0xe77   :  { %1747 = vadd.xlane.f32.xlu1 %v1746_v58  ;;  %v2137_v58 = vld [vmem:[#allocation5 + $0x1d0] sm:$0xff] }
 0xee1   :  { %v1745_v63 = vpop.xlane.xlu0 %1744 }
 0xee2   :  { %3675 = vrcp.f32 %v1745_v63  ;;  %v1760_v5 = vand.u32 2147483648, %v1745_v63  ;;  %v1758_v7 = vand.u32 2147483647, %v1745_v63  ;;  %vm1754_vm0 = vweird.f32 %v1745_v63 }
 0xee4   :  { %v1761_v9 = vor.u32 1.1754944e-38, %v1760_v5  ;;  %vm1759_vm4 = vcmp.eq.f32.partialorder %v1758_v7, 8.507059e+37 }
 0xee8   :  { %v3676_v0 = vpop.eup %3675 }
 0xee9   :  { %v1750_v2 = vmul.f32 %v3676_v0, %v1745_v63  ;;  %vm1755_vm15 = vweird.f32 %v3676_v0  ;;  %v2169_v63 = vld [vmem:[#allocation5 + $0x248] sm:$0xff] }
 0xeea   :  { %v1748_v3 = vpop.xlane.xlu1 %1747  ;;  %vm1756_vm3 = vmor %vm1754_vm0, %vm1755_vm15 }
 0xeeb   :  { %v1751_v4 = vsub.f32 1.0, %v1750_v2  ;;  %3677 = vrcp.f32 %v1748_v3  ;;  %v1775_v15 = vand.u32 2147483648, %v1748_v3  ;;  %v1773_v17 = vand.u32 2147483647, %v1748_v3  ;;  %v2168_v2 = vld [vmem:[#allocation5 + $0x240] sm:$0xff] }
 0xeec   :  { %vm1769_vm7 = vweird.f32 %v1748_v3 }
 0xeed   :  { %v1752_v6 = vmul.f32 %v3676_v0, %v1751_v4  ;;  %v1776_v53 = vor.u32 1.1754944e-38, %v1775_v15  ;;  %vm1774_vm9 = vcmp.eq.f32.partialorder %v1773_v17, 8.507059e+37 }
 0xeef   :  { %v1753_v8 = vadd.f32 %v3676_v0, %v1752_v6 }
 0xef1   :  { %v3678_v11 = vpop.eup %3677  ;;  %v1757_v51 = vsel %vm1756_vm3, %v3676_v0, %v1753_v8 }
 0xef2   :  { %v1762_v21 = vsel %vm1759_vm4, %v1761_v9, %v1757_v51  ;;  %v1765_v10 = vmul.f32 %v3678_v11, %v1748_v3  ;;  %vm1770_vm5 = vweird.f32 %v3678_v11 }
 0xef3   :  { %v1763_v13 = vmul.f32 %v3672_v48, %v1762_v21  ;;  %vm1771_vm8 = vmor %vm1769_vm7, %vm1770_vm5 }
 0xef4   :  { %v1766_v14 = vsub.f32 1.0, %v1765_v10 }
 0xef5   :  { %3489 = vmatmul.msk.f32.vlgmr.msrb.gmra.mxu3 %vm254_vm2, %v1763_v13 }
 0xef6   :  { %v1767_v16 = vmul.f32 %v3678_v11, %v1766_v14  ;;  %2097 = vmatpush.msrb.mxu3 %v2075_v23 }
 0xef8   :  { %v1768_v52 = vadd.f32 %v3678_v11, %v1767_v16 }
 0xefa   :  { %v1772_v1 = vsel %vm1771_vm8, %v3678_v11, %v1768_v52 }
 0xefb   :  { %v1777_v20 = vsel %vm1774_vm9, %v1776_v53, %v1772_v1 }
 0xefc   :  { %v1778_v57 = vmul.f32 %v3674_v56, %v1777_v20  ;;  %v2138_v56 = vld [vmem:[#allocation5 + $0x1d8] sm:$0xff] }
 0xefd   :  { %3495 = vmatmul.msk.f32.vlgmr.msra.gmra.mxu3 %vm158_vm1, %v4211_v12 }
 0xefe   :  { %3490 = vmatmul.msk.f32.vlgmr.msra.gmra.mxu0 %vm254_vm2, %v1778_v57  ;;  %2222 = vmatpush.msra.mxu3 %v2204_v61 }
 0xeff   :  { %3499 = vmatpush.xpose.msk.msra.mxu0 %vm254_vm2, %v1891_v22 }
 0xf05   :  { %3496 = vmatmul.msk.f32.gmra.mxu3 %vm158_vm1, %v4220_v50 }
 0xf06   :  { %3498 = vmatmul.msk.f32.vlgmr.msrb.gmra.mxu0 %vm254_vm2, %v1855_v24  ;;  %v2203_v24 = vld [vmem:[#allocation5 + $0x2d0] sm:$0xff] }
 0xf07   :  { %2126 = vmatpush.msrb.mxu0 %v1826_v27  ;;  %2223 = vmatpush.msra.mxu3 %v2203_v24  ;;  %v2451_v27 = vld [vmem:[#allocation5 + $0x278] sm:$0xff] }
 0xf09   :  { %2224 = vmatpush.msra.mxu3 %v2202_v25 }
 0xf0e   :  { %3500 = vmatmul.msk.f32.vlgmr.msra.gmra.mxu0 %vm254_vm2, %v1858_v26  ;;  %v2201_v26 = vld [vmem:[#allocation5 + $0x2c0] sm:$0xff] }
 0xf0f   :  { %2225 = vmatpush.msra.mxu3 %v2201_v26 }
 0xf78   :  { %v1799_v42 = vpop.f32.mrf.mxu3 }
 0xf79   :  { %3505 = vmatmul.msk.f32.vlgmr.msrb.gmra.mxu0 %vm254_vm2, %v1799_v42 }
 0xf7b   :  { %v1822_v28 = vpop.f32.mrf.mxu0 }
 0xf80   :  { %v1920_v30 = vpop.f32.mrf.mxu3 }
 0xf81   :  { %v1921_v47 = vadd.f32 %v3608_v29, %v1920_v30  ;;  %3506 = vmatmul.msk.f32.gmra.mxu0 %vm254_vm2, %v1822_v28  ;;  %v2450_v28 = vld [vmem:[#allocation5 + $0x270] sm:$0xff]  ;;  %v2448_v30 = vld [vmem:[#allocation5 + $0x260] sm:$0xff] }
 0xf83   :  { %v1949_v31 = vpop.f32.mrf.mxu0  ;;  %2046 = vmatpush.msrb.mxu1 %v1921_v47 }
 0xf84   :  { %v1978_v32 = vmul.f32 0.35355338, %v1949_v31  ;;  %v3610_v31 = vld [vmem:[#allocation7 + $0x12] ss:$0 sm:$0xff] }
 0xf85   :  { %2156 = vmatpush.msra.mxu1 %v2138_v56 }
 0xf86   :  { %v1980_v33 = vsel %vm254_vm2, %v1978_v32, -inf }
 0xf87   :  { %1981 = vmax.xlane.f32.xlu2 %v1980_v33  ;;  %2157 = vmatpush.msra.mxu1 %v2137_v58  ;;  %v3609_v33 = vld [vmem:[#allocation7 + $0xe] ss:$0 sm:$0xff] }
 0xf88   :  { %v1923_v34 = vpop.f32.mrf.mxu3 }
 0xf89   :  { %v1924_v35 = vadd.f32 %v3608_v29, %v1923_v34  ;;  %2158 = vmatpush.msra.mxu1 %v2136_v59  ;;  %v2449_v29 = vld [vmem:[#allocation5 + $0x268] sm:$0xff] }
 0xf8b   :  { %v1975_v36 = vpop.f32.mrf.mxu0  ;;  %2069 = vmatpush.msra.mxu2 %v1924_v35  ;;  %2159 = vmatpush.msra.mxu1 %v2135_v60 }
 0xf8c   :  { %v1979_v37 = vmul.f32 0.35355338, %v1975_v36 }
 0xf8d   :  { %2189 = vmatpush.msrb.mxu2 %v2171_v55 }
 0xf8e   :  { %v1983_v38 = vsel %vm254_vm2, %v1979_v37, -inf }
 0xf8f   :  { %1984 = vmax.xlane.f32.xlu1 %v1983_v38  ;;  %2190 = vmatpush.msrb.mxu2 %v2170_v62 }
 0xf91   :  { %2191 = vmatpush.msrb.mxu2 %v2169_v63 }
 0xf93   :  { %2192 = vmatpush.msrb.mxu2 %v2168_v2 }
 0xffa   :  { %v1982_v39 = vpop.xlane.xlu2 %1981 }
 0xffb   :  { %v1986_v40 = vsub.f32 %v1978_v32, %v1982_v39 }
 0xffd   :  { %v1988_v41 = vmul.f32 1.442695, %v1986_v40 }
 0xfff   :  { %3679 = vpow2.f32 %v1988_v41  ;;  %v4284_v41 = vpop.f32.mrf.mxu0 }
0x1002   :  { %v1985_v43 = vpop.xlane.xlu1 %1984 }
0x1003   :  { %v1987_v44 = vsub.f32 %v1979_v37, %v1985_v43 }
0x1005   :  { %v3680_v45 = vpop.eup %3679  ;;  %v1990_v46 = vmul.f32 1.442695, %v1987_v44  ;;  %v2382_v44 = vld [vmem:[#allocation8 + $0x30] sm:$0xff] }
0x1006   :  { %v1992_v48 = vsel %vm254_vm2, %v3680_v45, 0.0 }
0x1007   :  { %3681 = vpow2.f32 %v1990_v46  ;;  %1993 = vadd.xlane.f32.xlu1 %v1992_v48 }
0x100d   :  { %v3682_v49 = vpop.eup %3681 }
0x100e   :  { %v1995_v54 = vsel %vm254_vm2, %v3682_v49, 0.0 }
0x100f   :  { %1996 = vadd.xlane.f32.xlu0 %v1995_v54 }
0x107a   :  { %v1994_v0 = vpop.xlane.xlu1 %1993 }
0x107b   :  { %3683 = vrcp.f32 %v1994_v0  ;;  %v2009_v7 = vand.u32 2147483648, %v1994_v0  ;;  %v2007_v9 = vand.u32 2147483647, %v1994_v0  ;;  %vm2003_vm11 = vweird.f32 %v1994_v0 }
0x107d   :  { %v2010_v21 = vor.u32 1.1754944e-38, %v2009_v7  ;;  %vm2008_vm13 = vcmp.eq.f32.partialorder %v2007_v9, 8.507059e+37 }
0x1081   :  { %v3684_v3 = vpop.eup %3683 }
0x1082   :  { %v1999_v4 = vmul.f32 %v3684_v3, %v1994_v0  ;;  %v1997_v5 = vpop.xlane.xlu0 %1996  ;;  %vm2004_vm10 = vweird.f32 %v3684_v3 }
0x1083   :  { %3685 = vrcp.f32 %v1997_v5  ;;  %vm2005_vm12 = vmor %vm2003_vm11, %vm2004_vm10  ;;  %v2024_v17 = vand.u32 2147483648, %v1997_v5  ;;  %v2022_v53 = vand.u32 2147483647, %v1997_v5  ;;  %vm2018_vm15 = vweird.f32 %v1997_v5 }
0x1084   :  { %v2000_v6 = vsub.f32 1.0, %v1999_v4 }
0x1085   :  { %v2025_v1 = vor.u32 1.1754944e-38, %v2024_v17  ;;  %vm2023_vm3 = vcmp.eq.f32.partialorder %v2022_v53, 8.507059e+37  ;;  %v2416_v17 = vld [vmem:[#allocation5 + $0x1e8] sm:$0xff]  ;;  %v2484_v53 = vld [vmem:[#allocation5 + $0x2f8] sm:$0xff] }
0x1086   :  { %v2001_v8 = vmul.f32 %v3684_v3, %v2000_v6 }
0x1088   :  { %v2002_v11 = vadd.f32 %v3684_v3, %v2001_v8 }
0x1089   :  { %v3686_v51 = vpop.eup %3685 }
0x108a   :  { %v2006_v10 = vsel %vm2005_vm12, %v3684_v3, %v2002_v11  ;;  %v2014_v13 = vmul.f32 %v3686_v51, %v1997_v5  ;;  %vm2019_vm14 = vweird.f32 %v3686_v51  ;;  %v3612_v3 = vld [vmem:[#allocation7 + $0x13] ss:$0 sm:$0xff] }
0x108b   :  { %v2011_v14 = vsel %vm2008_vm13, %v2010_v21, %v2006_v10  ;;  %vm2020_vm0 = vmor %vm2018_vm15, %vm2019_vm14 }
0x108c   :  { %v2015_v15 = vsub.f32 1.0, %v2014_v13  ;;  %v2012_v16 = vmul.f32 %v3680_v45, %v2011_v14  ;;  %v2131_v45 = vpop.f32.mrf.mxu0 }
0x108e   :  { %v2016_v52 = vmul.f32 %v3686_v51, %v2015_v15  ;;  %3501 = vmatmul.msk.f32.vlgmr.msrb.gmra.mxu1 %vm254_vm2, %v2012_v16  ;;  %v2418_v15 = vld [vmem:[#allocation5 + $0x1f8] sm:$0xff]  ;;  %v2417_v16 = vld [vmem:[#allocation5 + $0x1f0] sm:$0xff] }
0x1090   :  { %v2017_v19 = vadd.f32 %v3686_v51, %v2016_v52  ;;  %v2415_v52 = vld [vmem:[#allocation5 + $0x1e0] sm:$0xff] }
0x1092   :  { %v2021_v20 = vsel %vm2020_vm0, %v3686_v51, %v2017_v19  ;;  %v2483_v19 = vld [vmem:[#allocation5 + $0x2f0] sm:$0xff] }
0x1093   :  { %v2026_v57 = vsel %vm2023_vm3, %v2025_v1, %v2021_v20  ;;  %v2482_v1 = vld [vmem:[#allocation5 + $0x2e8] sm:$0xff] }
0x1094   :  { %v2027_v22 = vmul.f32 %v3682_v49, %v2026_v57  ;;  %v3611_v49 = vld [vmem:[#allocation7 + $0x16] ss:$0 sm:$0xff]  ;;  %v2481_v57 = vld [vmem:[#allocation5 + $0x2e0] sm:$0xff] }
0x1096   :  { %3502 = vmatmul.msk.f32.vlgmr.msra.gmra.mxu2 %vm254_vm2, %v2027_v22  ;;  %3507 = vmatmul.msk.f32.vlgmr.msra.gmra.mxu1 %vm158_vm1, %v4211_v12 }
0x109e   :  { %3508 = vmatmul.msk.f32.gmra.mxu1 %vm158_vm1, %v4220_v50  ;;  %3509 = vmatmul.msk.f32.vlgmr.msrb.gmra.mxu2 %vm158_vm1, %v4211_v12 }
0x10a6   :  { %3510 = vmatmul.msk.f32.gmra.mxu2 %vm158_vm1, %v4220_v50 }
0x110b   :  { %v2048_v42 = vpop.f32.mrf.mxu1 }
0x110c   :  { %3503 = vmatmul.msk.f32.vlgmr.msrb.gmra.mxu3 %vm254_vm2, %v2048_v42 }
0x110d   :  { %2469 = vmatpush.msrb.mxu3 %v2451_v27 }
0x110f   :  { %2470 = vmatpush.msrb.mxu3 %v2450_v28 }
0x1111   :  { %2471 = vmatpush.msrb.mxu3 %v2449_v29 }
0x1113   :  { %2472 = vmatpush.msrb.mxu3 %v2448_v30  ;;  %v2161_v32 = vpop.f32.mrf.mxu1 }
0x1114   :  { %v2162_v36 = vadd.f32 %v3609_v33, %v2161_v32 }
0x1119   :  { %v2071_v47 = vpop.f32.mrf.mxu2 }
0x111a   :  { %3504 = vmatmul.msk.f32.gmra.mxu3 %vm254_vm2, %v2071_v47 }
0x111b   :  { %v2164_v38 = vpop.f32.mrf.mxu1 }
0x111c   :  { %v2165_v40 = vadd.f32 %v3609_v33, %v2164_v38 }
0x1121   :  { %v2194_v34 = vpop.f32.mrf.mxu2 }
0x1122   :  { %v2195_v35 = vadd.f32 %v3610_v31, %v2194_v34  ;;  %3511 = vmatmul.msk.f32.vlgmr.msra.gmra.mxu3 %vm158_vm1, %v4211_v12 }
0x1124   :  { %3513 = vmatpush.xpose.msk.msra.mxu0 %vm254_vm2, %v2195_v35 }
0x1127   :  { %3514 = vmatmul.msk.f32.vlgmr.msra.gmra.mxu0 %vm254_vm2, %v2162_v36 }
0x1129   :  { %v2197_v37 = vpop.f32.mrf.mxu2 }
0x112a   :  { %v2198_v39 = vadd.f32 %v3610_v31, %v2197_v37  ;;  %3512 = vmatmul.msk.f32.gmra.mxu3 %vm158_vm1, %v4220_v50 }
0x112c   :  { %3515 = vmatpush.xpose.msk.msrb.mxu1 %vm254_vm2, %v2198_v39 }
0x112f   :  { %3516 = vmatmul.msk.f32.vlgmr.msrb.gmra.mxu1 %vm254_vm2, %v2165_v40 }
0x1130   :  { %2404 = vmatpush.msra.mxu1 %v2382_v44 }
0x1132   :  { %3523 = vmatmul.msk.f32.vlgmr.msrb.gmra.mxu3 %vm158_vm1, %v4211_v12 }
0x113a   :  { %3524 = vmatmul.msk.f32.gmra.mxu3 %vm158_vm1, %v4220_v50 }
0x118f   :  { %v4286_v43 = vpop.f32.mrf.mxu3 }
0x119d   :  { %v2102_v46 = vpop.f32.mrf.mxu3 }
0x119e   :  { %v4288_v48 = vadd.f32 %v2131_v45, %v2102_v46 }
0x11a4   :  { %v2256_v54 = vpop.f32.mrf.mxu0 }
0x11a5   :  { %v2285_v56 = vmul.f32 0.35355338, %v2256_v54  ;;  %v2227_v58 = vpop.f32.mrf.mxu3 }
0x11a6   :  { %v2228_v59 = vadd.f32 %v3611_v49, %v2227_v58 }
0x11a7   :  { %v2287_v60 = vsel %vm254_vm2, %v2285_v56, -inf }
0x11a8   :  { %2288 = vmax.xlane.f32.xlu2 %v2287_v60  ;;  %2353 = vmatpush.msra.mxu2 %v2228_v59  ;;  %v3613_v60 = vld [vmem:[#allocation7 + $0xf] ss:$0 sm:$0xff] }
0x11aa   :  { %2436 = vmatpush.msrb.mxu2 %v2418_v15 }
0x11ac   :  { %v2282_v55 = vpop.f32.mrf.mxu1  ;;  %2437 = vmatpush.msrb.mxu2 %v2417_v16 }
0x11ad   :  { %v2286_v62 = vmul.f32 0.35355338, %v2282_v55  ;;  %v2230_v63 = vpop.f32.mrf.mxu3 }
0x11ae   :  { %v2231_v0 = vadd.f32 %v3611_v49, %v2230_v63  ;;  %2438 = vmatpush.msrb.mxu2 %v2416_v17 }
0x11af   :  { %v2290_v2 = vsel %vm254_vm2, %v2286_v62, -inf }
0x11b0   :  { %2291 = vmax.xlane.f32.xlu0 %v2290_v2  ;;  %2376 = vmatpush.msrb.mxu0 %v2231_v0 }
0x11b1   :  { %2439 = vmatpush.msrb.mxu2 %v2415_v52 }
0x11b2   :  { %2502 = vmatpush.msra.mxu0 %v2484_v53 }
0x11b4   :  { %2503 = vmatpush.msra.mxu0 %v2483_v19 }
0x11b5   :  { %v2474_v4 = vpop.f32.mrf.mxu3 }
0x11b6   :  { %v2475_v5 = vadd.f32 %v3612_v3, %v2474_v4  ;;  %2504 = vmatpush.msra.mxu0 %v2482_v1  ;;  %v2129_v4 = vadd.f32 %v4284_v41, %v4286_v43 }
0x11b8   :  { %3527 = vmatpush.xpose.msk.msrb.mxu1 %vm254_vm2, %v2475_v5  ;;  %2505 = vmatpush.msra.mxu0 %v2481_v57 }
0x11bd   :  { %v2477_v30 = vpop.f32.mrf.mxu3 }
0x11be   :  { %v2478_v35 = vadd.f32 %v3612_v3, %v2477_v30 }
0x121b   :  { %v2289_v6 = vpop.xlane.xlu2 %2288 }
0x121c   :  { %v2293_v7 = vsub.f32 %v2285_v56, %v2289_v6  ;;  %v3614_v56 = vld [vmem:[#allocation7 + $0x17] ss:$0 sm:$0xff] }
0x121e   :  { %v2295_v8 = vmul.f32 1.442695, %v2293_v7 }
0x1220   :  { %3687 = vpow2.f32 %v2295_v8 }
0x1223   :  { %v2292_v9 = vpop.xlane.xlu0 %2291 }
0x1224   :  { %v2294_v11 = vsub.f32 %v2286_v62, %v2292_v9 }
0x1226   :  { %v3688_v51 = vpop.eup %3687  ;;  %v2297_v21 = vmul.f32 1.442695, %v2294_v11 }
0x1227   :  { %v2299_v10 = vsel %vm254_vm2, %v3688_v51, 0.0 }
0x1228   :  { %3689 = vpow2.f32 %v2297_v21  ;;  %2300 = vadd.xlane.f32.xlu1 %v2299_v10 }
0x122e   :  { %v3690_v13 = vpop.eup %3689 }
0x122f   :  { %v2302_v14 = vsel %vm254_vm2, %v3690_v13, 0.0 }
0x1230   :  { %2303 = vadd.xlane.f32.xlu2 %v2302_v14 }
0x129b   :  { %v2301_v20 = vpop.xlane.xlu1 %2300 }
0x129c   :  { %3691 = vrcp.f32 %v2301_v20  ;;  %v2316_v25 = vand.u32 2147483648, %v2301_v20  ;;  %v2314_v27 = vand.u32 2147483647, %v2301_v20  ;;  %vm2310_vm5 = vweird.f32 %v2301_v20 }
0x129e   :  { %v2317_v29 = vor.u32 1.1754944e-38, %v2316_v25  ;;  %vm2315_vm8 = vcmp.eq.f32.partialorder %v2314_v27, 8.507059e+37 }
0x12a2   :  { %v3692_v22 = vpop.eup %3691 }
0x12a3   :  { %v2306_v23 = vmul.f32 %v3692_v22, %v2301_v20  ;;  %v2304_v61 = vpop.xlane.xlu2 %2303  ;;  %vm2311_vm4 = vweird.f32 %v3692_v22 }
0x12a4   :  { %3693 = vrcp.f32 %v2304_v61  ;;  %vm2312_vm7 = vmor %vm2310_vm5, %vm2311_vm4  ;;  %v2331_v36 = vand.u32 2147483648, %v2304_v61  ;;  %v2329_v38 = vand.u32 2147483647, %v2304_v61  ;;  %vm2325_vm10 = vweird.f32 %v2304_v61 }
0x12a5   :  { %v2307_v24 = vsub.f32 1.0, %v2306_v23 }
0x12a6   :  { %v2332_v40 = vor.u32 1.1754944e-38, %v2331_v36  ;;  %vm2330_vm12 = vcmp.eq.f32.partialorder %v2329_v38, 8.507059e+37 }
0x12a7   :  { %v2308_v26 = vmul.f32 %v3692_v22, %v2307_v24 }
0x12a9   :  { %v2309_v42 = vadd.f32 %v3692_v22, %v2308_v26 }
0x12aa   :  { %v3694_v28 = vpop.eup %3693 }
0x12ab   :  { %v2313_v47 = vsel %vm2312_vm7, %v3692_v22, %v2309_v42  ;;  %v2321_v31 = vmul.f32 %v3694_v28, %v2304_v61  ;;  %vm2326_vm9 = vweird.f32 %v3694_v28 }
0x12ac   :  { %v2318_v32 = vsel %vm2315_vm8, %v2317_v29, %v2313_v47  ;;  %vm2327_vm11 = vmor %vm2325_vm10, %vm2326_vm9 }
0x12ad   :  { %v2322_v33 = vsub.f32 1.0, %v2321_v31  ;;  %v2319_v34 = vmul.f32 %v3688_v51, %v2318_v32 }
0x12af   :  { %v2323_v37 = vmul.f32 %v3694_v28, %v2322_v33  ;;  %3517 = vmatmul.msk.f32.vlgmr.msra.gmra.mxu2 %vm254_vm2, %v2319_v34 }
0x12b0   :  { %3529 = vmatpush.xpose.msk.msra.mxu2 %vm254_vm2, %v2478_v35 }
0x12b1   :  { %v2324_v39 = vadd.f32 %v3694_v28, %v2323_v37 }
0x12b3   :  { %v2328_v44 = vsel %vm2327_vm11, %v3694_v28, %v2324_v39 }
0x12b4   :  { %v2333_v45 = vsel %vm2330_vm12, %v2332_v40, %v2328_v44  ;;  %v2662_v40 = vld [vmem:[#allocation8 + $0x38] sm:$0xff] }
0x12b5   :  { %v2334_v46 = vmul.f32 %v3690_v13, %v2333_v45 }
0x12b7   :  { %3518 = vmatmul.msk.f32.vlgmr.msrb.gmra.mxu0 %vm254_vm2, %v2334_v46  ;;  %3521 = vmatmul.msk.f32.vlgmr.msrb.gmra.mxu2 %vm158_vm1, %v4211_v12  ;;  %v3615_v46 = vld [vmem:[%s4525_s8 + $0x6] ss:$0 sm:$0xff] }
0x12bf   :  { %3522 = vmatmul.msk.f32.gmra.mxu2 %vm158_vm1, %v4220_v50  ;;  %3525 = vmatmul.msk.f32.vlgmr.msra.gmra.mxu0 %vm158_vm1, %v4211_v12 }
0x12c7   :  { %3526 = vmatmul.msk.f32.gmra.mxu0 %vm158_vm1, %v4220_v50 }
0x1332   :  { %v2355_v49 = vpop.f32.mrf.mxu2 }
0x1333   :  { %3519 = vmatmul.msk.f32.vlgmr.msra.gmra.mxu1 %vm254_vm2, %v2355_v49 }
0x1334   :  { %v2378_v54 = vpop.f32.mrf.mxu0  ;;  %2684 = vmatpush.msra.mxu1 %v2662_v40  ;;  %v3554_v40 = vld [vmem:[%s4524_s7 + $0x78] sm:$0xff] }
0x133a   :  { %v2441_v58 = vpop.f32.mrf.mxu2 }
0x133b   :  { %3520 = vmatmul.msk.f32.gmra.mxu1 %vm254_vm2, %v2378_v54  ;;  %v2442_v62 = vadd.f32 %v3613_v60, %v2441_v58 }
0x133c   :  { %v2507_v59 = vpop.f32.mrf.mxu0 }
0x133d   :  { %v2508_v55 = vadd.f32 %v3614_v56, %v2507_v59 }
0x133f   :  { %2633 = vmatpush.msra.mxu3 %v2508_v55 }
0x1341   :  { %2916 = vmatpush.msrb.mxu3 %v3554_v40 }
0x1342   :  { %v2444_v63 = vpop.f32.mrf.mxu2 }
0x1343   :  { %v2445_v0 = vadd.f32 %v3613_v60, %v2444_v63  ;;  %3528 = vmatmul.msk.f32.vlgmr.msrb.gmra.mxu1 %vm254_vm2, %v2442_v62 }
0x1344   :  { %v2510_v2 = vpop.f32.mrf.mxu0 }
0x1345   :  { %v2511_v3 = vadd.f32 %v3614_v56, %v2510_v2  ;;  %3530 = vmatmul.msk.f32.vlgmr.msra.gmra.mxu2 %vm254_vm2, %v2445_v0 }
0x1347   :  { %2656 = vmatpush.msrb.mxu0 %v2511_v3 }
0x13b0   :  { %v2406_v5 = vpop.f32.mrf.mxu1 }
0x13b1   :  { %v4312_v6 = vadd.f32 %v2406_v5, %v2129_v4 }
0x13b8   :  { %v2409_v7 = vpop.f32.mrf.mxu1 }
0x13b9   :  { %v4315_v8 = vadd.f32 %v2409_v7, %v4288_v48 }
0x13c0   :  { %v2536_v9 = vpop.f32.mrf.mxu1 }
0x13c1   :  { %v2565_v11 = vmul.f32 0.35355338, %v2536_v9 }
0x13c3   :  { %v2567_v51 = vsel %vm254_vm2, %v2565_v11, -inf }
0x13c4   :  { %2568 = vmax.xlane.f32.xlu0 %v2567_v51  ;;  %v3540_v51 = vld [vmem:[%s4522_s5 + $0x30] sm:$0xff] }
0x13c8   :  { %v2562_v21 = vpop.f32.mrf.mxu2 }
0x13c9   :  { %v2566_v10 = vmul.f32 0.35355338, %v2562_v21  ;;  %v3539_v21 = vld [vmem:[%s4522_s5 + $0x28] sm:$0xff] }
0x13cb   :  { %v2570_v13 = vsel %vm254_vm2, %v2566_v10, -inf }
0x13cc   :  { %2571 = vmax.xlane.f32.xlu1 %v2570_v13 }
0x1437   :  { %v2569_v14 = vpop.xlane.xlu0 %2568 }
0x1438   :  { %v2573_v15 = vsub.f32 %v2565_v11, %v2569_v14 }
0x143a   :  { %v2575_v41 = vmul.f32 1.442695, %v2573_v15 }
0x143c   :  { %3695 = vpow2.f32 %v2575_v41 }
0x143f   :  { %v2572_v43 = vpop.xlane.xlu1 %2571 }
0x1440   :  { %v2574_v16 = vsub.f32 %v2566_v10, %v2572_v43  ;;  %v3538_v10 = vld [vmem:[%s4522_s5 + $0x20] sm:$0xff] }
0x1442   :  { %v3696_v17 = vpop.eup %3695  ;;  %v2577_v52 = vmul.f32 1.442695, %v2574_v16 }
0x1443   :  { %v2579_v48 = vsel %vm254_vm2, %v3696_v17, 0.0 }
0x1444   :  { %3697 = vpow2.f32 %v2577_v52  ;;  %2580 = vadd.xlane.f32.xlu2 %v2579_v48 }
0x144a   :  { %v3698_v53 = vpop.eup %3697 }
0x144b   :  { %v2582_v19 = vsel %vm254_vm2, %v3698_v53, 0.0 }
0x144c   :  { %2583 = vadd.xlane.f32.xlu0 %v2582_v19 }
0x14b7   :  { %v2581_v1 = vpop.xlane.xlu2 %2580 }
0x14b8   :  { %3699 = vrcp.f32 %v2581_v1  ;;  %v2596_v61 = vand.u32 2147483648, %v2581_v1  ;;  %v2594_v25 = vand.u32 2147483647, %v2581_v1  ;;  %vm2590_vm14 = vweird.f32 %v2581_v1 }
0x14ba   :  { %v2597_v42 = vor.u32 1.1754944e-38, %v2596_v61  ;;  %vm2595_vm0 = vcmp.eq.f32.partialorder %v2594_v25, 8.507059e+37 }
0x14be   :  { %v3700_v20 = vpop.eup %3699 }
0x14bf   :  { %v2586_v57 = vmul.f32 %v3700_v20, %v2581_v1  ;;  %v2584_v22 = vpop.xlane.xlu0 %2583  ;;  %vm2591_vm13 = vweird.f32 %v3700_v20 }
0x14c0   :  { %3701 = vrcp.f32 %v2584_v22  ;;  %vm2592_vm15 = vmor %vm2590_vm14, %vm2591_vm13  ;;  %v2611_v32 = vand.u32 2147483648, %v2584_v22  ;;  %v2609_v34 = vand.u32 2147483647, %v2584_v22  ;;  %vm2605_vm4 = vweird.f32 %v2584_v22 }
0x14c1   :  { %v2587_v23 = vsub.f32 1.0, %v2586_v57 }
0x14c2   :  { %v2612_v36 = vor.u32 1.1754944e-38, %v2611_v32  ;;  %vm2610_vm7 = vcmp.eq.f32.partialorder %v2609_v34, 8.507059e+37 }
0x14c3   :  { %v2588_v24 = vmul.f32 %v3700_v20, %v2587_v23 }
0x14c5   :  { %v2589_v26 = vadd.f32 %v3700_v20, %v2588_v24  ;;  %v3617_v24 = vld [vmem:[%s4525_s8 + $0x8] ss:$0 sm:$0xff] }
0x14c6   :  { %v3702_v27 = vpop.eup %3701 }
0x14c7   :  { %v2593_v28 = vsel %vm2592_vm15, %v3700_v20, %v2589_v26  ;;  %v2601_v29 = vmul.f32 %v3702_v27, %v2584_v22  ;;  %vm2606_vm3 = vweird.f32 %v3702_v27  ;;  %v3616_v22 = vld [vmem:[%s4525_s8 + $0x7] ss:$0 sm:$0xff] }
0x14c8   :  { %v2598_v30 = vsel %vm2595_vm0, %v2597_v42, %v2593_v28  ;;  %vm2607_vm5 = vmor %vm2605_vm4, %vm2606_vm3 }
0x14c9   :  { %v2599_v47 = vmul.f32 %v3696_v17, %v2598_v30  ;;  %v2602_v31 = vsub.f32 1.0, %v2601_v29 }
0x14cb   :  { %v2603_v33 = vmul.f32 %v3702_v27, %v2602_v31  ;;  %3531 = vmatmul.msk.f32.vlgmr.msra.gmra.mxu3 %vm254_vm2, %v2599_v47 }
0x14cd   :  { %v2604_v35 = vadd.f32 %v3702_v27, %v2603_v33  ;;  %v3618_v33 = vld [vmem:[%s4523_s6 + $0x1] ss:$0 sm:$0xff] }
0x14cf   :  { %v2608_v37 = vsel %vm2607_vm5, %v3702_v27, %v2604_v35 }
0x14d0   :  { %v2613_v38 = vsel %vm2610_vm7, %v2612_v36, %v2608_v37 }
0x14d1   :  { %v2614_v39 = vmul.f32 %v3698_v53, %v2613_v38 }
0x14d3   :  { %3532 = vmatmul.msk.f32.vlgmr.msrb.gmra.mxu0 %vm254_vm2, %v2614_v39 }
0x154e   :  { %v2635_v44 = vpop.f32.mrf.mxu3 }
0x154f   :  { %3533 = vmatmul.msk.f32.vlgmr.msra.gmra.mxu1 %vm254_vm2, %v2635_v44 }
0x1550   :  { %v2658_v45 = vpop.f32.mrf.mxu0 }
0x1557   :  { %3534 = vmatmul.msk.f32.gmra.mxu1 %vm254_vm2, %v2658_v45 }
0x15cc   :  { %v2686_v49 = vpop.f32.mrf.mxu1 }
0x15cd   :  { %v2692_v54 = vadd.f32 %v2686_v49, %v4312_v6  ;;  %v3553_v49 = vld [vmem:[%s4524_s7 + $0x70] sm:$0xff] }
0x15ce   :  { %2917 = vmatpush.msrb.mxu3 %v3553_v49 }
0x15cf   :  { %v2699_v56 = vadd.f32 %v3615_v46, %v2692_v54 }
0x15d1   :  { %v2701_v58 = vadd.f32 %v2699_v56, %v4211_v12 }
0x15d3   :  { %v2707_v59 = vsel %vm158_vm1, %v2701_v58, 0.0 }
0x15d4   :  { %2708 = vadd.xlane.f32.xlu1 %v2707_v59  ;;  %v2689_v60 = vpop.f32.mrf.mxu1  ;;  %v3552_v59 = vld [vmem:[%s4524_s7 + $0x68] sm:$0xff] }
0x15d5   :  { %v2693_v55 = vadd.f32 %v2689_v60, %v4315_v8  ;;  %2918 = vmatpush.msrb.mxu3 %v3552_v59 }
0x15d7   :  { %v2700_v62 = vadd.f32 %v3615_v46, %v2693_v55 }
0x15d9   :  { %v2702_v63 = vadd.f32 %v2700_v62, %v4220_v50  ;;  %v3541_v50 = vld [vmem:[%s4522_s5 + $0x38] sm:$0xff] }
0x15da   :  { %2789 = vmatpush.msrb.mxu2 %v3541_v50 }
0x15db   :  { %v2710_v0 = vsel %vm158_vm1, %v2702_v63, 0.0 }
0x15dc   :  { %2711 = vadd.xlane.f32.xlu2 %v2710_v0  ;;  %2790 = vmatpush.msrb.mxu2 %v3540_v51  ;;  %v3548_v51 = vld [vmem:[%s4524_s7 + $0x48] sm:$0xff] }
0x15de   :  { %2791 = vmatpush.msrb.mxu2 %v3539_v21 }
0x15e0   :  { %2792 = vmatpush.msrb.mxu2 %v3538_v10 }
0x1647   :  { %v2709_v2 = vpop.xlane.xlu1 %2708 }
0x1648   :  { %v2713_v3 = vmul.f32 %v2709_v2, %v4102_v18 }
0x164a   :  { %v2715_v4 = vsub.f32 %v2701_v58, %v2713_v3 }
0x164c   :  { %v2717_v5 = vmul.f32 %v2715_v4, %v2715_v4 }
0x164e   :  { %v2719_v6 = vsel %vm158_vm1, %v2717_v5, 0.0 }
0x164f   :  { %2720 = vadd.xlane.f32.xlu0 %v2719_v6  ;;  %v2712_v12 = vpop.xlane.xlu2 %2711 }
0x1650   :  { %v2714_v7 = vmul.f32 %v2712_v12, %v4102_v18 }
0x1652   :  { %v2716_v9 = vsub.f32 %v2702_v63, %v2714_v7  ;;  %v3551_v63 = vld [vmem:[%s4524_s7 + $0x60] sm:$0xff]  ;;  %v3549_v7 = vld [vmem:[%s4524_s7 + $0x50] sm:$0xff] }
0x1653   :  { %2919 = vmatpush.msrb.mxu3 %v3551_v63 }
0x1654   :  { %v2718_v11 = vmul.f32 %v2716_v9, %v2716_v9 }
0x1656   :  { %v2722_v8 = vsel %vm158_vm1, %v2718_v11, 0.0 }
0x1657   :  { %2723 = vadd.xlane.f32.xlu1 %v2722_v8 }
0x16c2   :  { %v2721_v13 = vpop.xlane.xlu0 %2720 }
0x16c3   :  { %v2725_v14 = vmul.f32 %v2721_v13, %v4102_v18 }
0x16c5   :  { %v2727_v15 = vadd.f32 1e-05, %v2725_v14  ;;  %v3547_v14 = vld [vmem:[%s4524_s7 + $0x40] sm:$0xff] }
0x16c7   :  { %3703 = vrsqrt.f32 %v2727_v15  ;;  %vm2735_vm8 = vweird.f32 %v2727_v15 }
0x16ca   :  { %v2724_v41 = vpop.xlane.xlu1 %2723 }
0x16cb   :  { %v2726_v43 = vmul.f32 %v2724_v41, %v4102_v18 }
0x16cd   :  { %v3704_v16 = vpop.eup %3703  ;;  %v2728_v17 = vadd.f32 1e-05, %v2726_v43 }
0x16ce   :  { %v2730_v52 = vmul.f32 %v3704_v16, %v2727_v15  ;;  %vm2736_vm2 = vweird.f32 %v3704_v16 }
0x16cf   :  { %3705 = vrsqrt.f32 %v2728_v17  ;;  %vm2737_vm9 = vmor %vm2735_vm8, %vm2736_vm2  ;;  %vm2745_vm11 = vweird.f32 %v2728_v17 }
0x16d0   :  { %v2731_v48 = vmul.f32 %v3704_v16, %v2730_v52 }
0x16d2   :  { %v2732_v53 = vmul.f32 0.5, %v2731_v48 }
0x16d4   :  { %v2733_v19 = vsub.f32 1.5, %v2732_v53 }
0x16d5   :  { %v3706_v1 = vpop.eup %3705 }
0x16d6   :  { %v2734_v20 = vmul.f32 %v3704_v16, %v2733_v19  ;;  %v2740_v57 = vmul.f32 %v3706_v1, %v2728_v17  ;;  %vm2746_vm10 = vweird.f32 %v3706_v1 }
0x16d7   :  { %vm2747_vm12 = vmor %vm2745_vm11, %vm2746_vm10 }
0x16d8   :  { %v2738_v23 = vsel %vm2737_vm9, %v3704_v16, %v2734_v20  ;;  %v2741_v61 = vmul.f32 %v3706_v1, %v2740_v57 }
0x16d9   :  { %v2749_v25 = vmul.f32 %v2738_v23, %v2715_v4  ;;  %v3550_v4 = vld [vmem:[%s4524_s7 + $0x58] sm:$0xff] }
0x16da   :  { %v2742_v26 = vmul.f32 0.5, %v2741_v61  ;;  %2920 = vmatpush.msrb.mxu3 %v3550_v4 }
0x16db   :  { %v2754_v27 = vmul.f32 %v3616_v22, %v2749_v25 }
0x16dc   :  { %v2743_v42 = vsub.f32 1.5, %v2742_v26  ;;  %2921 = vmatpush.msrb.mxu3 %v3549_v7 }
0x16dd   :  { %v4358_v28 = vadd.f32 %v3617_v24, %v2754_v27 }
0x16de   :  { %v2744_v29 = vmul.f32 %v3706_v1, %v2743_v42  ;;  %2922 = vmatpush.msrb.mxu3 %v3548_v51 }
0x16df   :  { %3543 = vmatmul.msk.f32.vlgmr.msrb.gmra.mxu2 %vm158_vm1, %v4358_v28 }
0x16e0   :  { %v2748_v30 = vsel %vm2747_vm12, %v3706_v1, %v2744_v29  ;;  %2923 = vmatpush.msrb.mxu3 %v3547_v14 }
0x16e1   :  { %v2750_v47 = vmul.f32 %v2748_v30, %v2716_v9 }
0x16e3   :  { %v2755_v31 = vmul.f32 %v3616_v22, %v2750_v47 }
0x16e5   :  { %v4362_v32 = vadd.f32 %v3617_v24, %v2755_v31 }
0x16e7   :  { %3544 = vmatmul.msk.f32.gmra.mxu2 %vm158_vm1, %v4362_v32 }
0x1762   :  { %v2794_v34 = vpop.f32.mrf.mxu2 }
0x1763   :  { %v4369_v35 = vadd.f32 %v3618_v33, %v2794_v34 }
0x1765   :  { %v4372_v36 = vmul.f32 0.70710677, %v4369_v35 }
0x1767   :  { %v2804_v37 = vmul.f32 %v4372_v36, %v4372_v36 }
0x1769   :  { %v2805_v38 = vmin.f32 %v2804_v37, 16.0 }
0x176a   :  { %v2797_v39 = vpop.f32.mrf.mxu2 }
0x176b   :  { %v2806_v44 = vmul.f32 2.1237322e-06, %v2805_v38  ;;  %v2817_v45 = vmul.f32 3.8918573e-05, %v2805_v38  ;;  %v4379_v46 = vadd.f32 %v3618_v33, %v2797_v39 }
0x176d   :  { %v2807_v54 = vadd.f32 0.00028619796, %v2806_v44  ;;  %v2818_v56 = vadd.f32 0.001143296, %v2817_v45  ;;  %v4385_v58 = vmul.f32 0.70710677, %v4379_v46 }
0x176f   :  { %v2808_v60 = vmul.f32 %v2807_v54, %v2805_v38  ;;  %v2819_v55 = vmul.f32 %v2818_v56, %v2805_v38  ;;  %v2844_v62 = vmul.f32 %v4385_v58, %v4385_v58 }
0x1771   :  { %v2820_v0 = vadd.f32 0.014752088, %v2819_v55  ;;  %v2809_v2 = vadd.f32 0.0036580483, %v2808_v60  ;;  %v2845_v3 = vmin.f32 %v2844_v62, 16.0 }
0x1773   :  { %v2821_v5 = vmul.f32 %v2820_v0, %v2805_v38  ;;  %v2846_v6 = vmul.f32 2.1237322e-06, %v2845_v3  ;;  %v2857_v12 = vmul.f32 3.8918573e-05, %v2845_v3  ;;  %v2810_v11 = vmul.f32 %v2809_v2, %v2805_v38 }
0x1774   :  { %v2800_v2 = vmul.f32 0.5, %v4369_v35  ;;  %v3619_v35 = vld [vmem:[%s4525_s8 + $0x9] ss:$0 sm:$0xff] }
0x1775   :  { %v2822_v9 = vadd.f32 0.112945676, %v2821_v5  ;;  %v2847_v8 = vadd.f32 0.00028619796, %v2846_v6  ;;  %v2858_v50 = vadd.f32 0.001143296, %v2857_v12 }
0x1776   :  { %v2811_v41 = vadd.f32 0.05243302, %v2810_v11 }
0x1777   :  { %v2823_v21 = vmul.f32 %v2822_v9, %v2805_v38  ;;  %v2848_v10 = vmul.f32 %v2847_v8, %v2845_v3  ;;  %v2859_v13 = vmul.f32 %v2858_v50, %v2845_v3  ;;  %v2801_v8 = vmul.f32 0.5, %v4379_v46 }
0x1778   :  { %v2812_v53 = vmul.f32 %v2811_v41, %v2805_v38 }
0x1779   :  { %v2824_v15 = vadd.f32 0.4994258, %v2823_v21  ;;  %v2860_v43 = vadd.f32 0.014752088, %v2859_v13  ;;  %v2849_v17 = vadd.f32 0.0036580483, %v2848_v10 }
0x177a   :  { %v2813_v57 = vadd.f32 0.18741608, %v2812_v53 }
0x177b   :  { %v2825_v16 = vmul.f32 %v2824_v15, %v2805_v38  ;;  %v2861_v52 = vmul.f32 %v2860_v43, %v2845_v3  ;;  %v2850_v1 = vmul.f32 %v2849_v17, %v2845_v3 }
0x177c   :  { %v2814_v25 = vmul.f32 %v2813_v57, %v2805_v38 }
0x177d   :  { %v2826_v48 = vadd.f32 1.0, %v2825_v16  ;;  %v2862_v19 = vadd.f32 0.112945676, %v2861_v52  ;;  %v2851_v23 = vadd.f32 0.05243302, %v2850_v1 }
0x177e   :  { %v2815_v47 = vadd.f32 1.1283791, %v2814_v25 }
0x177f   :  { %3707 = vrcp.f32 %v2826_v48  ;;  %v2863_v20 = vmul.f32 %v2862_v19, %v2845_v3  ;;  %v2852_v42 = vmul.f32 %v2851_v23, %v2845_v3  ;;  %v2838_v30 = vand.u32 2147483648, %v2826_v48 }
0x1780   :  { %v2836_v33 = vand.u32 2147483647, %v2826_v48  ;;  %vm2832_vm14 = vweird.f32 %v2826_v48  ;;  %v2816_v44 = vmul.f32 %v2815_v47, %v4372_v36 }
0x1781   :  { %v2864_v22 = vadd.f32 0.4994258, %v2863_v20  ;;  %v2853_v34 = vadd.f32 0.18741608, %v2852_v42  ;;  %v2839_v39 = vor.u32 1.1754944e-38, %v2838_v30 }
0x1782   :  { %vm2837_vm0 = vcmp.eq.f32.partialorder %v2836_v33, 8.507059e+37  ;;  %v3620_v33 = vld [vmem:[%s4525_s8 + $0xa] ss:$0 sm:$0xff] }
0x1783   :  { %v2865_v61 = vmul.f32 %v2864_v22, %v2845_v3  ;;  %v2854_v49 = vmul.f32 %v2853_v34, %v2845_v3 }
0x1785   :  { %v3708_v24 = vpop.eup %3707  ;;  %v2866_v27 = vadd.f32 1.0, %v2865_v61  ;;  %v2855_v62 = vadd.f32 1.1283791, %v2854_v49 }
0x1786   :  { %v2828_v26 = vmul.f32 %v3708_v24, %v2826_v48  ;;  %vm2833_vm13 = vweird.f32 %v3708_v24 }
0x1787   :  { %3709 = vrcp.f32 %v2866_v27  ;;  %vm2834_vm15 = vmor %vm2832_vm14, %vm2833_vm13  ;;  %v2878_v55 = vand.u32 2147483648, %v2866_v27  ;;  %v2876_v0 = vand.u32 2147483647, %v2866_v27  ;;  %vm2872_vm4 = vweird.f32 %v2866_v27 }
0x1788   :  { %v2829_v29 = vsub.f32 1.0, %v2828_v26  ;;  %v2856_v12 = vmul.f32 %v2855_v62, %v4385_v58 }
0x1789   :  { %v2879_v36 = vor.u32 1.1754944e-38, %v2878_v55  ;;  %vm2877_vm7 = vcmp.eq.f32.partialorder %v2876_v0, 8.507059e+37 }
0x178a   :  { %v2830_v31 = vmul.f32 %v3708_v24, %v2829_v29 }
0x178c   :  { %v2831_v37 = vadd.f32 %v3708_v24, %v2830_v31 }
0x178d   :  { %v3710_v40 = vpop.eup %3709 }
0x178e   :  { %v2835_v45 = vsel %vm2834_vm15, %v3708_v24, %v2831_v37  ;;  %v2868_v54 = vmul.f32 %v3710_v40, %v2866_v27  ;;  %vm2873_vm3 = vweird.f32 %v3710_v40 }
0x178f   :  { %v2840_v38 = vsel %vm2837_vm0, %v2839_v39, %v2835_v45  ;;  %vm2874_vm5 = vmor %vm2872_vm4, %vm2873_vm3 }
0x1790   :  { %v2841_v56 = vmul.f32 %v2840_v38, %v2816_v44  ;;  %v2869_v59 = vsub.f32 1.0, %v2868_v54 }
0x1792   :  { %v3545_v60 = vclamps-f32 %v2841_v56, 1.0  ;;  %v2870_v63 = vmul.f32 %v3710_v40, %v2869_v59 }
0x1794   :  { %v2884_v4 = vadd.f32 1.0, %v3545_v60  ;;  %v2871_v5 = vadd.f32 %v3710_v40, %v2870_v63 }
0x1796   :  { %v2886_v6 = vmul.f32 %v2884_v4, %v2800_v2  ;;  %v2875_v3 = vsel %vm2874_vm5, %v3710_v40, %v2871_v5  ;;  %v3621_v40 = vld [vmem:[%s4525_s8 + $0xb] ss:$0 sm:$0xff] }
0x1797   :  { %v2880_v7 = vsel %vm2877_vm7, %v2879_v36, %v2875_v3 }
0x1798   :  { %3556 = vmatmul.msk.f32.vlgmr.msrb.gmra.mxu3 %vm1482_vm6, %v2886_v6  ;;  %v2881_v9 = vmul.f32 %v2880_v7, %v2856_v12 }
0x179a   :  { %v3546_v11 = vclamps-f32 %v2881_v9, 1.0 }
0x179c   :  { %v2885_v50 = vadd.f32 1.0, %v3546_v11 }
0x179e   :  { %v2887_v51 = vmul.f32 %v2885_v50, %v2801_v8 }
0x17a0   :  { %3557 = vmatmul.msk.f32.gmra.mxu3 %vm1482_vm6, %v2887_v51 }
0x181b   :  { %v2925_v21 = vpop.f32.mrf.mxu3 }
0x181c   :  { %v2926_v10 = vadd.f32 %v3619_v35, %v2925_v21 }
0x181e   :  { %v2931_v58 = vadd.f32 %v2926_v10, %v4358_v28 }
0x1820   :  { %v2937_v13 = vsel %vm158_vm1, %v2931_v58, 0.0 }
0x1821   :  { %2938 = vadd.xlane.f32.xlu2 %v2937_v13 }
0x1823   :  { %v2928_v14 = vpop.f32.mrf.mxu3 }
0x1824   :  { %v2929_v15 = vadd.f32 %v3619_v35, %v2928_v14 }
0x1826   :  { %v2932_v41 = vadd.f32 %v2929_v15, %v4362_v32 }
0x1828   :  { %v2940_v46 = vsel %vm158_vm1, %v2932_v41, 0.0 }
0x1829   :  { %2941 = vadd.xlane.f32.xlu0 %v2940_v46 }
0x1894   :  { %v2939_v43 = vpop.xlane.xlu2 %2938 }
0x1895   :  { %v2943_v16 = vmul.f32 %v2939_v43, %v4102_v18  ;;  %v3622_v43 = vld [vmem:[%s4525_s8 + $0xc] ss:$0 sm:$0xff] }
0x1897   :  { %v2945_v17 = vsub.f32 %v2931_v58, %v2943_v16 }
0x1899   :  { %v2947_v52 = vmul.f32 %v2945_v17, %v2945_v17 }
0x189b   :  { %v2949_v48 = vsel %vm158_vm1, %v2947_v52, 0.0 }
0x189c   :  { %2950 = vadd.xlane.f32.xlu1 %v2949_v48  ;;  %v2942_v53 = vpop.xlane.xlu0 %2941 }
0x189d   :  { %v2944_v28 = vmul.f32 %v2942_v53, %v4102_v18 }
0x189f   :  { %v2946_v19 = vsub.f32 %v2932_v41, %v2944_v28 }
0x18a1   :  { %v2948_v1 = vmul.f32 %v2946_v19, %v2946_v19 }
0x18a3   :  { %v2952_v20 = vsel %vm158_vm1, %v2948_v1, 0.0 }
0x18a4   :  { %2953 = vadd.xlane.f32.xlu2 %v2952_v20 }
0x190f   :  { %v2951_v32 = vpop.xlane.xlu1 %2950 }
0x1910   :  { %v2955_v57 = vmul.f32 %v2951_v32, %v4102_v18 }
0x1912   :  { %v2957_v22 = vadd.f32 1e-05, %v2955_v57 }
0x1914   :  { %3711 = vrsqrt.f32 %v2957_v22  ;;  %vm2965_vm2 = vweird.f32 %v2957_v22 }
0x1917   :  { %v2954_v23 = vpop.xlane.xlu2 %2953 }
0x1918   :  { %v2956_v61 = vmul.f32 %v2954_v23, %v4102_v18 }
0x191a   :  { %v3712_v24 = vpop.eup %3711  ;;  %v2958_v26 = vadd.f32 1e-05, %v2956_v61 }
0x191b   :  { %v2960_v25 = vmul.f32 %v3712_v24, %v2957_v22  ;;  %vm2966_vm6 = vweird.f32 %v3712_v24 }
0x191c   :  { %3713 = vrsqrt.f32 %v2958_v26  ;;  %vm2967_vm8 = vmor %vm2965_vm2, %vm2966_vm6  ;;  %vm2975_vm10 = vweird.f32 %v2958_v26 }
0x191d   :  { %v2961_v27 = vmul.f32 %v3712_v24, %v2960_v25 }
0x191f   :  { %v2962_v42 = vmul.f32 0.5, %v2961_v27 }
0x1921   :  { %v2963_v29 = vsub.f32 1.5, %v2962_v42 }
0x1922   :  { %v3714_v30 = vpop.eup %3713 }
0x1923   :  { %v2964_v47 = vmul.f32 %v3712_v24, %v2963_v29  ;;  %v2970_v31 = vmul.f32 %v3714_v30, %v2958_v26  ;;  %vm2976_vm9 = vweird.f32 %v3714_v30 }
0x1924   :  { %vm2977_vm11 = vmor %vm2975_vm10, %vm2976_vm9 }
0x1925   :  { %v2968_v34 = vsel %vm2967_vm8, %v3712_v24, %v2964_v47  ;;  %v2971_v37 = vmul.f32 %v3714_v30, %v2970_v31 }
0x1926   :  { %v2979_v39 = vmul.f32 %v2968_v34, %v2945_v17 }
0x1927   :  { %v2972_v44 = vmul.f32 0.5, %v2971_v37 }
0x1928   :  { %v2984_v45 = vmul.f32 %v3620_v33, %v2979_v39 }
0x1929   :  { %v2973_v38 = vsub.f32 1.5, %v2972_v44 }
0x192a   :  { %v2989_v49 = vadd.f32 %v3621_v40, %v2984_v45 }
0x192b   :  { %v2974_v54 = vmul.f32 %v3714_v30, %v2973_v38 }
0x192c   :  { %v2995_v56 = vsel %vm158_vm1, %v2989_v49, 0.0 }
0x192d   :  { %2996 = vadd.xlane.f32.xlu0 %v2995_v56  ;;  %v2978_v59 = vsel %vm2977_vm11, %v3714_v30, %v2974_v54  ;;  %vm3149_vm11 = vcmask 1041409  }
0x192e   :  { %v2980_v60 = vmul.f32 %v2978_v59, %v2946_v19 }
0x1930   :  { %v2985_v55 = vmul.f32 %v3620_v33, %v2980_v60 }
0x1932   :  { %v2990_v62 = vadd.f32 %v3621_v40, %v2985_v55 }
0x1934   :  { %v2998_v63 = vsel %vm158_vm1, %v2990_v62, 0.0 }
0x1935   :  { %2999 = vadd.xlane.f32.xlu1 %v2998_v63 }
0x19a0   :  { %v2997_v0 = vpop.xlane.xlu0 %2996 }
0x19a1   :  { %v3001_v2 = vmul.f32 %v2997_v0, %v4102_v18 }
0x19a3   :  { %v3003_v4 = vsub.f32 %v2989_v49, %v3001_v2 }
0x19a5   :  { %v3005_v5 = vmul.f32 %v3003_v4, %v3003_v4 }
0x19a7   :  { %v3007_v6 = vsel %vm158_vm1, %v3005_v5, 0.0  ;;  %v3145_v5 = vld [vmem:[#allocation10 + $0x38] sm:$0xff] }
0x19a8   :  { %3008 = vadd.xlane.f32.xlu2 %v3007_v6  ;;  %v3000_v36 = vpop.xlane.xlu1 %2999  ;;  %3165 = vmatpush.msra.mxu0 %v3145_v5 }
0x19a9   :  { %v3002_v12 = vmul.f32 %v3000_v36, %v4102_v18 }
0x19ab   :  { %v3004_v3 = vsub.f32 %v2990_v62, %v3002_v12 }
0x19ad   :  { %v3006_v7 = vmul.f32 %v3004_v3, %v3004_v3 }
0x19af   :  { %v3010_v9 = vsel %vm158_vm1, %v3006_v7, 0.0  ;;  %v3201_v7 = vld [vmem:[#allocation10 + $0x58] sm:$0xff] }
0x19b0   :  { %3011 = vadd.xlane.f32.xlu0 %v3010_v9  ;;  %v3232_v9 = vld [vmem:[#allocation10 + $0x78] sm:$0xff]  ;;  %3219 = vmatpush.msrb.mxu1 %v3201_v7 }
0x19b1   :  { %3250 = vmatpush.msra.mxu2 %v3232_v9 }
0x1a1b   :  { %v3009_v11 = vpop.xlane.xlu2 %3008 }
0x1a1c   :  { %v3013_v8 = vmul.f32 %v3009_v11, %v4102_v18 }
0x1a1e   :  { %v3015_v50 = vadd.f32 1e-05, %v3013_v8 }
0x1a20   :  { %3715 = vrsqrt.f32 %v3015_v50  ;;  %vm3023_vm13 = vweird.f32 %v3015_v50 }
0x1a23   :  { %v3012_v51 = vpop.xlane.xlu0 %3011 }
0x1a24   :  { %v3014_v35 = vmul.f32 %v3012_v51, %v4102_v18  ;;  %v3623_v18 = vld [vmem:[%s4525_s8 + $0xd] ss:$0 sm:$0xff]  ;;  %v3143_v51 = vld [vmem:[#allocation10 + $0x28] sm:$0xff] }
0x1a26   :  { %v3716_v21 = vpop.eup %3715  ;;  %v3016_v58 = vadd.f32 1e-05, %v3014_v35  ;;  %v3200_v35 = vld [vmem:[#allocation10 + $0x50] sm:$0xff] }
0x1a27   :  { %v3018_v10 = vmul.f32 %v3716_v21, %v3015_v50  ;;  %vm3024_vm12 = vweird.f32 %v3716_v21  ;;  %v3356_v50 = vld [vmem:[#allocation10 + $0xf8] sm:$0xff]  ;;  %3220 = vmatpush.msrb.mxu1 %v3200_v35 }
0x1a28   :  { %3717 = vrsqrt.f32 %v3016_v58  ;;  %vm3025_vm14 = vmor %vm3023_vm13, %vm3024_vm12  ;;  %vm3033_vm0 = vweird.f32 %v3016_v58  ;;  %3374 = vmatpush.msra.mxu3 %v3356_v50 }
0x1a29   :  { %v3019_v13 = vmul.f32 %v3716_v21, %v3018_v10 }
0x1a2b   :  { %v3020_v14 = vmul.f32 0.5, %v3019_v13  ;;  %v3142_v13 = vld [vmem:[#allocation10 + $0x20] sm:$0xff] }
0x1a2d   :  { %v3021_v15 = vsub.f32 1.5, %v3020_v14  ;;  %v3199_v14 = vld [vmem:[#allocation10 + $0x48] sm:$0xff] }
0x1a2e   :  { %v3718_v41 = vpop.eup %3717  ;;  %3221 = vmatpush.msrb.mxu1 %v3199_v14 }
0x1a2f   :  { %v3022_v46 = vmul.f32 %v3716_v21, %v3021_v15  ;;  %v3028_v16 = vmul.f32 %v3718_v41, %v3016_v58  ;;  %vm3034_vm15 = vweird.f32 %v3718_v41  ;;  %v3355_v58 = vld [vmem:[#allocation10 + $0xf0] sm:$0xff] }
0x1a30   :  { %vm3035_vm3 = vmor %vm3033_vm0, %vm3034_vm15  ;;  %3375 = vmatpush.msra.mxu3 %v3355_v58 }
0x1a31   :  { %v3026_v17 = vsel %vm3025_vm14, %v3716_v21, %v3022_v46  ;;  %v3029_v48 = vmul.f32 %v3718_v41, %v3028_v16  ;;  %v3231_v21 = vld [vmem:[#allocation10 + $0x70] sm:$0xff]  ;;  %v3354_v46 = vld [vmem:[#allocation10 + $0xe8] sm:$0xff] }
0x1a32   :  { %v3037_v52 = vmul.f32 %v3026_v17, %v3003_v4  ;;  %3251 = vmatpush.msra.mxu2 %v3231_v21  ;;  %v3140_v17 = vld [vmem:[#allocation10 + $0x18] sm:$0xff]  ;;  %3376 = vmatpush.msra.mxu3 %v3354_v46 }
0x1a33   :  { %v3030_v28 = vmul.f32 0.5, %v3029_v48  ;;  %v3353_v48 = vld [vmem:[#allocation10 + $0xe0] sm:$0xff] }
0x1a34   :  { %v3042_v53 = vmul.f32 %v3622_v43, %v3037_v52  ;;  %v3229_v52 = vld [vmem:[#allocation10 + $0x60] sm:$0xff]  ;;  %3377 = vmatpush.msra.mxu3 %v3353_v48 }
0x1a35   :  { %v3031_v1 = vsub.f32 1.5, %v3030_v28 }
0x1a36   :  { %v4446_v19 = vadd.f32 %v3623_v18, %v3042_v53 }
0x1a37   :  { %v3032_v32 = vmul.f32 %v3718_v41, %v3031_v1 }
0x1a38   :  { %v4449_v20 = vmul.f32 0.70710677, %v4446_v19  ;;  %v3049_v50 = vmul.f32 0.5, %v4446_v19  ;;  %v3262_v19 = vld [vmem:[#allocation10 + $0x90] sm:$0xff] }
0x1a39   :  { %v3036_v22 = vsel %vm3035_vm3, %v3718_v41, %v3032_v32  ;;  %v3230_v41 = vld [vmem:[#allocation10 + $0x68] sm:$0xff]  ;;  %v3139_v32 = vld [vmem:[#allocation10 + $0x10] sm:$0xff] }
0x1a3a   :  { %v3053_v57 = vmul.f32 %v4449_v20, %v4449_v20  ;;  %v3038_v23 = vmul.f32 %v3036_v22, %v3004_v3  ;;  %v3144_v3 = vld [vmem:[#allocation10 + $0x30] sm:$0xff]  ;;  %3252 = vmatpush.msra.mxu2 %v3230_v41  ;;  %v3325_v22 = vld [vmem:[#allocation10 + $0xd8] sm:$0xff] }
0x1a3b   :  { %3166 = vmatpush.msra.mxu0 %v3144_v3 }
0x1a3c   :  { %v4453_v61 = vmin.f32 %v3053_v57, 16.0  ;;  %v3043_v24 = vmul.f32 %v3622_v43, %v3038_v23  ;;  %3253 = vmatpush.msra.mxu2 %v3229_v52  ;;  %v3294_v57 = vld [vmem:[#allocation10 + $0xb8] sm:$0xff] }
0x1a3d   :  { %3167 = vmatpush.msra.mxu0 %v3143_v51 }
0x1a3e   :  { %v3055_v25 = vmul.f32 2.1237322e-06, %v4453_v61  ;;  %v3066_v26 = vmul.f32 3.8918573e-05, %v4453_v61  ;;  %v4457_v27 = vadd.f32 %v3623_v18, %v3043_v24  ;;  %v3198_v18 = vld [vmem:[#allocation10 + $0x40] sm:$0xff]  ;;  %3343 = vmatpush.msrb.mxu2 %v3325_v22 }
0x1a3f   :  { %3168 = vmatpush.msra.mxu0 %v3142_v13  ;;  %3222 = vmatpush.msrb.mxu1 %v3198_v18 }
0x1a40   :  { %v3056_v42 = vadd.f32 0.00028619796, %v3055_v25  ;;  %v3067_v29 = vadd.f32 0.001143296, %v3066_v26  ;;  %v4460_v30 = vmul.f32 0.70710677, %v4457_v27 }
0x1a41   :  { %3189 = vmatpush.msrb.mxu0 %v3140_v17  ;;  %3312 = vmatpush.msra.mxu1 %v3294_v57  ;;  %v3138_v26 = vld [vmem:[#allocation10 + $0x8] sm:$0xff] }
0x1a42   :  { %v3057_v47 = vmul.f32 %v3056_v42, %v4453_v61  ;;  %v3068_v31 = vmul.f32 %v3067_v29, %v4453_v61  ;;  %v3093_v33 = vmul.f32 %v4460_v30, %v4460_v30  ;;  %v3293_v42 = vld [vmem:[#allocation10 + $0xb0] sm:$0xff] }
0x1a43   :  { %3190 = vmatpush.msrb.mxu0 %v3139_v32  ;;  %v3324_v29 = vld [vmem:[#allocation10 + $0xd0] sm:$0xff]  ;;  %3313 = vmatpush.msra.mxu1 %v3293_v42 }
0x1a44   :  { %v3058_v34 = vadd.f32 0.0036580483, %v3057_v47  ;;  %v3069_v37 = vadd.f32 0.014752088, %v3068_v31  ;;  %v4466_v39 = vmin.f32 %v3093_v33, 16.0  ;;  %v3137_v47 = vld [vmem:[#allocation10] sm:$0xff]  ;;  %3344 = vmatpush.msrb.mxu2 %v3324_v29 }
0x1a45   :  { %v3292_v31 = vld [vmem:[#allocation10 + $0xa8] sm:$0xff]  ;;  %3191 = vmatpush.msrb.mxu0 %v3138_v26 }
0x1a46   :  { %v3070_v40 = vmul.f32 %v3069_v37, %v4453_v61  ;;  %v3095_v44 = vmul.f32 2.1237322e-06, %v4466_v39  ;;  %v3106_v45 = vmul.f32 3.8918573e-05, %v4466_v39  ;;  %v3059_v38 = vmul.f32 %v3058_v34, %v4453_v61  ;;  %3314 = vmatpush.msra.mxu1 %v3292_v31 }
0x1a47   :  { %3192 = vmatpush.msrb.mxu0 %v3137_v47 }
0x1a48   :  { %v3071_v49 = vadd.f32 0.112945676, %v3070_v40  ;;  %v3096_v54 = vadd.f32 0.00028619796, %v3095_v44  ;;  %v3107_v56 = vadd.f32 0.001143296, %v3106_v45 }
0x1a49   :  { %v3060_v62 = vadd.f32 0.05243302, %v3059_v38  ;;  %v3291_v38 = vld [vmem:[#allocation10 + $0xa0] sm:$0xff] }
0x1a4a   :  { %v3072_v59 = vmul.f32 %v3071_v49, %v4453_v61  ;;  %v3097_v60 = vmul.f32 %v3096_v54, %v4466_v39  ;;  %v3108_v55 = vmul.f32 %v3107_v56, %v4466_v39  ;;  %v3322_v49 = vld [vmem:[#allocation10 + $0xc0] sm:$0xff]  ;;  %3315 = vmatpush.msra.mxu1 %v3291_v38 }
0x1a4b   :  { %v3061_v36 = vmul.f32 %v3060_v62, %v4453_v61 }
0x1a4c   :  { %v3073_v63 = vadd.f32 0.4994258, %v3072_v59  ;;  %v3098_v0 = vadd.f32 0.0036580483, %v3097_v60  ;;  %v3109_v2 = vadd.f32 0.014752088, %v3108_v55 }
0x1a4d   :  { %v3062_v15 = vadd.f32 0.18741608, %v3061_v36 }
0x1a4e   :  { %v3074_v4 = vmul.f32 %v3073_v63, %v4453_v61  ;;  %v3110_v6 = vmul.f32 %v3109_v2, %v4466_v39  ;;  %v3099_v11 = vmul.f32 %v3098_v0, %v4466_v39 }
0x1a4f   :  { %v3063_v1 = vmul.f32 %v3062_v15, %v4453_v61  ;;  %v3323_v61 = vld [vmem:[#allocation10 + $0xc8] sm:$0xff] }
0x1a50   :  { %v4478_v12 = vadd.f32 1.0, %v3074_v4  ;;  %v3111_v8 = vadd.f32 0.112945676, %v3110_v6  ;;  %v3100_v43 = vadd.f32 0.05243302, %v3099_v11  ;;  %3345 = vmatpush.msrb.mxu2 %v3323_v61 }
0x1a51   :  { %v3064_v34 = vadd.f32 1.1283791, %v3063_v1  ;;  %v3260_v1 = vld [vmem:[#allocation10 + $0x80] sm:$0xff] }
0x1a52   :  { %3719 = vrcp.f32 %v4478_v12  ;;  %v3112_v10 = vmul.f32 %v3111_v8, %v4466_v39  ;;  %v3101_v24 = vmul.f32 %v3100_v43, %v4466_v39  ;;  %v3087_v37 = vand.u32 2147483648, %v4478_v12  ;;  %3346 = vmatpush.msrb.mxu2 %v3322_v49  ;;  %v3263_v43 = vld [vmem:[#allocation10 + $0x98] sm:$0xff] }
0x1a53   :  { %v3085_v44 = vand.u32 2147483647, %v4478_v12  ;;  %vm3081_vm5 = vweird.f32 %v4478_v12  ;;  %v3065_v60 = vmul.f32 %v3064_v34, %v4449_v20 }
0x1a54   :  { %v3113_v16 = vadd.f32 0.4994258, %v3112_v10  ;;  %v3102_v45 = vadd.f32 0.18741608, %v3101_v24  ;;  %v3088_v56 = vor.u32 1.1754944e-38, %v3087_v37  ;;  %v3050_v10 = vmul.f32 0.5, %v4457_v27 }
0x1a55   :  { %vm3086_vm6 = vcmp.eq.f32.partialorder %v3085_v44, 8.507059e+37 }
0x1a56   :  { %v3114_v53 = vmul.f32 %v3113_v16, %v4466_v39  ;;  %v3103_v62 = vmul.f32 %v3102_v45, %v4466_v39 }
0x1a58   :  { %v3720_v28 = vpop.eup %3719  ;;  %v3115_v25 = vadd.f32 1.0, %v3114_v53  ;;  %v3104_v5 = vadd.f32 1.1283791, %v3103_v62  ;;  %v3261_v53 = vld [vmem:[#allocation10 + $0x88] sm:$0xff] }
0x1a59   :  { %v3077_v23 = vmul.f32 %v3720_v28, %v4478_v12  ;;  %vm3082_vm4 = vweird.f32 %v3720_v28 }
0x1a5a   :  { %3721 = vrcp.f32 %v3115_v25  ;;  %vm3083_vm7 = vmor %vm3081_vm5, %vm3082_vm4  ;;  %v3127_v6 = vand.u32 2147483648, %v3115_v25  ;;  %v3125_v12 = vand.u32 2147483647, %v3115_v25  ;;  %vm3121_vm8 = vweird.f32 %v3115_v25 }
0x1a5b   :  { %v3078_v33 = vsub.f32 1.0, %v3077_v23  ;;  %v3105_v20 = vmul.f32 %v3104_v5, %v4460_v30 }
0x1a5c   :  { %v3128_v9 = vor.u32 1.1754944e-38, %v3127_v6  ;;  %vm3126_vm10 = vcmp.eq.f32.partialorder %v3125_v12, 8.507059e+37 }
0x1a5d   :  { %v3079_v40 = vmul.f32 %v3720_v28, %v3078_v33 }
0x1a5f   :  { %v3080_v54 = vadd.f32 %v3720_v28, %v3079_v40 }
0x1a60   :  { %v3722_v59 = vpop.eup %3721 }
0x1a61   :  { %v3084_v55 = vsel %vm3083_vm7, %v3720_v28, %v3080_v54  ;;  %v3117_v0 = vmul.f32 %v3722_v59, %v3115_v25  ;;  %vm3122_vm2 = vweird.f32 %v3722_v59 }
0x1a62   :  { %v3089_v63 = vsel %vm3086_vm6, %v3088_v56, %v3084_v55  ;;  %vm3123_vm9 = vmor %vm3121_vm8, %vm3122_vm2 }
0x1a63   :  { %v3090_v2 = vmul.f32 %v3089_v63, %v3065_v60  ;;  %v3118_v4 = vsub.f32 1.0, %v3117_v0  ;;  %v3624_v60 = vld [vmem:[%s4525_s8 + $0xe] ss:$0 sm:$0xff] }
0x1a65   :  { %v3562_v36 = vclamps-f32 %v3090_v2, 1.0  ;;  %v3119_v3 = vmul.f32 %v3722_v59, %v3118_v4 }
0x1a67   :  { %v3120_v7 = vadd.f32 %v3722_v59, %v3119_v3  ;;  %v3133_v11 = vadd.f32 1.0, %v3562_v36 }
0x1a69   :  { %v3124_v8 = vsel %vm3123_vm9, %v3722_v59, %v3120_v7  ;;  %v3135_v35 = vmul.f32 %v3133_v11, %v3049_v50 }
0x1a6a   :  { %v3129_v39 = vsel %vm3126_vm10, %v3128_v9, %v3124_v8 }
0x1a6b   :  { %v3130_v51 = vmul.f32 %v3129_v39, %v3105_v20  ;;  %v3148_v14 = vrot.slane %v3135_v35, 1  ;;  %v3202_v15 = vrot.slane %v3135_v35, 2  ;;  %v3233_v41 = vrot.slane %v3135_v35, 3 }
0x1a6c   :  { %v3357_v46 = vrot.slane %v3135_v35, 7  ;;  %v3295_v23 = vrot.slane %v3135_v35, 5  ;;  %v3326_v24 = vrot.slane %v3135_v35, 6  ;;  %v3264_v29 = vrot.slane %v3135_v35, 4 }
0x1a6d   :  { %v3563_v21 = vclamps-f32 %v3130_v51, 1.0 }
0x1a6f   :  { %v3134_v58 = vadd.f32 1.0, %v3563_v21 }
0x1a71   :  { %v3136_v13 = vmul.f32 %v3134_v58, %v3050_v10 }
0x1a73   :  { %v3150_v30 = vsel %vm3149_vm11, %v3136_v13, %v3148_v14  ;;  %v3203_v16 = vrot.slane %v3136_v13, 1  ;;  %v3234_v17 = vrot.slane %v3136_v13, 2  ;;  %v3358_v18 = vrot.slane %v3136_v13, 6 }
0x1a74   :  { %3564 = vmatmul.msk.f32.vlgmr.msra.gmra.mxu0 %vm158_vm1, %v3150_v30  ;;  %v3173_v28 = vrot.slane %v3136_v13, 7  ;;  %v3296_v32 = vrot.slane %v3136_v13, 4  ;;  %v3327_v57 = vrot.slane %v3136_v13, 5  ;;  %v3265_v42 = vrot.slane %v3136_v13, 3 }
0x1a75   :  { %v3204_v52 = vsel %vm3149_vm11, %v3203_v16, %v3202_v15  ;;  %v3235_v27 = vsel %vm3149_vm11, %v3234_v17, %v3233_v41  ;;  %v3359_v48 = vsel %vm3149_vm11, %v3358_v18, %v3357_v46  ;;  %3281 = vmatpush.msra.mxu0 %v3263_v43 }
0x1a76   :  { %3566 = vmatmul.msk.f32.vlgmr.msrb.gmra.mxu1 %vm158_vm1, %v3204_v52  ;;  %3567 = vmatmul.msk.f32.vlgmr.msra.gmra.mxu2 %vm158_vm1, %v3235_v27  ;;  %v3174_v22 = vsel %vm3149_vm11, %v3173_v28, %v3135_v35  ;;  %v3297_v25 = vsel %vm3149_vm11, %v3296_v32, %v3295_v23  ;;  %v3328_v26 = vsel %vm3149_vm11, %v3327_v57, %v3326_v24 }
0x1a77   :  { %3571 = vmatmul.msk.f32.vlgmr.msra.gmra.mxu3 %vm158_vm1, %v3359_v48  ;;  %3282 = vmatpush.msra.mxu0 %v3262_v19  ;;  %v3266_v47 = vsel %vm3149_vm11, %v3265_v42, %v3264_v29 }
0x1a79   :  { %3283 = vmatpush.msra.mxu0 %v3261_v53 }
0x1a7b   :  { %3284 = vmatpush.msra.mxu0 %v3260_v1 }
0x1a7c   :  { %3565 = vmatmul.msk.f32.vlgmr.msrb.gmra.mxu0 %vm158_vm1, %v3174_v22 }
0x1a7e   :  { %3569 = vmatmul.msk.f32.vlgmr.msra.gmra.mxu1 %vm158_vm1, %v3297_v25  ;;  %3570 = vmatmul.msk.f32.vlgmr.msrb.gmra.mxu2 %vm158_vm1, %v3328_v26 }
0x1a84   :  { %3568 = vmatmul.msk.f32.vlgmr.msra.gmra.mxu0 %vm158_vm1, %v3266_v47  ;;  %vm3389_vm1 = vcmask 9216  }
0x1af1   :  { %v3170_v31 = vpop.f32.mrf.mxu0 }
0x1af3   :  { %v3224_v33 = vpop.f32.mrf.mxu1 }
0x1af9   :  { %v3194_v61 = vpop.f32.mrf.mxu0  ;;  %v3255_v37 = vpop.f32.mrf.mxu2 }
0x1afa   :  { %v3195_v34 = vadd.f32 %v3194_v61, %v3170_v31  ;;  %v3379_v55 = vpop.f32.mrf.mxu3 }
0x1afb   :  { %v3317_v49 = vpop.f32.mrf.mxu1 }
0x1afc   :  { %v3227_v40 = vadd.f32 %v3224_v33, %v3195_v34 }
0x1afe   :  { %v3258_v44 = vadd.f32 %v3255_v37, %v3227_v40 }
0x1b01   :  { %v3286_v45 = vpop.f32.mrf.mxu0  ;;  %v3348_v56 = vpop.f32.mrf.mxu2 }
0x1b02   :  { %v3289_v38 = vadd.f32 %v3286_v45, %v3258_v44 }
0x1b04   :  { %v3320_v54 = vadd.f32 %v3317_v49, %v3289_v38 }
0x1b06   :  { %v3351_v59 = vadd.f32 %v3348_v56, %v3320_v54 }
0x1b08   :  { %v3382_v62 = vadd.f32 %v3379_v55, %v3351_v59 }
0x1b0a   :  { %v3388_v63 = vadd.f32 %v3624_v60, %v3382_v62 }
0x1b0c   :  { %3390 = vst.msk [vmem:[#allocation11] sm:$0x3] %vm3389_vm1, %v3388_v63 }
0x1b0d   :  { %3401 = dma.vmem_to_hbm [thread:$0]  %s3397_s21, 32, %s3399_s23, [#allocation4]  }
0x1b0e   :  { %3873 = dma.done.wait [#allocation4], 32  }
0x1b0f   :  { %3874 = vsyncadd [#allocation4], 4294967264 }
0x1b10   :  { %3406 = vsyncpa [#allocation3], 1 }
0x1b11   :  { %3407 = vsyncpa [#allocation6], 1 }
0x1b12   :  { %3408 = vsyncpa [#allocation9], 1 }
0x1b13   :  { %3409 = vsyncpa [#allocation4], 1 }

</bundles_post_ra>
